<compile_context>
chip_gen: v7x
topology: tpu7x:2x2x1
jax: 0.10.0
libtpu: 0.0.40
codegen_flags: <defaults>
</compile_context>

<pallas_src>
import functools

import jax
import jax.numpy as jnp
from jax.experimental import pallas as pl
from jax.experimental.pallas import tpu as pltpu


# --------------------------------------------------------------------------- #
# helpers: generation-aware sizing
# --------------------------------------------------------------------------- #
def _round_up(n, m):
    return ((n + m - 1) // m) * m


@functools.lru_cache(maxsize=None)
def _device_kind():
    try:
        return jax.devices()[0].device_kind.lower()
    except Exception:
        return ""


@functools.lru_cache(maxsize=None)
def _vmem_budget_bytes():
    """~80% of the physical per-core VMEM (headroom for compiler scratch)."""
    cap = None
    try:
        cap = int(pltpu.get_tpu_info().vmem_capacity_bytes)
    except Exception:
        cap = None
    if not cap or cap <= 0:
        cap = (64 if "v7" in _device_kind() else 128) * (1 << 20)
    return int(cap * 4 // 5)


def _batch_shards(bp, sublane):
    """Shard the recurrence over the 2 TensorCores of a v7x chip when the
    per-shard batch stays sublane aligned; on 1-TC chips a batch-shard axis is
    pure grid overhead, so keep a single shard."""
    if "v7" not in _device_kind():
        return 1
    return 2 if bp % (2 * sublane) == 0 else 1


def _resident_spec(shape, index_map):
    """BlockSpec for a block whose index never changes: single-buffered, which
    halves its VMEM footprint vs the default double buffering."""
    try:
        return pl.BlockSpec(shape, index_map, pipeline_mode=pl.Buffered(1))
    except Exception:  # older jax without pipeline_mode / Buffered
        return pl.BlockSpec(shape, index_map)


def _proj_tiles(n_rows, d_in, g, x_bytes, w_bytes, out_bytes, budget, row_align):
    """Row tile rm and N tile tn for the projection matmul, VMEM-budgeted."""
    tn = 128
    for cand in (2048, 1024, 512, 256):
        if g % cand == 0 and 2 * d_in * cand * w_bytes <= budget // 3:
            tn = cand
            break
    fixed = 2 * d_in * tn * w_bytes + 2 * tn * 4            # weight + bias tiles
    per_row = 2 * d_in * x_bytes + 2 * tn * out_bytes       # x tile + out tile
    rm = max(budget - fixed, per_row * row_align) // per_row
    rm = int(max(row_align, (rm // row_align) * row_align))
    rm = min(rm, 1024, _round_up(n_rows, row_align))
    return rm, tn


def _time_chunk(t, b, hp, g, gx_bytes, hseq_bytes, w_bytes, budget,
                extra_fixed=0, cap=64):
    """Largest tt dividing t such that the recurrence chunk fits the budget:
    2*tt*b*g (gx, double-buffered) + 2*tt*b*hp (hseq out, if any)
    + hp*g (W_hh, single-buffered) + 2*b*hp*4 (h/c scratch)."""
    fixed = hp * g * w_bytes + 2 * b * hp * 4 + extra_fixed
    per_t = 2 * b * g * gx_bytes + 2 * b * hp * hseq_bytes
    avail = max(budget - fixed, per_t)
    tt_max = int(max(1, min(avail // per_t, t, cap)))
    for tt in range(tt_max, 0, -1):
        if t % tt == 0:
            return tt
    return 1


# --------------------------------------------------------------------------- #
# Kernel 1: hoisted input projection  gates_x = x @ W_ih^T + (b_ih + b_hh)
# --------------------------------------------------------------------------- #
def _proj_kernel(x_ref, w_ref, b_ref, gx_ref):
    acc = jnp.dot(x_ref[...].astype(w_ref.dtype), w_ref[...],
                  preferred_element_type=jnp.float32)
    gx_ref[...] = (acc + b_ref[...].astype(jnp.float32)).astype(gx_ref.dtype)


def input_projection(x2d, w_t, bias, out_dtype):
    """x2d: (N, Din) rows = all (t, b) pairs; w_t: (Din, 4Hp); bias: (1, 4Hp)."""
    n, d_in = x2d.shape
    g = w_t.shape[1]
    budget = _vmem_budget_bytes()
    x_bytes = jnp.dtype(x2d.dtype).itemsize
    w_bytes = jnp.dtype(w_t.dtype).itemsize
    o_bytes = jnp.dtype(out_dtype).itemsize
    row_align = 16 if min(x_bytes, o_bytes) < 4 else 8
    rm, tn = _proj_tiles(n, d_in, g, x_bytes, w_bytes, o_bytes, budget, row_align)

    n_pad = _round_up(n, rm)
    if n_pad != n:                      # guarantee tileability (no whole-array block)
        x2d = jnp.pad(x2d, ((0, n_pad - n), (0, 0)))

    out = pl.pallas_call(
        _proj_kernel,
        out_shape=jax.ShapeDtypeStruct((n_pad, g), out_dtype),
        grid_spec=pltpu.PrefetchScalarGridSpec(
            num_scalar_prefetch=0,
            grid=(n_pad // rm, g // tn),
            in_specs=[
                pl.BlockSpec((rm, d_in), lambda i, j: (i, 0)),   # x rows
                pl.BlockSpec((d_in, tn), lambda i, j: (0, j)),   # weight N-tile
                pl.BlockSpec((1, tn), lambda i, j: (0, j)),      # bias N-tile
            ],
            out_specs=pl.BlockSpec((rm, tn), lambda i, j: (i, j)),
        ),
        compiler_params=pltpu.CompilerParams(
            dimension_semantics=("parallel", "parallel"),
            vmem_limit_bytes=budget,
        ),
    )(x2d, w_t, bias)
    return out[:n] if n_pad != n else out


# --------------------------------------------------------------------------- #
# Kernel 2: recurrence for intermediate layers (emits the full hidden sequence)
# --------------------------------------------------------------------------- #
def _lstm_recurrence_kernel(gx_ref, whh_ref, hseq_ref, h_ref, c_ref,
                            *, hidden, tt, unroll):
    @pl.when(pl.program_id(1) == 0)           # first time-chunk of this shard
    def _():
        h_ref[...] = jnp.zeros_like(h_ref)
        c_ref[...] = jnp.zeros_like(c_ref)

    whh = whh_ref[...]                        # (Hp, 4Hp), resident (Buffered(1))

    # TODO(synk): optional v5e micro-opt: weight-stationary W_hh via
    # pltpu.matmul_push_rhs / matmul_acc_lhs across the tt steps of a chunk.
    def body(t, carry):
        h, c = carry
        g = gx_ref[t].astype(jnp.float32) + jnp.dot(
            h.astype(whh.dtype), whh, preferred_element_type=jnp.float32)
        i_g = jax.nn.sigmoid(g[:, 0 * hidden:1 * hidden])
        f_g = jax.nn.sigmoid(g[:, 1 * hidden:2 * hidden])
        g_g = jnp.tanh(g[:, 2 * hidden:3 * hidden])
        o_g = jax.nn.sigmoid(g[:, 3 * hidden:4 * hidden])
        c = f_g * c + i_g * g_g
        h = o_g * jnp.tanh(c)
        hseq_ref[t] = h.astype(hseq_ref.dtype)
        return h, c

    h_fin, c_fin = jax.lax.fori_loop(0, tt, body, (h_ref[...], c_ref[...]),
                                     unroll=unroll)
    h_ref[...] = h_fin
    c_ref[...] = c_fin


def lstm_layer_seq(gx_tm, whh_t, *, out_dtype):
    """gx_tm: (T, B, 4Hp) time-major gates; returns (T, B, Hp) hidden sequence."""
    t_total, b, g = gx_tm.shape
    hidden = whh_t.shape[0]
    budget = _vmem_budget_bytes()
    gx_bytes = jnp.dtype(gx_tm.dtype).itemsize
    hs_bytes = jnp.dtype(out_dtype).itemsize
    sub = 16 if min(gx_bytes, hs_bytes) < 4 else 8
    nb = _batch_shards(b, sub)
    bb = b // nb
    tt = _time_chunk(t_total, bb, hidden, g, gx_bytes, hs_bytes,
                     jnp.dtype(whh_t.dtype).itemsize, budget)
    kernel = functools.partial(_lstm_recurrence_kernel, hidden=hidden, tt=tt,
                               unroll=min(tt, 8))
    return pl.pallas_call(
        kernel,
        out_shape=jax.ShapeDtypeStruct((t_total, b, hidden), out_dtype),
        grid_spec=pltpu.PrefetchScalarGridSpec(
            num_scalar_prefetch=0,
            grid=(nb, t_total // tt),
            in_specs=[
                pl.BlockSpec((tt, bb, g), lambda s, i: (i, s, 0)),   # gates chunk
                _resident_spec((hidden, g), lambda s, i: (0, 0)),    # W_hh, 1-buffered
            ],
            out_specs=pl.BlockSpec((tt, bb, hidden), lambda s, i: (i, s, 0)),
            scratch_shapes=[
                pltpu.VMEM((bb, hidden), jnp.float32),               # h state
                pltpu.VMEM((bb, hidden), jnp.float32),               # c state
            ],
        ),
        compiler_params=pltpu.CompilerParams(
            dimension_semantics=("parallel", "arbitrary"),
            vmem_limit_bytes=budget,
        ),
    )(gx_tm, whh_t)


# --------------------------------------------------------------------------- #
# Kernel 3: last layer recurrence fused with the final Linear (out[:, -1] @ W_fc)
# --------------------------------------------------------------------------- #
def _lstm_last_fc_kernel(gx_ref, whh_ref, wfc_ref, bfc_ref, out_ref,
                         h_ref, c_ref, *, hidden, tt, unroll):
    @pl.when(pl.program_id(1) == 0)
    def _():
        h_ref[...] = jnp.zeros_like(h_ref)
        c_ref[...] = jnp.zeros_like(c_ref)

    whh = whh_ref[...]

    def body(t, carry):
        h, c = carry
        g = gx_ref[t].astype(jnp.float32) + jnp.dot(
            h.astype(whh.dtype), whh, preferred_element_type=jnp.float32)
        i_g = jax.nn.sigmoid(g[:, 0 * hidden:1 * hidden])
        f_g = jax.nn.sigmoid(g[:, 1 * hidden:2 * hidden])
        g_g = jnp.tanh(g[:, 2 * hidden:3 * hidden])
        o_g = jax.nn.sigmoid(g[:, 3 * hidden:4 * hidden])
        c = f_g * c + i_g * g_g
        h = o_g * jnp.tanh(c)
        return h, c

    h_fin, c_fin = jax.lax.fori_loop(0, tt, body, (h_ref[...], c_ref[...]),
                                     unroll=unroll)
    h_ref[...] = h_fin
    c_ref[...] = c_fin

    @pl.when(pl.program_id(1) == pl.num_programs(1) - 1)
    def _():
        fc = jnp.dot(h_fin.astype(wfc_ref.dtype), wfc_ref[...],
                     preferred_element_type=jnp.float32)
        out_ref[...] = (fc + bfc_ref[...].astype(jnp.float32)).astype(out_ref.dtype)


def lstm_last_layer_fc(gx_tm, whh_t, wfc_t, bfc):
    """Last LSTM layer + fc(out[:, -1, :]).  Returns (B, output_dim) in f32."""
    t_total, b, g = gx_tm.shape
    hidden = whh_t.shape[0]
    out_dim = wfc_t.shape[1]
    budget = _vmem_budget_bytes()
    gx_bytes = jnp.dtype(gx_tm.dtype).itemsize
    sub = 16 if gx_bytes < 4 else 8
    nb = _batch_shards(b, sub)
    bb = b // nb
    extra = hidden * out_dim * jnp.dtype(wfc_t.dtype).itemsize + out_dim * 4 \
        + 2 * bb * out_dim * 4
    tt = _time_chunk(t_total, bb, hidden, g, gx_bytes, 0,
                     jnp.dtype(whh_t.dtype).itemsize, budget, extra_fixed=extra)
    kernel = functools.partial(_lstm_last_fc_kernel, hidden=hidden, tt=tt,
                               unroll=min(tt, 8))
    return pl.pallas_call(
        kernel,
        out_shape=jax.ShapeDtypeStruct((b, out_dim), jnp.float32),
        grid_spec=pltpu.PrefetchScalarGridSpec(
            num_scalar_prefetch=0,
            grid=(nb, t_total // tt),
            in_specs=[
                pl.BlockSpec((tt, bb, g), lambda s, i: (i, s, 0)),
                _resident_spec((hidden, g), lambda s, i: (0, 0)),       # W_hh
                _resident_spec((hidden, out_dim), lambda s, i: (0, 0)),  # W_fc
                _resident_spec((1, out_dim), lambda s, i: (0, 0)),       # b_fc
            ],
            out_specs=pl.BlockSpec((bb, out_dim), lambda s, i: (s, 0)),  # accumulator
            scratch_shapes=[
                pltpu.VMEM((bb, hidden), jnp.float32),
                pltpu.VMEM((bb, hidden), jnp.float32),
            ],
        ),
        compiler_params=pltpu.CompilerParams(
            dimension_semantics=("parallel", "arbitrary"),
            vmem_limit_bytes=budget,
        ),
    )(gx_tm, whh_t, wfc_t, bfc)


# --------------------------------------------------------------------------- #
# Parameters (PyTorch layout) + conversion to padded kernel layout
# --------------------------------------------------------------------------- #
def init_params(key, input_dim, hidden_dim, layer_dim, output_dim):
    """Mirrors nn.LSTM / nn.Linear shapes & init (U(-1/sqrt(H), 1/sqrt(H)))."""
    params = {"lstm": [], "fc": None}
    bound = 1.0 / jnp.sqrt(jnp.float32(hidden_dim))
    for layer in range(layer_dim):
        d_in = input_dim if layer == 0 else hidden_dim
        key, k1, k2, k3, k4 = jax.random.split(key, 5)
        params["lstm"].append({
            "w_ih": jax.random.uniform(k1, (4 * hidden_dim, d_in), jnp.float32, -bound, bound),
            "w_hh": jax.random.uniform(k2, (4 * hidden_dim, hidden_dim), jnp.float32, -bound, bound),
            "b_ih": jax.random.uniform(k3, (4 * hidden_dim,), jnp.float32, -bound, bound),
            "b_hh": jax.random.uniform(k4, (4 * hidden_dim,), jnp.float32, -bound, bound),
        })
    key, k5, k6 = jax.random.split(key, 3)
    params["fc"] = {
        "w": jax.random.uniform(k5, (output_dim, hidden_dim), jnp.float32, -bound, bound),
        "b": jax.random.uniform(k6, (output_dim,), jnp.float32, -bound, bound),
    }
    return params


def prepare_kernel_params(params, hidden_dim, dtype=jnp.float32, lane=128):
    """Pre-transpose weights and zero-pad the hidden dim (per gate) to a
    multiple of 128.  Padding is numerically exact: padded gate pre-activations
    are 0, so padded c/h units stay exactly 0 and never touch real outputs."""
    hp = _round_up(hidden_dim, lane)
    pad_h = hp - hidden_dim

    def pad_gate_rows(w):                                      # (4H, X) -> (4Hp, X)
        x = w.reshape(4, hidden_dim, w.shape[-1])
        x = jnp.pad(x, ((0, 0), (0, pad_h), (0, 0)))
        return x.reshape(4 * hp, w.shape[-1])

    layers = []
    for li, lp in enumerate(params["lstm"]):
        w_ih = pad_gate_rows(lp["w_ih"])                       # (4Hp, Din)
        if li > 0:                                             # prev layer output is Hp wide
            w_ih = jnp.pad(w_ih, ((0, 0), (0, pad_h)))         # (4Hp, Hp)
        w_hh = pad_gate_rows(lp["w_hh"])                       # (4Hp, H)
        w_hh = jnp.pad(w_hh, ((0, 0), (0, pad_h)))             # (4Hp, Hp)
        bias = (lp["b_ih"] + lp["b_hh"])[:, None]              # (4H, 1)
        bias = pad_gate_rows(bias).reshape(1, 4 * hp)          # (1, 4Hp)
        layers.append((
            jnp.transpose(w_ih).astype(dtype),                 # (Din[_p], 4Hp)
            jnp.transpose(w_hh).astype(dtype),                 # (Hp, 4Hp)
            bias.astype(jnp.float32),
        ))

    w_fc = jnp.pad(jnp.transpose(params["fc"]["w"]), ((0, pad_h), (0, 0)))   # (Hp, O)
    return {
        "layers": tuple(layers),
        "fc_w_t": w_fc.astype(dtype),
        "fc_b": params["fc"]["b"].reshape(1, -1).astype(jnp.float32),
        "hidden_padded": hp,
    }


# --------------------------------------------------------------------------- #
# Model forward
# --------------------------------------------------------------------------- #
@functools.partial(jax.jit, static_argnames=("stream_dtype",))
def lstm_model_forward(x_btd, layers, fc_w_t, fc_b, *, stream_dtype=jnp.float32):
    """x_btd: (B, T, D) batch_first like PyTorch.  Returns (B, output_dim).
    stream_dtype controls the dtype of the hoisted gates gx and intermediate
    hidden sequences (bf16 halves the sequential kernel's HBM traffic); all
    kernels still accumulate in f32."""
    b, t, _ = x_btd.shape
    hidden = layers[0][1].shape[0]                             # Hp
    # Pad batch to the sublane minimum: unmasked stores, legal (8/16,128)
    # blocks, and even batch shards for the v7x 2-TensorCore split.
    sub = 16 if jnp.dtype(stream_dtype).itemsize < 4 else 8
    bp = max(_round_up(b, sub), sub)
    if bp != b:
        x_btd = jnp.pad(x_btd, ((0, bp - b), (0, 0), (0, 0)))
    # Single layout change on the raw input; everything downstream is time-major.
    seq = jnp.transpose(x_btd, (1, 0, 2))                      # (T, Bp, D)
    n_layers = len(layers)
    out = None
    for li, (w_ih_t, w_hh_t, bias) in enumerate(layers):
        d_in = seq.shape[-1]
        # Hoisted projection: one large matmul over all T*Bp rows (free reshape).
        gx = input_projection(seq.reshape(t * bp, d_in), w_ih_t, bias, stream_dtype)
        gx = gx.reshape(t, bp, 4 * hidden)                     # (T, Bp, 4Hp)
        if li < n_layers - 1:
            # TODO(synk): fuse the next layer's input projection onto the
            # just-produced chunk inside the recurrence kernel to avoid the
            # per-layer hseq HBM round trip (bf16 streams already halve it).
            seq = lstm_layer_seq(gx, w_hh_t, out_dtype=stream_dtype)   # (T, Bp, Hp)
        else:
            out = lstm_last_layer_fc(gx, w_hh_t, fc_w_t, fc_b)        # (Bp, O)
    return out[:b]


# --------------------------------------------------------------------------- #
# Pure-JAX reference (unpadded, PyTorch-layout weights)
# --------------------------------------------------------------------------- #
def reference_forward(x_btd, params):
    b_sz, t_len, _ = x_btd.shape
    seq = x_btd
    for lp in params["lstm"]:
        hdim = lp["w_hh"].shape[1]
        h = jnp.zeros((b_sz, hdim), jnp.float32)
        c = jnp.zeros((b_sz, hdim), jnp.float32)
        outs = []
        for t in range(t_len):
            g = (seq[:, t, :] @ lp["w_ih"].T + h @ lp["w_hh"].T
                 + lp["b_ih"] + lp["b_hh"])
            i = jax.nn.sigmoid(g[:, 0 * hdim:1 * hdim])
            f = jax.nn.sigmoid(g[:, 1 * hdim:2 * hdim])
            gg = jnp.tanh(g[:, 2 * hdim:3 * hdim])
            o = jax.nn.sigmoid(g[:, 3 * hdim:4 * hdim])
            c = f * c + i * gg
            h = o * jnp.tanh(c)
            outs.append(h)
        seq = jnp.stack(outs, axis=1)
    return seq[:, -1, :] @ params["fc"]["w"].T + params["fc"]["b"]


# --------------------------------------------------------------------------- #
if __name__ == "__main__":
    B, T = 2, 8
    input_dim, hidden_dim, layer_dim, output_dim = 16, 32, 2, 4

    key = jax.random.PRNGKey(0)
    key, kx = jax.random.split(key)
    x = jax.random.normal(kx, (B, T, input_dim), jnp.float32)

    params = init_params(key, input_dim, hidden_dim, layer_dim, output_dim)
    kparams = prepare_kernel_params(params, hidden_dim, dtype=jnp.float32)

    ref = reference_forward(x, params)

    # f32 streams: tight check against the reference.
    out = lstm_model_forward(x, kparams["layers"], kparams["fc_w_t"],
                             kparams["fc_b"], stream_dtype=jnp.float32)
    out = jax.block_until_ready(out)
    assert out.shape == (B, output_dim), out.shape
    assert jnp.allclose(out, ref, atol=2e-4, rtol=2e-4), "f32 mismatch vs reference"

    # bf16 gx / hidden-sequence streams (production setting): loose check.
    out_bf16 = lstm_model_forward(x, kparams["layers"], kparams["fc_w_t"],
                                  kparams["fc_b"], stream_dtype=jnp.bfloat16)
    out_bf16 = jax.block_until_ready(out_bf16)
    assert jnp.allclose(out_bf16, ref, atol=1e-1, rtol=1e-1), "bf16 mismatch vs reference"

    print("KERNEL_OK")
</pallas_src>

<mosaic_0001>
module attributes {stable_mosaic.version = 11 : i64} {
  func.func @_proj_kernel(%arg0: i32, %arg1: i32, %arg2: memref<64x16xf32, #tpu.memory_space<vmem>>, %arg3: memref<16x512xf32, #tpu.memory_space<vmem>>, %arg4: memref<1x512xf32, #tpu.memory_space<vmem>>, %arg5: memref<64x512xf32, #tpu.memory_space<vmem>>) attributes {dimension_semantics = [#tpu.dimension_semantics<parallel>, #tpu.dimension_semantics<parallel>], iteration_bounds = array<i64: 1, 1>, scalar_prefetch = 0 : i64, scratch_operands = 0 : i64, tpu.core_type = #tpu.core_type<tc>, window_params = [{transform_indices = @transform_0, window_bounds = array<i64: 64, 16>}, {transform_indices = @transform_1, window_bounds = array<i64: 16, 512>}, {transform_indices = @transform_2, window_bounds = array<i64: 1, 512>}, {transform_indices = @transform_3, window_bounds = array<i64: 64, 512>}]} {
    %c0 = arith.constant 0 : index
    %c0_0 = arith.constant 0 : index
    %0 = vector.load %arg2[%c0, %c0_0] : memref<64x16xf32, #tpu.memory_space<vmem>>, vector<64x16xf32>
    %c0_1 = arith.constant 0 : index
    %c0_2 = arith.constant 0 : index
    %1 = vector.load %arg3[%c0_1, %c0_2] : memref<16x512xf32, #tpu.memory_space<vmem>>, vector<16x512xf32>
    %cst = arith.constant dense<0.000000e+00> : vector<64x512xf32>
    %2 = tpu.matmul %0, %1, %cst {dimension_numbers = #tpu.dot_dimension_numbers<[1], [0], [0], [1], [0, 0, 1, 1], [], []>} : vector<64x16xf32>, vector<16x512xf32>, vector<64x512xf32> -> vector<64x512xf32>
    %c0_3 = arith.constant 0 : index
    %c0_4 = arith.constant 0 : index
    %3 = vector.load %arg4[%c0_3, %c0_4] : memref<1x512xf32, #tpu.memory_space<vmem>>, vector<1x512xf32>
    %4 = vector.broadcast %3 : vector<1x512xf32> to vector<64x512xf32>
    %5 = arith.addf %2, %4 : vector<64x512xf32>
    %c0_5 = arith.constant 0 : index
    %c0_6 = arith.constant 0 : index
    %6 = vector.load %arg5[%c0_5, %c0_6] : memref<64x512xf32, #tpu.memory_space<vmem>>, vector<64x512xf32>
    tpu.vector_store %arg5[%c0_5, %c0_6], %5 {strides = array<i32>} : memref<64x512xf32, #tpu.memory_space<vmem>>, vector<64x512xf32>,
    return
  }
  func.func @transform_0(%arg0: i32, %arg1: i32) -> (i32, i32) {
    %c0_i32 = arith.constant 0 : i32
    %c0_i32_0 = arith.constant 0 : i32
    return %arg0, %c0_i32 : i32, i32
  }
  func.func @transform_1(%arg0: i32, %arg1: i32) -> (i32, i32) {
    %c0_i32 = arith.constant 0 : i32
    %c0_i32_0 = arith.constant 0 : i32
    return %c0_i32, %arg1 : i32, i32
  }
  func.func @transform_2(%arg0: i32, %arg1: i32) -> (i32, i32) {
    %c0_i32 = arith.constant 0 : i32
    %c0_i32_0 = arith.constant 0 : i32
    return %c0_i32, %arg1 : i32, i32
  }
  func.func @transform_3(%arg0: i32, %arg1: i32) -> (i32, i32) {
    %c0_i32 = arith.constant 0 : i32
    return %arg0, %arg1 : i32, i32
  }
}

module attributes {stable_mosaic.version = 11 : i64} {
  func.func @_lstm_recurrence_kernel(%arg0: i32, %arg1: i32, %arg2: memref<8x8x512xf32, #tpu.memory_space<vmem>>, %arg3: memref<128x512xf32, #tpu.memory_space<vmem>>, %arg4: memref<8x8x128xf32, #tpu.memory_space<vmem>>, %arg5: memref<8x128xf32, #tpu.memory_space<vmem>>, %arg6: memref<8x128xf32, #tpu.memory_space<vmem>>) attributes {dimension_semantics = [#tpu.dimension_semantics<parallel>, #tpu.dimension_semantics<arbitrary>], iteration_bounds = array<i64: 1, 1>, scalar_prefetch = 0 : i64, scratch_operands = 2 : i64, tpu.core_type = #tpu.core_type<tc>, window_params = [{transform_indices = @transform_0, window_bounds = array<i64: 8, 8, 512>}, {pipeline_mode = #tpu.pipeline_mode<synchronous>, transform_indices = @transform_1, window_bounds = array<i64: 128, 512>}, {transform_indices = @transform_2, window_bounds = array<i64: 8, 8, 128>}]} {
    %c0_i32 = arith.constant 0 : i32
    %0 = arith.cmpi eq, %arg1, %c0_i32 : i32
    %1 = arith.extui %0 : i1 to i32
    %c0_i32_0 = arith.constant 0 : i32
    %2 = arith.cmpi ne, %1, %c0_i32_0 : i32
    scf.if %2 {
      %cst_74 = arith.constant 0.000000e+00 : f32
      %280 = vector.broadcast %cst_74 : f32 to vector<8x128xf32>
      %c0_75 = arith.constant 0 : index
      %c0_76 = arith.constant 0 : index
      %281 = vector.load %arg5[%c0_75, %c0_76] : memref<8x128xf32, #tpu.memory_space<vmem>>, vector<8x128xf32>
      tpu.vector_store %arg5[%c0_75, %c0_76], %280 {strides = array<i32>} : memref<8x128xf32, #tpu.memory_space<vmem>>, vector<8x128xf32>,
      %cst_77 = arith.constant 0.000000e+00 : f32
      %282 = vector.broadcast %cst_77 : f32 to vector<8x128xf32>
      %c0_78 = arith.constant 0 : index
      %c0_79 = arith.constant 0 : index
      %283 = vector.load %arg6[%c0_78, %c0_79] : memref<8x128xf32, #tpu.memory_space<vmem>>, vector<8x128xf32>
      tpu.vector_store %arg6[%c0_78, %c0_79], %282 {strides = array<i32>} : memref<8x128xf32, #tpu.memory_space<vmem>>, vector<8x128xf32>,
    } else {
    }
    %c0 = arith.constant 0 : index
    %c0_1 = arith.constant 0 : index
    %3 = vector.load %arg3[%c0, %c0_1] : memref<128x512xf32, #tpu.memory_space<vmem>>, vector<128x512xf32>
    %c0_2 = arith.constant 0 : index
    %c0_3 = arith.constant 0 : index
    %4 = vector.load %arg5[%c0_2, %c0_3] : memref<8x128xf32, #tpu.memory_space<vmem>>, vector<8x128xf32>
    %c0_4 = arith.constant 0 : index
    %c0_5 = arith.constant 0 : index
    %5 = vector.load %arg6[%c0_4, %c0_5] : memref<8x128xf32, #tpu.memory_space<vmem>>, vector<8x128xf32>
    %c0_i32_6 = arith.constant 0 : i32
    %6 = arith.index_cast %c0_i32_6 : i32 to index
    %c0_7 = arith.constant 0 : index
    %c0_8 = arith.constant 0 : index
    %7 = vector.load %arg2[%6, %c0_7, %c0_8] : memref<8x8x512xf32, #tpu.memory_space<vmem>>, vector<1x8x512xf32>
    %8 = vector.shape_cast %7 : vector<1x8x512xf32> to vector<8x512xf32>
    %cst = arith.constant dense<0.000000e+00> : vector<8x512xf32>
    %9 = tpu.matmul %4, %3, %cst {dimension_numbers = #tpu.dot_dimension_numbers<[1], [0], [0], [1], [0, 0, 1, 1], [], []>} : vector<8x128xf32>, vector<128x512xf32>, vector<8x512xf32> -> vector<8x512xf32>
    %10 = arith.addf %8, %9 : vector<8x512xf32>
    %11 = vector.extract_strided_slice %10 {offsets = [0, 0], sizes = [8, 128], strides = [1, 1]} : vector<8x512xf32> to vector<8x128xf32>
    %12 = arith.negf %11 : vector<8x128xf32>
    %13 = math.exp %12 : vector<8x128xf32>
    %cst_9 = arith.constant 1.000000e+00 : f32
    %14 = vector.broadcast %cst_9 : f32 to vector<8x128xf32>
    %15 = arith.addf %14, %13 : vector<8x128xf32>
    %16 = arith.divf %14, %15 : vector<8x128xf32>
    %17 = vector.extract_strided_slice %10 {offsets = [0, 128], sizes = [8, 128], strides = [1, 1]} : vector<8x512xf32> to vector<8x128xf32>
    %18 = arith.negf %17 : vector<8x128xf32>
    %19 = math.exp %18 : vector<8x128xf32>
    %cst_10 = arith.constant 1.000000e+00 : f32
    %20 = vector.broadcast %cst_10 : f32 to vector<8x128xf32>
    %21 = arith.addf %20, %19 : vector<8x128xf32>
    %22 = arith.divf %20, %21 : vector<8x128xf32>
    %23 = vector.extract_strided_slice %10 {offsets = [0, 256], sizes = [8, 128], strides = [1, 1]} : vector<8x512xf32> to vector<8x128xf32>
    %24 = math.tanh %23 : vector<8x128xf32>
    %25 = vector.extract_strided_slice %10 {offsets = [0, 384], sizes = [8, 128], strides = [1, 1]} : vector<8x512xf32> to vector<8x128xf32>
    %26 = arith.negf %25 : vector<8x128xf32>
    %27 = math.exp %26 : vector<8x128xf32>
    %cst_11 = arith.constant 1.000000e+00 : f32
    %28 = vector.broadcast %cst_11 : f32 to vector<8x128xf32>
    %29 = arith.addf %28, %27 : vector<8x128xf32>
    %30 = arith.divf %28, %29 : vector<8x128xf32>
    %31 = arith.mulf %22, %5 : vector<8x128xf32>
    %32 = arith.mulf %16, %24 : vector<8x128xf32>
    %33 = arith.addf %31, %32 : vector<8x128xf32>
    %34 = math.tanh %33 : vector<8x128xf32>
    %35 = arith.mulf %30, %34 : vector<8x128xf32>
    %36 = arith.index_cast %c0_i32_6 : i32 to index
    %c0_12 = arith.constant 0 : index
    %c0_13 = arith.constant 0 : index
    %37 = vector.load %arg4[%36, %c0_12, %c0_13] : memref<8x8x128xf32, #tpu.memory_space<vmem>>, vector<1x8x128xf32>
    %38 = vector.shape_cast %37 : vector<1x8x128xf32> to vector<8x128xf32>
    %39 = vector.shape_cast %35 : vector<8x128xf32> to vector<1x8x128xf32>
    tpu.vector_store %arg4[%36, %c0_12, %c0_13], %39 {strides = array<i32>} : memref<8x8x128xf32, #tpu.memory_space<vmem>>, vector<1x8x128xf32>,
    %c1_i32 = arith.constant 1 : i32
    %40 = arith.index_cast %c1_i32 : i32 to index
    %c0_14 = arith.constant 0 : index
    %c0_15 = arith.constant 0 : index
    %41 = vector.load %arg2[%40, %c0_14, %c0_15] : memref<8x8x512xf32, #tpu.memory_space<vmem>>, vector<1x8x512xf32>
    %42 = vector.shape_cast %41 : vector<1x8x512xf32> to vector<8x512xf32>
    %cst_16 = arith.constant dense<0.000000e+00> : vector<8x512xf32>
    %43 = tpu.matmul %35, %3, %cst_16 {dimension_numbers = #tpu.dot_dimension_numbers<[1], [0], [0], [1], [0, 0, 1, 1], [], []>} : vector<8x128xf32>, vector<128x512xf32>, vector<8x512xf32> -> vector<8x512xf32>
    %44 = arith.addf %42, %43 : vector<8x512xf32>
    %45 = vector.extract_strided_slice %44 {offsets = [0, 0], sizes = [8, 128], strides = [1, 1]} : vector<8x512xf32> to vector<8x128xf32>
    %46 = arith.negf %45 : vector<8x128xf32>
    %47 = math.exp %46 : vector<8x128xf32>
    %cst_17 = arith.constant 1.000000e+00 : f32
    %48 = vector.broadcast %cst_17 : f32 to vector<8x128xf32>
    %49 = arith.addf %48, %47 : vector<8x128xf32>
    %50 = arith.divf %48, %49 : vector<8x128xf32>
    %51 = vector.extract_strided_slice %44 {offsets = [0, 128], sizes = [8, 128], strides = [1, 1]} : vector<8x512xf32> to vector<8x128xf32>
    %52 = arith.negf %51 : vector<8x128xf32>
    %53 = math.exp %52 : vector<8x128xf32>
    %cst_18 = arith.constant 1.000000e+00 : f32
    %54 = vector.broadcast %cst_18 : f32 to vector<8x128xf32>
    %55 = arith.addf %54, %53 : vector<8x128xf32>
    %56 = arith.divf %54, %55 : vector<8x128xf32>
    %57 = vector.extract_strided_slice %44 {offsets = [0, 256], sizes = [8, 128], strides = [1, 1]} : vector<8x512xf32> to vector<8x128xf32>
    %58 = math.tanh %57 : vector<8x128xf32>
    %59 = vector.extract_strided_slice %44 {offsets = [0, 384], sizes = [8, 128], strides = [1, 1]} : vector<8x512xf32> to vector<8x128xf32>
    %60 = arith.negf %59 : vector<8x128xf32>
    %61 = math.exp %60 : vector<8x128xf32>
    %cst_19 = arith.constant 1.000000e+00 : f32
    %62 = vector.broadcast %cst_19 : f32 to vector<8x128xf32>
    %63 = arith.addf %62, %61 : vector<8x128xf32>
    %64 = arith.divf %62, %63 : vector<8x128xf32>
    %65 = arith.mulf %56, %33 : vector<8x128xf32>
    %66 = arith.mulf %50, %58 : vector<8x128xf32>
    %67 = arith.addf %65, %66 : vector<8x128xf32>
    %68 = math.tanh %67 : vector<8x128xf32>
    %69 = arith.mulf %64, %68 : vector<8x128xf32>
    %70 = arith.index_cast %c1_i32 : i32 to index
    %c0_20 = arith.constant 0 : index
    %c0_21 = arith.constant 0 : index
    %71 = vector.load %arg4[%70, %c0_20, %c0_21] : memref<8x8x128xf32, #tpu.memory_space<vmem>>, vector<1x8x128xf32>
    %72 = vector.shape_cast %71 : vector<1x8x128xf32> to vector<8x128xf32>
    %73 = vector.shape_cast %69 : vector<8x128xf32> to vector<1x8x128xf32>
    tpu.vector_store %arg4[%70, %c0_20, %c0_21], %73 {strides = array<i32>} : memref<8x8x128xf32, #tpu.memory_space<vmem>>, vector<1x8x128xf32>,
    %c2_i32 = arith.constant 2 : i32
    %74 = arith.index_cast %c2_i32 : i32 to index
    %c0_22 = arith.constant 0 : index
    %c0_23 = arith.constant 0 : index
    %75 = vector.load %arg2[%74, %c0_22, %c0_23] : memref<8x8x512xf32, #tpu.memory_space<vmem>>, vector<1x8x512xf32>
    %76 = vector.shape_cast %75 : vector<1x8x512xf32> to vector<8x512xf32>
    %cst_24 = arith.constant dense<0.000000e+00> : vector<8x512xf32>
    %77 = tpu.matmul %69, %3, %cst_24 {dimension_numbers = #tpu.dot_dimension_numbers<[1], [0], [0], [1], [0, 0, 1, 1], [], []>} : vector<8x128xf32>, vector<128x512xf32>, vector<8x512xf32> -> vector<8x512xf32>
    %78 = arith.addf %76, %77 : vector<8x512xf32>
    %79 = vector.extract_strided_slice %78 {offsets = [0, 0], sizes = [8, 128], strides = [1, 1]} : vector<8x512xf32> to vector<8x128xf32>
    %80 = arith.negf %79 : vector<8x128xf32>
    %81 = math.exp %80 : vector<8x128xf32>
    %cst_25 = arith.constant 1.000000e+00 : f32
    %82 = vector.broadcast %cst_25 : f32 to vector<8x128xf32>
    %83 = arith.addf %82, %81 : vector<8x128xf32>
    %84 = arith.divf %82, %83 : vector<8x128xf32>
    %85 = vector.extract_strided_slice %78 {offsets = [0, 128], sizes = [8, 128], strides = [1, 1]} : vector<8x512xf32> to vector<8x128xf32>
    %86 = arith.negf %85 : vector<8x128xf32>
    %87 = math.exp %86 : vector<8x128xf32>
    %cst_26 = arith.constant 1.000000e+00 : f32
    %88 = vector.broadcast %cst_26 : f32 to vector<8x128xf32>
    %89 = arith.addf %88, %87 : vector<8x128xf32>
    %90 = arith.divf %88, %89 : vector<8x128xf32>
    %91 = vector.extract_strided_slice %78 {offsets = [0, 256], sizes = [8, 128], strides = [1, 1]} : vector<8x512xf32> to vector<8x128xf32>
    %92 = math.tanh %91 : vector<8x128xf32>
    %93 = vector.extract_strided_slice %78 {offsets = [0, 384], sizes = [8, 128], strides = [1, 1]} : vector<8x512xf32> to vector<8x128xf32>
    %94 = arith.negf %93 : vector<8x128xf32>
    %95 = math.exp %94 : vector<8x128xf32>
    %cst_27 = arith.constant 1.000000e+00 : f32
    %96 = vector.broadcast %cst_27 : f32 to vector<8x128xf32>
    %97 = arith.addf %96, %95 : vector<8x128xf32>
    %98 = arith.divf %96, %97 : vector<8x128xf32>
    %99 = arith.mulf %90, %67 : vector<8x128xf32>
    %100 = arith.mulf %84, %92 : vector<8x128xf32>
    %101 = arith.addf %99, %100 : vector<8x128xf32>
    %102 = math.tanh %101 : vector<8x128xf32>
    %103 = arith.mulf %98, %102 : vector<8x128xf32>
    %104 = arith.index_cast %c2_i32 : i32 to index
    %c0_28 = arith.constant 0 : index
    %c0_29 = arith.constant 0 : index
    %105 = vector.load %arg4[%104, %c0_28, %c0_29] : memref<8x8x128xf32, #tpu.memory_space<vmem>>, vector<1x8x128xf32>
    %106 = vector.shape_cast %105 : vector<1x8x128xf32> to vector<8x128xf32>
    %107 = vector.shape_cast %103 : vector<8x128xf32> to vector<1x8x128xf32>
    tpu.vector_store %arg4[%104, %c0_28, %c0_29], %107 {strides = array<i32>} : memref<8x8x128xf32, #tpu.memory_space<vmem>>, vector<1x8x128xf32>,
    %c3_i32 = arith.constant 3 : i32
    %108 = arith.index_cast %c3_i32 : i32 to index
    %c0_30 = arith.constant 0 : index
    %c0_31 = arith.constant 0 : index
    %109 = vector.load %arg2[%108, %c0_30, %c0_31] : memref<8x8x512xf32, #tpu.memory_space<vmem>>, vector<1x8x512xf32>
    %110 = vector.shape_cast %109 : vector<1x8x512xf32> to vector<8x512xf32>
    %cst_32 = arith.constant dense<0.000000e+00> : vector<8x512xf32>
    %111 = tpu.matmul %103, %3, %cst_32 {dimension_numbers = #tpu.dot_dimension_numbers<[1], [0], [0], [1], [0, 0, 1, 1], [], []>} : vector<8x128xf32>, vector<128x512xf32>, vector<8x512xf32> -> vector<8x512xf32>
    %112 = arith.addf %110, %111 : vector<8x512xf32>
    %113 = vector.extract_strided_slice %112 {offsets = [0, 0], sizes = [8, 128], strides = [1, 1]} : vector<8x512xf32> to vector<8x128xf32>
    %114 = arith.negf %113 : vector<8x128xf32>
    %115 = math.exp %114 : vector<8x128xf32>
    %cst_33 = arith.constant 1.000000e+00 : f32
    %116 = vector.broadcast %cst_33 : f32 to vector<8x128xf32>
    %117 = arith.addf %116, %115 : vector<8x128xf32>
    %118 = arith.divf %116, %117 : vector<8x128xf32>
    %119 = vector.extract_strided_slice %112 {offsets = [0, 128], sizes = [8, 128], strides = [1, 1]} : vector<8x512xf32> to vector<8x128xf32>
    %120 = arith.negf %119 : vector<8x128xf32>
    %121 = math.exp %120 : vector<8x128xf32>
    %cst_34 = arith.constant 1.000000e+00 : f32
    %122 = vector.broadcast %cst_34 : f32 to vector<8x128xf32>
    %123 = arith.addf %122, %121 : vector<8x128xf32>
    %124 = arith.divf %122, %123 : vector<8x128xf32>
    %125 = vector.extract_strided_slice %112 {offsets = [0, 256], sizes = [8, 128], strides = [1, 1]} : vector<8x512xf32> to vector<8x128xf32>
    %126 = math.tanh %125 : vector<8x128xf32>
    %127 = vector.extract_strided_slice %112 {offsets = [0, 384], sizes = [8, 128], strides = [1, 1]} : vector<8x512xf32> to vector<8x128xf32>
    %128 = arith.negf %127 : vector<8x128xf32>
    %129 = math.exp %128 : vector<8x128xf32>
    %cst_35 = arith.constant 1.000000e+00 : f32
    %130 = vector.broadcast %cst_35 : f32 to vector<8x128xf32>
    %131 = arith.addf %130, %129 : vector<8x128xf32>
    %132 = arith.divf %130, %131 : vector<8x128xf32>
    %133 = arith.mulf %124, %101 : vector<8x128xf32>
    %134 = arith.mulf %118, %126 : vector<8x128xf32>
    %135 = arith.addf %133, %134 : vector<8x128xf32>
    %136 = math.tanh %135 : vector<8x128xf32>
    %137 = arith.mulf %132, %136 : vector<8x128xf32>
    %138 = arith.index_cast %c3_i32 : i32 to index
    %c0_36 = arith.constant 0 : index
    %c0_37 = arith.constant 0 : index
    %139 = vector.load %arg4[%138, %c0_36, %c0_37] : memref<8x8x128xf32, #tpu.memory_space<vmem>>, vector<1x8x128xf32>
    %140 = vector.shape_cast %139 : vector<1x8x128xf32> to vector<8x128xf32>
    %141 = vector.shape_cast %137 : vector<8x128xf32> to vector<1x8x128xf32>
    tpu.vector_store %arg4[%138, %c0_36, %c0_37], %141 {strides = array<i32>} : memref<8x8x128xf32, #tpu.memory_space<vmem>>, vector<1x8x128xf32>,
    %c4_i32 = arith.constant 4 : i32
    %142 = arith.index_cast %c4_i32 : i32 to index
    %c0_38 = arith.constant 0 : index
    %c0_39 = arith.constant 0 : index
    %143 = vector.load %arg2[%142, %c0_38, %c0_39] : memref<8x8x512xf32, #tpu.memory_space<vmem>>, vector<1x8x512xf32>
    %144 = vector.shape_cast %143 : vector<1x8x512xf32> to vector<8x512xf32>
    %cst_40 = arith.constant dense<0.000000e+00> : vector<8x512xf32>
    %145 = tpu.matmul %137, %3, %cst_40 {dimension_numbers = #tpu.dot_dimension_numbers<[1], [0], [0], [1], [0, 0, 1, 1], [], []>} : vector<8x128xf32>, vector<128x512xf32>, vector<8x512xf32> -> vector<8x512xf32>
    %146 = arith.addf %144, %145 : vector<8x512xf32>
    %147 = vector.extract_strided_slice %146 {offsets = [0, 0], sizes = [8, 128], strides = [1, 1]} : vector<8x512xf32> to vector<8x128xf32>
    %148 = arith.negf %147 : vector<8x128xf32>
    %149 = math.exp %148 : vector<8x128xf32>
    %cst_41 = arith.constant 1.000000e+00 : f32
    %150 = vector.broadcast %cst_41 : f32 to vector<8x128xf32>
    %151 = arith.addf %150, %149 : vector<8x128xf32>
    %152 = arith.divf %150, %151 : vector<8x128xf32>
    %153 = vector.extract_strided_slice %146 {offsets = [0, 128], sizes = [8, 128], strides = [1, 1]} : vector<8x512xf32> to vector<8x128xf32>
    %154 = arith.negf %153 : vector<8x128xf32>
    %155 = math.exp %154 : vector<8x128xf32>
    %cst_42 = arith.constant 1.000000e+00 : f32
    %156 = vector.broadcast %cst_42 : f32 to vector<8x128xf32>
    %157 = arith.addf %156, %155 : vector<8x128xf32>
    %158 = arith.divf %156, %157 : vector<8x128xf32>
    %159 = vector.extract_strided_slice %146 {offsets = [0, 256], sizes = [8, 128], strides = [1, 1]} : vector<8x512xf32> to vector<8x128xf32>
    %160 = math.tanh %159 : vector<8x128xf32>
    %161 = vector.extract_strided_slice %146 {offsets = [0, 384], sizes = [8, 128], strides = [1, 1]} : vector<8x512xf32> to vector<8x128xf32>
    %162 = arith.negf %161 : vector<8x128xf32>
    %163 = math.exp %162 : vector<8x128xf32>
    %cst_43 = arith.constant 1.000000e+00 : f32
    %164 = vector.broadcast %cst_43 : f32 to vector<8x128xf32>
    %165 = arith.addf %164, %163 : vector<8x128xf32>
    %166 = arith.divf %164, %165 : vector<8x128xf32>
    %167 = arith.mulf %158, %135 : vector<8x128xf32>
    %168 = arith.mulf %152, %160 : vector<8x128xf32>
    %169 = arith.addf %167, %168 : vector<8x128xf32>
    %170 = math.tanh %169 : vector<8x128xf32>
    %171 = arith.mulf %166, %170 : vector<8x128xf32>
    %172 = arith.index_cast %c4_i32 : i32 to index
    %c0_44 = arith.constant 0 : index
    %c0_45 = arith.constant 0 : index
    %173 = vector.load %arg4[%172, %c0_44, %c0_45] : memref<8x8x128xf32, #tpu.memory_space<vmem>>, vector<1x8x128xf32>
    %174 = vector.shape_cast %173 : vector<1x8x128xf32> to vector<8x128xf32>
    %175 = vector.shape_cast %171 : vector<8x128xf32> to vector<1x8x128xf32>
    tpu.vector_store %arg4[%172, %c0_44, %c0_45], %175 {strides = array<i32>} : memref<8x8x128xf32, #tpu.memory_space<vmem>>, vector<1x8x128xf32>,
    %c5_i32 = arith.constant 5 : i32
    %176 = arith.index_cast %c5_i32 : i32 to index
    %c0_46 = arith.constant 0 : index
    %c0_47 = arith.constant 0 : index
    %177 = vector.load %arg2[%176, %c0_46, %c0_47] : memref<8x8x512xf32, #tpu.memory_space<vmem>>, vector<1x8x512xf32>
    %178 = vector.shape_cast %177 : vector<1x8x512xf32> to vector<8x512xf32>
    %cst_48 = arith.constant dense<0.000000e+00> : vector<8x512xf32>
    %179 = tpu.matmul %171, %3, %cst_48 {dimension_numbers = #tpu.dot_dimension_numbers<[1], [0], [0], [1], [0, 0, 1, 1], [], []>} : vector<8x128xf32>, vector<128x512xf32>, vector<8x512xf32> -> vector<8x512xf32>
    %180 = arith.addf %178, %179 : vector<8x512xf32>
    %181 = vector.extract_strided_slice %180 {offsets = [0, 0], sizes = [8, 128], strides = [1, 1]} : vector<8x512xf32> to vector<8x128xf32>
    %182 = arith.negf %181 : vector<8x128xf32>
    %183 = math.exp %182 : vector<8x128xf32>
    %cst_49 = arith.constant 1.000000e+00 : f32
    %184 = vector.broadcast %cst_49 : f32 to vector<8x128xf32>
    %185 = arith.addf %184, %183 : vector<8x128xf32>
    %186 = arith.divf %184, %185 : vector<8x128xf32>
    %187 = vector.extract_strided_slice %180 {offsets = [0, 128], sizes = [8, 128], strides = [1, 1]} : vector<8x512xf32> to vector<8x128xf32>
    %188 = arith.negf %187 : vector<8x128xf32>
    %189 = math.exp %188 : vector<8x128xf32>
    %cst_50 = arith.constant 1.000000e+00 : f32
    %190 = vector.broadcast %cst_50 : f32 to vector<8x128xf32>
    %191 = arith.addf %190, %189 : vector<8x128xf32>
    %192 = arith.divf %190, %191 : vector<8x128xf32>
    %193 = vector.extract_strided_slice %180 {offsets = [0, 256], sizes = [8, 128], strides = [1, 1]} : vector<8x512xf32> to vector<8x128xf32>
    %194 = math.tanh %193 : vector<8x128xf32>
    %195 = vector.extract_strided_slice %180 {offsets = [0, 384], sizes = [8, 128], strides = [1, 1]} : vector<8x512xf32> to vector<8x128xf32>
    %196 = arith.negf %195 : vector<8x128xf32>
    %197 = math.exp %196 : vector<8x128xf32>
    %cst_51 = arith.constant 1.000000e+00 : f32
    %198 = vector.broadcast %cst_51 : f32 to vector<8x128xf32>
    %199 = arith.addf %198, %197 : vector<8x128xf32>
    %200 = arith.divf %198, %199 : vector<8x128xf32>
    %201 = arith.mulf %192, %169 : vector<8x128xf32>
    %202 = arith.mulf %186, %194 : vector<8x128xf32>
    %203 = arith.addf %201, %202 : vector<8x128xf32>
    %204 = math.tanh %203 : vector<8x128xf32>
    %205 = arith.mulf %200, %204 : vector<8x128xf32>
    %206 = arith.index_cast %c5_i32 : i32 to index
    %c0_52 = arith.constant 0 : index
    %c0_53 = arith.constant 0 : index
    %207 = vector.load %arg4[%206, %c0_52, %c0_53] : memref<8x8x128xf32, #tpu.memory_space<vmem>>, vector<1x8x128xf32>
    %208 = vector.shape_cast %207 : vector<1x8x128xf32> to vector<8x128xf32>
    %209 = vector.shape_cast %205 : vector<8x128xf32> to vector<1x8x128xf32>
    tpu.vector_store %arg4[%206, %c0_52, %c0_53], %209 {strides = array<i32>} : memref<8x8x128xf32, #tpu.memory_space<vmem>>, vector<1x8x128xf32>,
    %c6_i32 = arith.constant 6 : i32
    %210 = arith.index_cast %c6_i32 : i32 to index
    %c0_54 = arith.constant 0 : index
    %c0_55 = arith.constant 0 : index
    %211 = vector.load %arg2[%210, %c0_54, %c0_55] : memref<8x8x512xf32, #tpu.memory_space<vmem>>, vector<1x8x512xf32>
    %212 = vector.shape_cast %211 : vector<1x8x512xf32> to vector<8x512xf32>
    %cst_56 = arith.constant dense<0.000000e+00> : vector<8x512xf32>
    %213 = tpu.matmul %205, %3, %cst_56 {dimension_numbers = #tpu.dot_dimension_numbers<[1], [0], [0], [1], [0, 0, 1, 1], [], []>} : vector<8x128xf32>, vector<128x512xf32>, vector<8x512xf32> -> vector<8x512xf32>
    %214 = arith.addf %212, %213 : vector<8x512xf32>
    %215 = vector.extract_strided_slice %214 {offsets = [0, 0], sizes = [8, 128], strides = [1, 1]} : vector<8x512xf32> to vector<8x128xf32>
    %216 = arith.negf %215 : vector<8x128xf32>
    %217 = math.exp %216 : vector<8x128xf32>
    %cst_57 = arith.constant 1.000000e+00 : f32
    %218 = vector.broadcast %cst_57 : f32 to vector<8x128xf32>
    %219 = arith.addf %218, %217 : vector<8x128xf32>
    %220 = arith.divf %218, %219 : vector<8x128xf32>
    %221 = vector.extract_strided_slice %214 {offsets = [0, 128], sizes = [8, 128], strides = [1, 1]} : vector<8x512xf32> to vector<8x128xf32>
    %222 = arith.negf %221 : vector<8x128xf32>
    %223 = math.exp %222 : vector<8x128xf32>
    %cst_58 = arith.constant 1.000000e+00 : f32
    %224 = vector.broadcast %cst_58 : f32 to vector<8x128xf32>
    %225 = arith.addf %224, %223 : vector<8x128xf32>
    %226 = arith.divf %224, %225 : vector<8x128xf32>
    %227 = vector.extract_strided_slice %214 {offsets = [0, 256], sizes = [8, 128], strides = [1, 1]} : vector<8x512xf32> to vector<8x128xf32>
    %228 = math.tanh %227 : vector<8x128xf32>
    %229 = vector.extract_strided_slice %214 {offsets = [0, 384], sizes = [8, 128], strides = [1, 1]} : vector<8x512xf32> to vector<8x128xf32>
    %230 = arith.negf %229 : vector<8x128xf32>
    %231 = math.exp %230 : vector<8x128xf32>
    %cst_59 = arith.constant 1.000000e+00 : f32
    %232 = vector.broadcast %cst_59 : f32 to vector<8x128xf32>
    %233 = arith.addf %232, %231 : vector<8x128xf32>
    %234 = arith.divf %232, %233 : vector<8x128xf32>
    %235 = arith.mulf %226, %203 : vector<8x128xf32>
    %236 = arith.mulf %220, %228 : vector<8x128xf32>
    %237 = arith.addf %235, %236 : vector<8x128xf32>
    %238 = math.tanh %237 : vector<8x128xf32>
    %239 = arith.mulf %234, %238 : vector<8x128xf32>
    %240 = arith.index_cast %c6_i32 : i32 to index
    %c0_60 = arith.constant 0 : index
    %c0_61 = arith.constant 0 : index
    %241 = vector.load %arg4[%240, %c0_60, %c0_61] : memref<8x8x128xf32, #tpu.memory_space<vmem>>, vector<1x8x128xf32>
    %242 = vector.shape_cast %241 : vector<1x8x128xf32> to vector<8x128xf32>
    %243 = vector.shape_cast %239 : vector<8x128xf32> to vector<1x8x128xf32>
    tpu.vector_store %arg4[%240, %c0_60, %c0_61], %243 {strides = array<i32>} : memref<8x8x128xf32, #tpu.memory_space<vmem>>, vector<1x8x128xf32>,
    %c7_i32 = arith.constant 7 : i32
    %244 = arith.index_cast %c7_i32 : i32 to index
    %c0_62 = arith.constant 0 : index
    %c0_63 = arith.constant 0 : index
    %245 = vector.load %arg2[%244, %c0_62, %c0_63] : memref<8x8x512xf32, #tpu.memory_space<vmem>>, vector<1x8x512xf32>
    %246 = vector.shape_cast %245 : vector<1x8x512xf32> to vector<8x512xf32>
    %cst_64 = arith.constant dense<0.000000e+00> : vector<8x512xf32>
    %247 = tpu.matmul %239, %3, %cst_64 {dimension_numbers = #tpu.dot_dimension_numbers<[1], [0], [0], [1], [0, 0, 1, 1], [], []>} : vector<8x128xf32>, vector<128x512xf32>, vector<8x512xf32> -> vector<8x512xf32>
    %248 = arith.addf %246, %247 : vector<8x512xf32>
    %249 = vector.extract_strided_slice %248 {offsets = [0, 0], sizes = [8, 128], strides = [1, 1]} : vector<8x512xf32> to vector<8x128xf32>
    %250 = arith.negf %249 : vector<8x128xf32>
    %251 = math.exp %250 : vector<8x128xf32>
    %cst_65 = arith.constant 1.000000e+00 : f32
    %252 = vector.broadcast %cst_65 : f32 to vector<8x128xf32>
    %253 = arith.addf %252, %251 : vector<8x128xf32>
    %254 = arith.divf %252, %253 : vector<8x128xf32>
    %255 = vector.extract_strided_slice %248 {offsets = [0, 128], sizes = [8, 128], strides = [1, 1]} : vector<8x512xf32> to vector<8x128xf32>
    %256 = arith.negf %255 : vector<8x128xf32>
    %257 = math.exp %256 : vector<8x128xf32>
    %cst_66 = arith.constant 1.000000e+00 : f32
    %258 = vector.broadcast %cst_66 : f32 to vector<8x128xf32>
    %259 = arith.addf %258, %257 : vector<8x128xf32>
    %260 = arith.divf %258, %259 : vector<8x128xf32>
    %261 = vector.extract_strided_slice %248 {offsets = [0, 256], sizes = [8, 128], strides = [1, 1]} : vector<8x512xf32> to vector<8x128xf32>
    %262 = math.tanh %261 : vector<8x128xf32>
    %263 = vector.extract_strided_slice %248 {offsets = [0, 384], sizes = [8, 128], strides = [1, 1]} : vector<8x512xf32> to vector<8x128xf32>
    %264 = arith.negf %263 : vector<8x128xf32>
    %265 = math.exp %264 : vector<8x128xf32>
    %cst_67 = arith.constant 1.000000e+00 : f32
    %266 = vector.broadcast %cst_67 : f32 to vector<8x128xf32>
    %267 = arith.addf %266, %265 : vector<8x128xf32>
    %268 = arith.divf %266, %267 : vector<8x128xf32>
    %269 = arith.mulf %260, %237 : vector<8x128xf32>
    %270 = arith.mulf %254, %262 : vector<8x128xf32>
    %271 = arith.addf %269, %270 : vector<8x128xf32>
    %272 = math.tanh %271 : vector<8x128xf32>
    %273 = arith.mulf %268, %272 : vector<8x128xf32>
    %274 = arith.index_cast %c7_i32 : i32 to index
    %c0_68 = arith.constant 0 : index
    %c0_69 = arith.constant 0 : index
    %275 = vector.load %arg4[%274, %c0_68, %c0_69] : memref<8x8x128xf32, #tpu.memory_space<vmem>>, vector<1x8x128xf32>
    %276 = vector.shape_cast %275 : vector<1x8x128xf32> to vector<8x128xf32>
    %277 = vector.shape_cast %273 : vector<8x128xf32> to vector<1x8x128xf32>
    tpu.vector_store %arg4[%274, %c0_68, %c0_69], %277 {strides = array<i32>} : memref<8x8x128xf32, #tpu.memory_space<vmem>>, vector<1x8x128xf32>,
    %c8_i32 = arith.constant 8 : i32
    %c0_70 = arith.constant 0 : index
    %c0_71 = arith.constant 0 : index
    %278 = vector.load %arg5[%c0_70, %c0_71] : memref<8x128xf32, #tpu.memory_space<vmem>>, vector<8x128xf32>
    tpu.vector_store %arg5[%c0_70, %c0_71], %273 {strides = array<i32>} : memref<8x128xf32, #tpu.memory_space<vmem>>, vector<8x128xf32>,
    %c0_72 = arith.constant 0 : index
    %c0_73 = arith.constant 0 : index
    %279 = vector.load %arg6[%c0_72, %c0_73] : memref<8x128xf32, #tpu.memory_space<vmem>>, vector<8x128xf32>
    tpu.vector_store %arg6[%c0_72, %c0_73], %271 {strides = array<i32>} : memref<8x128xf32, #tpu.memory_space<vmem>>, vector<8x128xf32>,
    return
  }
  func.func @transform_0(%arg0: i32, %arg1: i32) -> (i32, i32, i32) {
    %c0_i32 = arith.constant 0 : i32
    %c0_i32_0 = arith.constant 0 : i32
    return %arg1, %arg0, %c0_i32 : i32, i32, i32
  }
  func.func @transform_1(%arg0: i32, %arg1: i32) -> (i32, i32) {
    %c0_i32 = arith.constant 0 : i32
    %c0_i32_0 = arith.constant 0 : i32
    %c0_i32_1 = arith.constant 0 : i32
    return %c0_i32, %c0_i32_0 : i32, i32
  }
  func.func @transform_2(%arg0: i32, %arg1: i32) -> (i32, i32, i32) {
    %c0_i32 = arith.constant 0 : i32
    %c0_i32_0 = arith.constant 0 : i32
    return %arg1, %arg0, %c0_i32 : i32, i32, i32
  }
}

module attributes {stable_mosaic.version = 11 : i64} {
  func.func @_proj_kernel(%arg0: i32, %arg1: i32, %arg2: memref<64x128xf32, #tpu.memory_space<vmem>>, %arg3: memref<128x512xf32, #tpu.memory_space<vmem>>, %arg4: memref<1x512xf32, #tpu.memory_space<vmem>>, %arg5: memref<64x512xf32, #tpu.memory_space<vmem>>) attributes {dimension_semantics = [#tpu.dimension_semantics<parallel>, #tpu.dimension_semantics<parallel>], iteration_bounds = array<i64: 1, 1>, scalar_prefetch = 0 : i64, scratch_operands = 0 : i64, tpu.core_type = #tpu.core_type<tc>, window_params = [{transform_indices = @transform_0, window_bounds = array<i64: 64, 128>}, {transform_indices = @transform_1, window_bounds = array<i64: 128, 512>}, {transform_indices = @transform_2, window_bounds = array<i64: 1, 512>}, {transform_indices = @transform_3, window_bounds = array<i64: 64, 512>}]} {
    %c0 = arith.constant 0 : index
    %c0_0 = arith.constant 0 : index
    %0 = vector.load %arg2[%c0, %c0_0] : memref<64x128xf32, #tpu.memory_space<vmem>>, vector<64x128xf32>
    %c0_1 = arith.constant 0 : index
    %c0_2 = arith.constant 0 : index
    %1 = vector.load %arg3[%c0_1, %c0_2] : memref<128x512xf32, #tpu.memory_space<vmem>>, vector<128x512xf32>
    %cst = arith.constant dense<0.000000e+00> : vector<64x512xf32>
    %2 = tpu.matmul %0, %1, %cst {dimension_numbers = #tpu.dot_dimension_numbers<[1], [0], [0], [1], [0, 0, 1, 1], [], []>} : vector<64x128xf32>, vector<128x512xf32>, vector<64x512xf32> -> vector<64x512xf32>
    %c0_3 = arith.constant 0 : index
    %c0_4 = arith.constant 0 : index
    %3 = vector.load %arg4[%c0_3, %c0_4] : memref<1x512xf32, #tpu.memory_space<vmem>>, vector<1x512xf32>
    %4 = vector.broadcast %3 : vector<1x512xf32> to vector<64x512xf32>
    %5 = arith.addf %2, %4 : vector<64x512xf32>
    %c0_5 = arith.constant 0 : index
    %c0_6 = arith.constant 0 : index
    %6 = vector.load %arg5[%c0_5, %c0_6] : memref<64x512xf32, #tpu.memory_space<vmem>>, vector<64x512xf32>
    tpu.vector_store %arg5[%c0_5, %c0_6], %5 {strides = array<i32>} : memref<64x512xf32, #tpu.memory_space<vmem>>, vector<64x512xf32>,
    return
  }
  func.func @transform_0(%arg0: i32, %arg1: i32) -> (i32, i32) {
    %c0_i32 = arith.constant 0 : i32
    %c0_i32_0 = arith.constant 0 : i32
    return %arg0, %c0_i32 : i32, i32
  }
  func.func @transform_1(%arg0: i32, %arg1: i32) -> (i32, i32) {
    %c0_i32 = arith.constant 0 : i32
    %c0_i32_0 = arith.constant 0 : i32
    return %c0_i32, %arg1 : i32, i32
  }
  func.func @transform_2(%arg0: i32, %arg1: i32) -> (i32, i32) {
    %c0_i32 = arith.constant 0 : i32
    %c0_i32_0 = arith.constant 0 : i32
    return %c0_i32, %arg1 : i32, i32
  }
  func.func @transform_3(%arg0: i32, %arg1: i32) -> (i32, i32) {
    %c0_i32 = arith.constant 0 : i32
    return %arg0, %arg1 : i32, i32
  }
}

module attributes {stable_mosaic.version = 11 : i64} {
  func.func @_lstm_last_fc_kernel(%arg0: i32, %arg1: i32, %arg2: memref<8x8x512xf32, #tpu.memory_space<vmem>>, %arg3: memref<128x512xf32, #tpu.memory_space<vmem>>, %arg4: memref<128x4xf32, #tpu.memory_space<vmem>>, %arg5: memref<1x4xf32, #tpu.memory_space<vmem>>, %arg6: memref<8x4xf32, #tpu.memory_space<vmem>>, %arg7: memref<8x128xf32, #tpu.memory_space<vmem>>, %arg8: memref<8x128xf32, #tpu.memory_space<vmem>>) attributes {dimension_semantics = [#tpu.dimension_semantics<parallel>, #tpu.dimension_semantics<arbitrary>], iteration_bounds = array<i64: 1, 1>, scalar_prefetch = 0 : i64, scratch_operands = 2 : i64, tpu.core_type = #tpu.core_type<tc>, window_params = [{transform_indices = @transform_0, window_bounds = array<i64: 8, 8, 512>}, {pipeline_mode = #tpu.pipeline_mode<synchronous>, transform_indices = @transform_1, window_bounds = array<i64: 128, 512>}, {pipeline_mode = #tpu.pipeline_mode<synchronous>, transform_indices = @transform_2, window_bounds = array<i64: 128, 4>}, {pipeline_mode = #tpu.pipeline_mode<synchronous>, transform_indices = @transform_3, window_bounds = array<i64: 1, 4>}, {transform_indices = @transform_4, window_bounds = array<i64: 8, 4>}]} {
    %c0_i32 = arith.constant 0 : i32
    %0 = arith.cmpi eq, %arg1, %c0_i32 : i32
    %1 = arith.extui %0 : i1 to i32
    %c0_i32_0 = arith.constant 0 : i32
    %2 = arith.cmpi ne, %1, %c0_i32_0 : i32
    scf.if %2 {
      %cst_60 = arith.constant 0.000000e+00 : f32
      %251 = vector.broadcast %cst_60 : f32 to vector<8x128xf32>
      %c0_61 = arith.constant 0 : index
      %c0_62 = arith.constant 0 : index
      %252 = vector.load %arg7[%c0_61, %c0_62] : memref<8x128xf32, #tpu.memory_space<vmem>>, vector<8x128xf32>
      tpu.vector_store %arg7[%c0_61, %c0_62], %251 {strides = array<i32>} : memref<8x128xf32, #tpu.memory_space<vmem>>, vector<8x128xf32>,
      %cst_63 = arith.constant 0.000000e+00 : f32
      %253 = vector.broadcast %cst_63 : f32 to vector<8x128xf32>
      %c0_64 = arith.constant 0 : index
      %c0_65 = arith.constant 0 : index
      %254 = vector.load %arg8[%c0_64, %c0_65] : memref<8x128xf32, #tpu.memory_space<vmem>>, vector<8x128xf32>
      tpu.vector_store %arg8[%c0_64, %c0_65], %253 {strides = array<i32>} : memref<8x128xf32, #tpu.memory_space<vmem>>, vector<8x128xf32>,
    } else {
    }
    %c0 = arith.constant 0 : index
    %c0_1 = arith.constant 0 : index
    %3 = vector.load %arg3[%c0, %c0_1] : memref<128x512xf32, #tpu.memory_space<vmem>>, vector<128x512xf32>
    %c0_2 = arith.constant 0 : index
    %c0_3 = arith.constant 0 : index
    %4 = vector.load %arg7[%c0_2, %c0_3] : memref<8x128xf32, #tpu.memory_space<vmem>>, vector<8x128xf32>
    %c0_4 = arith.constant 0 : index
    %c0_5 = arith.constant 0 : index
    %5 = vector.load %arg8[%c0_4, %c0_5] : memref<8x128xf32, #tpu.memory_space<vmem>>, vector<8x128xf32>
    %c0_i32_6 = arith.constant 0 : i32
    %6 = arith.index_cast %c0_i32_6 : i32 to index
    %c0_7 = arith.constant 0 : index
    %c0_8 = arith.constant 0 : index
    %7 = vector.load %arg2[%6, %c0_7, %c0_8] : memref<8x8x512xf32, #tpu.memory_space<vmem>>, vector<1x8x512xf32>
    %8 = vector.shape_cast %7 : vector<1x8x512xf32> to vector<8x512xf32>
    %cst = arith.constant dense<0.000000e+00> : vector<8x512xf32>
    %9 = tpu.matmul %4, %3, %cst {dimension_numbers = #tpu.dot_dimension_numbers<[1], [0], [0], [1], [0, 0, 1, 1], [], []>} : vector<8x128xf32>, vector<128x512xf32>, vector<8x512xf32> -> vector<8x512xf32>
    %10 = arith.addf %8, %9 : vector<8x512xf32>
    %11 = vector.extract_strided_slice %10 {offsets = [0, 0], sizes = [8, 128], strides = [1, 1]} : vector<8x512xf32> to vector<8x128xf32>
    %12 = arith.negf %11 : vector<8x128xf32>
    %13 = math.exp %12 : vector<8x128xf32>
    %cst_9 = arith.constant 1.000000e+00 : f32
    %14 = vector.broadcast %cst_9 : f32 to vector<8x128xf32>
    %15 = arith.addf %14, %13 : vector<8x128xf32>
    %16 = arith.divf %14, %15 : vector<8x128xf32>
    %17 = vector.extract_strided_slice %10 {offsets = [0, 128], sizes = [8, 128], strides = [1, 1]} : vector<8x512xf32> to vector<8x128xf32>
    %18 = arith.negf %17 : vector<8x128xf32>
    %19 = math.exp %18 : vector<8x128xf32>
    %cst_10 = arith.constant 1.000000e+00 : f32
    %20 = vector.broadcast %cst_10 : f32 to vector<8x128xf32>
    %21 = arith.addf %20, %19 : vector<8x128xf32>
    %22 = arith.divf %20, %21 : vector<8x128xf32>
    %23 = vector.extract_strided_slice %10 {offsets = [0, 256], sizes = [8, 128], strides = [1, 1]} : vector<8x512xf32> to vector<8x128xf32>
    %24 = math.tanh %23 : vector<8x128xf32>
    %25 = vector.extract_strided_slice %10 {offsets = [0, 384], sizes = [8, 128], strides = [1, 1]} : vector<8x512xf32> to vector<8x128xf32>
    %26 = arith.negf %25 : vector<8x128xf32>
    %27 = math.exp %26 : vector<8x128xf32>
    %cst_11 = arith.constant 1.000000e+00 : f32
    %28 = vector.broadcast %cst_11 : f32 to vector<8x128xf32>
    %29 = arith.addf %28, %27 : vector<8x128xf32>
    %30 = arith.divf %28, %29 : vector<8x128xf32>
    %31 = arith.mulf %22, %5 : vector<8x128xf32>
    %32 = arith.mulf %16, %24 : vector<8x128xf32>
    %33 = arith.addf %31, %32 : vector<8x128xf32>
    %34 = math.tanh %33 : vector<8x128xf32>
    %35 = arith.mulf %30, %34 : vector<8x128xf32>
    %c1_i32 = arith.constant 1 : i32
    %36 = arith.index_cast %c1_i32 : i32 to index
    %c0_12 = arith.constant 0 : index
    %c0_13 = arith.constant 0 : index
    %37 = vector.load %arg2[%36, %c0_12, %c0_13] : memref<8x8x512xf32, #tpu.memory_space<vmem>>, vector<1x8x512xf32>
    %38 = vector.shape_cast %37 : vector<1x8x512xf32> to vector<8x512xf32>
    %cst_14 = arith.constant dense<0.000000e+00> : vector<8x512xf32>
    %39 = tpu.matmul %35, %3, %cst_14 {dimension_numbers = #tpu.dot_dimension_numbers<[1], [0], [0], [1], [0, 0, 1, 1], [], []>} : vector<8x128xf32>, vector<128x512xf32>, vector<8x512xf32> -> vector<8x512xf32>
    %40 = arith.addf %38, %39 : vector<8x512xf32>
    %41 = vector.extract_strided_slice %40 {offsets = [0, 0], sizes = [8, 128], strides = [1, 1]} : vector<8x512xf32> to vector<8x128xf32>
    %42 = arith.negf %41 : vector<8x128xf32>
    %43 = math.exp %42 : vector<8x128xf32>
    %cst_15 = arith.constant 1.000000e+00 : f32
    %44 = vector.broadcast %cst_15 : f32 to vector<8x128xf32>
    %45 = arith.addf %44, %43 : vector<8x128xf32>
    %46 = arith.divf %44, %45 : vector<8x128xf32>
    %47 = vector.extract_strided_slice %40 {offsets = [0, 128], sizes = [8, 128], strides = [1, 1]} : vector<8x512xf32> to vector<8x128xf32>
    %48 = arith.negf %47 : vector<8x128xf32>
    %49 = math.exp %48 : vector<8x128xf32>
    %cst_16 = arith.constant 1.000000e+00 : f32
    %50 = vector.broadcast %cst_16 : f32 to vector<8x128xf32>
    %51 = arith.addf %50, %49 : vector<8x128xf32>
    %52 = arith.divf %50, %51 : vector<8x128xf32>
    %53 = vector.extract_strided_slice %40 {offsets = [0, 256], sizes = [8, 128], strides = [1, 1]} : vector<8x512xf32> to vector<8x128xf32>
    %54 = math.tanh %53 : vector<8x128xf32>
    %55 = vector.extract_strided_slice %40 {offsets = [0, 384], sizes = [8, 128], strides = [1, 1]} : vector<8x512xf32> to vector<8x128xf32>
    %56 = arith.negf %55 : vector<8x128xf32>
    %57 = math.exp %56 : vector<8x128xf32>
    %cst_17 = arith.constant 1.000000e+00 : f32
    %58 = vector.broadcast %cst_17 : f32 to vector<8x128xf32>
    %59 = arith.addf %58, %57 : vector<8x128xf32>
    %60 = arith.divf %58, %59 : vector<8x128xf32>
    %61 = arith.mulf %52, %33 : vector<8x128xf32>
    %62 = arith.mulf %46, %54 : vector<8x128xf32>
    %63 = arith.addf %61, %62 : vector<8x128xf32>
    %64 = math.tanh %63 : vector<8x128xf32>
    %65 = arith.mulf %60, %64 : vector<8x128xf32>
    %c2_i32 = arith.constant 2 : i32
    %66 = arith.index_cast %c2_i32 : i32 to index
    %c0_18 = arith.constant 0 : index
    %c0_19 = arith.constant 0 : index
    %67 = vector.load %arg2[%66, %c0_18, %c0_19] : memref<8x8x512xf32, #tpu.memory_space<vmem>>, vector<1x8x512xf32>
    %68 = vector.shape_cast %67 : vector<1x8x512xf32> to vector<8x512xf32>
    %cst_20 = arith.constant dense<0.000000e+00> : vector<8x512xf32>
    %69 = tpu.matmul %65, %3, %cst_20 {dimension_numbers = #tpu.dot_dimension_numbers<[1], [0], [0], [1], [0, 0, 1, 1], [], []>} : vector<8x128xf32>, vector<128x512xf32>, vector<8x512xf32> -> vector<8x512xf32>
    %70 = arith.addf %68, %69 : vector<8x512xf32>
    %71 = vector.extract_strided_slice %70 {offsets = [0, 0], sizes = [8, 128], strides = [1, 1]} : vector<8x512xf32> to vector<8x128xf32>
    %72 = arith.negf %71 : vector<8x128xf32>
    %73 = math.exp %72 : vector<8x128xf32>
    %cst_21 = arith.constant 1.000000e+00 : f32
    %74 = vector.broadcast %cst_21 : f32 to vector<8x128xf32>
    %75 = arith.addf %74, %73 : vector<8x128xf32>
    %76 = arith.divf %74, %75 : vector<8x128xf32>
    %77 = vector.extract_strided_slice %70 {offsets = [0, 128], sizes = [8, 128], strides = [1, 1]} : vector<8x512xf32> to vector<8x128xf32>
    %78 = arith.negf %77 : vector<8x128xf32>
    %79 = math.exp %78 : vector<8x128xf32>
    %cst_22 = arith.constant 1.000000e+00 : f32
    %80 = vector.broadcast %cst_22 : f32 to vector<8x128xf32>
    %81 = arith.addf %80, %79 : vector<8x128xf32>
    %82 = arith.divf %80, %81 : vector<8x128xf32>
    %83 = vector.extract_strided_slice %70 {offsets = [0, 256], sizes = [8, 128], strides = [1, 1]} : vector<8x512xf32> to vector<8x128xf32>
    %84 = math.tanh %83 : vector<8x128xf32>
    %85 = vector.extract_strided_slice %70 {offsets = [0, 384], sizes = [8, 128], strides = [1, 1]} : vector<8x512xf32> to vector<8x128xf32>
    %86 = arith.negf %85 : vector<8x128xf32>
    %87 = math.exp %86 : vector<8x128xf32>
    %cst_23 = arith.constant 1.000000e+00 : f32
    %88 = vector.broadcast %cst_23 : f32 to vector<8x128xf32>
    %89 = arith.addf %88, %87 : vector<8x128xf32>
    %90 = arith.divf %88, %89 : vector<8x128xf32>
    %91 = arith.mulf %82, %63 : vector<8x128xf32>
    %92 = arith.mulf %76, %84 : vector<8x128xf32>
    %93 = arith.addf %91, %92 : vector<8x128xf32>
    %94 = math.tanh %93 : vector<8x128xf32>
    %95 = arith.mulf %90, %94 : vector<8x128xf32>
    %c3_i32 = arith.constant 3 : i32
    %96 = arith.index_cast %c3_i32 : i32 to index
    %c0_24 = arith.constant 0 : index
    %c0_25 = arith.constant 0 : index
    %97 = vector.load %arg2[%96, %c0_24, %c0_25] : memref<8x8x512xf32, #tpu.memory_space<vmem>>, vector<1x8x512xf32>
    %98 = vector.shape_cast %97 : vector<1x8x512xf32> to vector<8x512xf32>
    %cst_26 = arith.constant dense<0.000000e+00> : vector<8x512xf32>
    %99 = tpu.matmul %95, %3, %cst_26 {dimension_numbers = #tpu.dot_dimension_numbers<[1], [0], [0], [1], [0, 0, 1, 1], [], []>} : vector<8x128xf32>, vector<128x512xf32>, vector<8x512xf32> -> vector<8x512xf32>
    %100 = arith.addf %98, %99 : vector<8x512xf32>
    %101 = vector.extract_strided_slice %100 {offsets = [0, 0], sizes = [8, 128], strides = [1, 1]} : vector<8x512xf32> to vector<8x128xf32>
    %102 = arith.negf %101 : vector<8x128xf32>
    %103 = math.exp %102 : vector<8x128xf32>
    %cst_27 = arith.constant 1.000000e+00 : f32
    %104 = vector.broadcast %cst_27 : f32 to vector<8x128xf32>
    %105 = arith.addf %104, %103 : vector<8x128xf32>
    %106 = arith.divf %104, %105 : vector<8x128xf32>
    %107 = vector.extract_strided_slice %100 {offsets = [0, 128], sizes = [8, 128], strides = [1, 1]} : vector<8x512xf32> to vector<8x128xf32>
    %108 = arith.negf %107 : vector<8x128xf32>
    %109 = math.exp %108 : vector<8x128xf32>
    %cst_28 = arith.constant 1.000000e+00 : f32
    %110 = vector.broadcast %cst_28 : f32 to vector<8x128xf32>
    %111 = arith.addf %110, %109 : vector<8x128xf32>
    %112 = arith.divf %110, %111 : vector<8x128xf32>
    %113 = vector.extract_strided_slice %100 {offsets = [0, 256], sizes = [8, 128], strides = [1, 1]} : vector<8x512xf32> to vector<8x128xf32>
    %114 = math.tanh %113 : vector<8x128xf32>
    %115 = vector.extract_strided_slice %100 {offsets = [0, 384], sizes = [8, 128], strides = [1, 1]} : vector<8x512xf32> to vector<8x128xf32>
    %116 = arith.negf %115 : vector<8x128xf32>
    %117 = math.exp %116 : vector<8x128xf32>
    %cst_29 = arith.constant 1.000000e+00 : f32
    %118 = vector.broadcast %cst_29 : f32 to vector<8x128xf32>
    %119 = arith.addf %118, %117 : vector<8x128xf32>
    %120 = arith.divf %118, %119 : vector<8x128xf32>
    %121 = arith.mulf %112, %93 : vector<8x128xf32>
    %122 = arith.mulf %106, %114 : vector<8x128xf32>
    %123 = arith.addf %121, %122 : vector<8x128xf32>
    %124 = math.tanh %123 : vector<8x128xf32>
    %125 = arith.mulf %120, %124 : vector<8x128xf32>
    %c4_i32 = arith.constant 4 : i32
    %126 = arith.index_cast %c4_i32 : i32 to index
    %c0_30 = arith.constant 0 : index
    %c0_31 = arith.constant 0 : index
    %127 = vector.load %arg2[%126, %c0_30, %c0_31] : memref<8x8x512xf32, #tpu.memory_space<vmem>>, vector<1x8x512xf32>
    %128 = vector.shape_cast %127 : vector<1x8x512xf32> to vector<8x512xf32>
    %cst_32 = arith.constant dense<0.000000e+00> : vector<8x512xf32>
    %129 = tpu.matmul %125, %3, %cst_32 {dimension_numbers = #tpu.dot_dimension_numbers<[1], [0], [0], [1], [0, 0, 1, 1], [], []>} : vector<8x128xf32>, vector<128x512xf32>, vector<8x512xf32> -> vector<8x512xf32>
    %130 = arith.addf %128, %129 : vector<8x512xf32>
    %131 = vector.extract_strided_slice %130 {offsets = [0, 0], sizes = [8, 128], strides = [1, 1]} : vector<8x512xf32> to vector<8x128xf32>
    %132 = arith.negf %131 : vector<8x128xf32>
    %133 = math.exp %132 : vector<8x128xf32>
    %cst_33 = arith.constant 1.000000e+00 : f32
    %134 = vector.broadcast %cst_33 : f32 to vector<8x128xf32>
    %135 = arith.addf %134, %133 : vector<8x128xf32>
    %136 = arith.divf %134, %135 : vector<8x128xf32>
    %137 = vector.extract_strided_slice %130 {offsets = [0, 128], sizes = [8, 128], strides = [1, 1]} : vector<8x512xf32> to vector<8x128xf32>
    %138 = arith.negf %137 : vector<8x128xf32>
    %139 = math.exp %138 : vector<8x128xf32>
    %cst_34 = arith.constant 1.000000e+00 : f32
    %140 = vector.broadcast %cst_34 : f32 to vector<8x128xf32>
    %141 = arith.addf %140, %139 : vector<8x128xf32>
    %142 = arith.divf %140, %141 : vector<8x128xf32>
    %143 = vector.extract_strided_slice %130 {offsets = [0, 256], sizes = [8, 128], strides = [1, 1]} : vector<8x512xf32> to vector<8x128xf32>
    %144 = math.tanh %143 : vector<8x128xf32>
    %145 = vector.extract_strided_slice %130 {offsets = [0, 384], sizes = [8, 128], strides = [1, 1]} : vector<8x512xf32> to vector<8x128xf32>
    %146 = arith.negf %145 : vector<8x128xf32>
    %147 = math.exp %146 : vector<8x128xf32>
    %cst_35 = arith.constant 1.000000e+00 : f32
    %148 = vector.broadcast %cst_35 : f32 to vector<8x128xf32>
    %149 = arith.addf %148, %147 : vector<8x128xf32>
    %150 = arith.divf %148, %149 : vector<8x128xf32>
    %151 = arith.mulf %142, %123 : vector<8x128xf32>
    %152 = arith.mulf %136, %144 : vector<8x128xf32>
    %153 = arith.addf %151, %152 : vector<8x128xf32>
    %154 = math.tanh %153 : vector<8x128xf32>
    %155 = arith.mulf %150, %154 : vector<8x128xf32>
    %c5_i32 = arith.constant 5 : i32
    %156 = arith.index_cast %c5_i32 : i32 to index
    %c0_36 = arith.constant 0 : index
    %c0_37 = arith.constant 0 : index
    %157 = vector.load %arg2[%156, %c0_36, %c0_37] : memref<8x8x512xf32, #tpu.memory_space<vmem>>, vector<1x8x512xf32>
    %158 = vector.shape_cast %157 : vector<1x8x512xf32> to vector<8x512xf32>
    %cst_38 = arith.constant dense<0.000000e+00> : vector<8x512xf32>
    %159 = tpu.matmul %155, %3, %cst_38 {dimension_numbers = #tpu.dot_dimension_numbers<[1], [0], [0], [1], [0, 0, 1, 1], [], []>} : vector<8x128xf32>, vector<128x512xf32>, vector<8x512xf32> -> vector<8x512xf32>
    %160 = arith.addf %158, %159 : vector<8x512xf32>
    %161 = vector.extract_strided_slice %160 {offsets = [0, 0], sizes = [8, 128], strides = [1, 1]} : vector<8x512xf32> to vector<8x128xf32>
    %162 = arith.negf %161 : vector<8x128xf32>
    %163 = math.exp %162 : vector<8x128xf32>
    %cst_39 = arith.constant 1.000000e+00 : f32
    %164 = vector.broadcast %cst_39 : f32 to vector<8x128xf32>
    %165 = arith.addf %164, %163 : vector<8x128xf32>
    %166 = arith.divf %164, %165 : vector<8x128xf32>
    %167 = vector.extract_strided_slice %160 {offsets = [0, 128], sizes = [8, 128], strides = [1, 1]} : vector<8x512xf32> to vector<8x128xf32>
    %168 = arith.negf %167 : vector<8x128xf32>
    %169 = math.exp %168 : vector<8x128xf32>
    %cst_40 = arith.constant 1.000000e+00 : f32
    %170 = vector.broadcast %cst_40 : f32 to vector<8x128xf32>
    %171 = arith.addf %170, %169 : vector<8x128xf32>
    %172 = arith.divf %170, %171 : vector<8x128xf32>
    %173 = vector.extract_strided_slice %160 {offsets = [0, 256], sizes = [8, 128], strides = [1, 1]} : vector<8x512xf32> to vector<8x128xf32>
    %174 = math.tanh %173 : vector<8x128xf32>
    %175 = vector.extract_strided_slice %160 {offsets = [0, 384], sizes = [8, 128], strides = [1, 1]} : vector<8x512xf32> to vector<8x128xf32>
    %176 = arith.negf %175 : vector<8x128xf32>
    %177 = math.exp %176 : vector<8x128xf32>
    %cst_41 = arith.constant 1.000000e+00 : f32
    %178 = vector.broadcast %cst_41 : f32 to vector<8x128xf32>
    %179 = arith.addf %178, %177 : vector<8x128xf32>
    %180 = arith.divf %178, %179 : vector<8x128xf32>
    %181 = arith.mulf %172, %153 : vector<8x128xf32>
    %182 = arith.mulf %166, %174 : vector<8x128xf32>
    %183 = arith.addf %181, %182 : vector<8x128xf32>
    %184 = math.tanh %183 : vector<8x128xf32>
    %185 = arith.mulf %180, %184 : vector<8x128xf32>
    %c6_i32 = arith.constant 6 : i32
    %186 = arith.index_cast %c6_i32 : i32 to index
    %c0_42 = arith.constant 0 : index
    %c0_43 = arith.constant 0 : index
    %187 = vector.load %arg2[%186, %c0_42, %c0_43] : memref<8x8x512xf32, #tpu.memory_space<vmem>>, vector<1x8x512xf32>
    %188 = vector.shape_cast %187 : vector<1x8x512xf32> to vector<8x512xf32>
    %cst_44 = arith.constant dense<0.000000e+00> : vector<8x512xf32>
    %189 = tpu.matmul %185, %3, %cst_44 {dimension_numbers = #tpu.dot_dimension_numbers<[1], [0], [0], [1], [0, 0, 1, 1], [], []>} : vector<8x128xf32>, vector<128x512xf32>, vector<8x512xf32> -> vector<8x512xf32>
    %190 = arith.addf %188, %189 : vector<8x512xf32>
    %191 = vector.extract_strided_slice %190 {offsets = [0, 0], sizes = [8, 128], strides = [1, 1]} : vector<8x512xf32> to vector<8x128xf32>
    %192 = arith.negf %191 : vector<8x128xf32>
    %193 = math.exp %192 : vector<8x128xf32>
    %cst_45 = arith.constant 1.000000e+00 : f32
    %194 = vector.broadcast %cst_45 : f32 to vector<8x128xf32>
    %195 = arith.addf %194, %193 : vector<8x128xf32>
    %196 = arith.divf %194, %195 : vector<8x128xf32>
    %197 = vector.extract_strided_slice %190 {offsets = [0, 128], sizes = [8, 128], strides = [1, 1]} : vector<8x512xf32> to vector<8x128xf32>
    %198 = arith.negf %197 : vector<8x128xf32>
    %199 = math.exp %198 : vector<8x128xf32>
    %cst_46 = arith.constant 1.000000e+00 : f32
    %200 = vector.broadcast %cst_46 : f32 to vector<8x128xf32>
    %201 = arith.addf %200, %199 : vector<8x128xf32>
    %202 = arith.divf %200, %201 : vector<8x128xf32>
    %203 = vector.extract_strided_slice %190 {offsets = [0, 256], sizes = [8, 128], strides = [1, 1]} : vector<8x512xf32> to vector<8x128xf32>
    %204 = math.tanh %203 : vector<8x128xf32>
    %205 = vector.extract_strided_slice %190 {offsets = [0, 384], sizes = [8, 128], strides = [1, 1]} : vector<8x512xf32> to vector<8x128xf32>
    %206 = arith.negf %205 : vector<8x128xf32>
    %207 = math.exp %206 : vector<8x128xf32>
    %cst_47 = arith.constant 1.000000e+00 : f32
    %208 = vector.broadcast %cst_47 : f32 to vector<8x128xf32>
    %209 = arith.addf %208, %207 : vector<8x128xf32>
    %210 = arith.divf %208, %209 : vector<8x128xf32>
    %211 = arith.mulf %202, %183 : vector<8x128xf32>
    %212 = arith.mulf %196, %204 : vector<8x128xf32>
    %213 = arith.addf %211, %212 : vector<8x128xf32>
    %214 = math.tanh %213 : vector<8x128xf32>
    %215 = arith.mulf %210, %214 : vector<8x128xf32>
    %c7_i32 = arith.constant 7 : i32
    %216 = arith.index_cast %c7_i32 : i32 to index
    %c0_48 = arith.constant 0 : index
    %c0_49 = arith.constant 0 : index
    %217 = vector.load %arg2[%216, %c0_48, %c0_49] : memref<8x8x512xf32, #tpu.memory_space<vmem>>, vector<1x8x512xf32>
    %218 = vector.shape_cast %217 : vector<1x8x512xf32> to vector<8x512xf32>
    %cst_50 = arith.constant dense<0.000000e+00> : vector<8x512xf32>
    %219 = tpu.matmul %215, %3, %cst_50 {dimension_numbers = #tpu.dot_dimension_numbers<[1], [0], [0], [1], [0, 0, 1, 1], [], []>} : vector<8x128xf32>, vector<128x512xf32>, vector<8x512xf32> -> vector<8x512xf32>
    %220 = arith.addf %218, %219 : vector<8x512xf32>
    %221 = vector.extract_strided_slice %220 {offsets = [0, 0], sizes = [8, 128], strides = [1, 1]} : vector<8x512xf32> to vector<8x128xf32>
    %222 = arith.negf %221 : vector<8x128xf32>
    %223 = math.exp %222 : vector<8x128xf32>
    %cst_51 = arith.constant 1.000000e+00 : f32
    %224 = vector.broadcast %cst_51 : f32 to vector<8x128xf32>
    %225 = arith.addf %224, %223 : vector<8x128xf32>
    %226 = arith.divf %224, %225 : vector<8x128xf32>
    %227 = vector.extract_strided_slice %220 {offsets = [0, 128], sizes = [8, 128], strides = [1, 1]} : vector<8x512xf32> to vector<8x128xf32>
    %228 = arith.negf %227 : vector<8x128xf32>
    %229 = math.exp %228 : vector<8x128xf32>
    %cst_52 = arith.constant 1.000000e+00 : f32
    %230 = vector.broadcast %cst_52 : f32 to vector<8x128xf32>
    %231 = arith.addf %230, %229 : vector<8x128xf32>
    %232 = arith.divf %230, %231 : vector<8x128xf32>
    %233 = vector.extract_strided_slice %220 {offsets = [0, 256], sizes = [8, 128], strides = [1, 1]} : vector<8x512xf32> to vector<8x128xf32>
    %234 = math.tanh %233 : vector<8x128xf32>
    %235 = vector.extract_strided_slice %220 {offsets = [0, 384], sizes = [8, 128], strides = [1, 1]} : vector<8x512xf32> to vector<8x128xf32>
    %236 = arith.negf %235 : vector<8x128xf32>
    %237 = math.exp %236 : vector<8x128xf32>
    %cst_53 = arith.constant 1.000000e+00 : f32
    %238 = vector.broadcast %cst_53 : f32 to vector<8x128xf32>
    %239 = arith.addf %238, %237 : vector<8x128xf32>
    %240 = arith.divf %238, %239 : vector<8x128xf32>
    %241 = arith.mulf %232, %213 : vector<8x128xf32>
    %242 = arith.mulf %226, %234 : vector<8x128xf32>
    %243 = arith.addf %241, %242 : vector<8x128xf32>
    %244 = math.tanh %243 : vector<8x128xf32>
    %245 = arith.mulf %240, %244 : vector<8x128xf32>
    %c8_i32 = arith.constant 8 : i32
    %c0_54 = arith.constant 0 : index
    %c0_55 = arith.constant 0 : index
    %246 = vector.load %arg7[%c0_54, %c0_55] : memref<8x128xf32, #tpu.memory_space<vmem>>, vector<8x128xf32>
    tpu.vector_store %arg7[%c0_54, %c0_55], %245 {strides = array<i32>} : memref<8x128xf32, #tpu.memory_space<vmem>>, vector<8x128xf32>,
    %c0_56 = arith.constant 0 : index
    %c0_57 = arith.constant 0 : index
    %247 = vector.load %arg8[%c0_56, %c0_57] : memref<8x128xf32, #tpu.memory_space<vmem>>, vector<8x128xf32>
    tpu.vector_store %arg8[%c0_56, %c0_57], %243 {strides = array<i32>} : memref<8x128xf32, #tpu.memory_space<vmem>>, vector<8x128xf32>,
    %c0_i32_58 = arith.constant 0 : i32
    %248 = arith.cmpi eq, %arg1, %c0_i32_58 : i32
    %249 = arith.extui %248 : i1 to i32
    %c0_i32_59 = arith.constant 0 : i32
    %250 = arith.cmpi ne, %249, %c0_i32_59 : i32
    scf.if %250 {
      %c0_60 = arith.constant 0 : index
      %c0_61 = arith.constant 0 : index
      %251 = vector.load %arg4[%c0_60, %c0_61] : memref<128x4xf32, #tpu.memory_space<vmem>>, vector<128x4xf32>
      %cst_62 = arith.constant dense<0.000000e+00> : vector<8x4xf32>
      %252 = tpu.matmul %245, %251, %cst_62 {dimension_numbers = #tpu.dot_dimension_numbers<[1], [0], [0], [1], [0, 0, 1, 1], [], []>} : vector<8x128xf32>, vector<128x4xf32>, vector<8x4xf32> -> vector<8x4xf32>
      %c0_63 = arith.constant 0 : index
      %c0_64 = arith.constant 0 : index
      %253 = vector.load %arg5[%c0_63, %c0_64] : memref<1x4xf32, #tpu.memory_space<vmem>>, vector<1x4xf32>
      %254 = vector.broadcast %253 : vector<1x4xf32> to vector<8x4xf32>
      %255 = arith.addf %252, %254 : vector<8x4xf32>
      %c0_65 = arith.constant 0 : index
      %c0_66 = arith.constant 0 : index
      %256 = vector.load %arg6[%c0_65, %c0_66] : memref<8x4xf32, #tpu.memory_space<vmem>>, vector<8x4xf32>
      tpu.vector_store %arg6[%c0_65, %c0_66], %255 {strides = array<i32>} : memref<8x4xf32, #tpu.memory_space<vmem>>, vector<8x4xf32>,
    } else {
    }
    return
  }
  func.func @transform_0(%arg0: i32, %arg1: i32) -> (i32, i32, i32) {
    %c0_i32 = arith.constant 0 : i32
    %c0_i32_0 = arith.constant 0 : i32
    return %arg1, %arg0, %c0_i32 : i32, i32, i32
  }
  func.func @transform_1(%arg0: i32, %arg1: i32) -> (i32, i32) {
    %c0_i32 = arith.constant 0 : i32
    %c0_i32_0 = arith.constant 0 : i32
    %c0_i32_1 = arith.constant 0 : i32
    return %c0_i32, %c0_i32_0 : i32, i32
  }
  func.func @transform_2(%arg0: i32, %arg1: i32) -> (i32, i32) {
    %c0_i32 = arith.constant 0 : i32
    %c0_i32_0 = arith.constant 0 : i32
    %c0_i32_1 = arith.constant 0 : i32
    return %c0_i32, %c0_i32_0 : i32, i32
  }
  func.func @transform_3(%arg0: i32, %arg1: i32) -> (i32, i32) {
    %c0_i32 = arith.constant 0 : i32
    %c0_i32_0 = arith.constant 0 : i32
    %c0_i32_1 = arith.constant 0 : i32
    return %c0_i32, %c0_i32_0 : i32, i32
  }
  func.func @transform_4(%arg0: i32, %arg1: i32) -> (i32, i32) {
    %c0_i32 = arith.constant 0 : i32
    %c0_i32_0 = arith.constant 0 : i32
    return %arg0, %c0_i32 : i32, i32
  }
}

</mosaic_0001>

<bundles_post_ra>
// kernel: lstm_model_forward.4
= control target key start
LH: loop header
LB: loop body
LE: loop exit
PB: predicated region body
PF: predicated region fallthrough
CT: control target
= control target key end

     0   :  { %8 = vsyncpa [#allocation3], 0  ;;  %s659_s0 = inlined_call_operand.hbm [shape: f32[64,16], index: 0, kind: input, shape index: {}]   ;;  %s660_s1 = inlined_call_operand.hbm [shape: f32[16,512], index: 1, kind: input, shape index: {}]   ;;  %s661_s2 = inlined_call_operand.hbm [shape: f32[1,512], index: 2, kind: input, shape index: {}]   ;;  %s662_s3 = inlined_call_operand.hbm [shape: f32[64,512], index: 3, kind: output, shape index: {}]  }
   0x1   :  { %9 = vsyncpa [#allocation6], 0 }
   0x2   :  { %10 = vsyncpa [#allocation4], 0  ;;  %s520_s12 = smov [#allocation5]   ;;  %s426_s16 = scalar_lea.hbm %s660_s1, 1024 }
   0x3   :  { %s28_s13 = sshll.u32 %s520_s12, 4  ;;  %p427_p0 = scmp.ne.s32.totalorder %s660_s1, %s426_s16  ;;  %s29_s13 = int_to_ptr.vmem [resolvable:$true] %s28_s13 }
   0x4   :  { %p430_p1 = scmp.lt.u32.totalorder %s426_s16, %s660_s1 }
   0x6   :  { %p432_p2 = pnand %p430_p1, %p427_p0 }
   0x8   :  { %435 = shalt.err (!%p432_p2)
}
   0x9   :  { %s436_s21 = scalar_lea.vmem %s29_s13, 1024  ;;  %p441_p4 = scmp.lt.s32.totalorder %s29_s13, %s29_s13 }
   0xa   :  { %p437_p3 = scmp.ne.s32.totalorder %s29_s13, %s436_s21  ;;  %p442_p5 = scmp.lt.s32.totalorder %s436_s21, %s436_s21 }
   0xc   :  { %p443_p6 = por %p442_p5, %p441_p4 }
   0xe   :  { %p444_p7 = pnand %p443_p6, %p437_p3 }
  0x10   :  { %447 = shalt.err (!%p444_p7)
}
  0x11   :  { %s521_s22 = smov 512   ;;  %s522_s23 = smov 32  }
  0x12   :  { %34 = dma.hbm_to_vmem [thread:$0]  %s660_s1, 1024, %s29_s13, [#allocation6], %s521_s22, %s521_s22, %s522_s23  }
  0x13   :  { %s523_s26 = smov [#allocation2]   ;;  %s448_s30 = scalar_lea.hbm %s659_s0, 1024 }
  0x14   :  { %s16_s27 = sshll.u32 %s523_s26, 4  ;;  %p449_p8 = scmp.ne.s32.totalorder %s659_s0, %s448_s30  ;;  %s17_s27 = int_to_ptr.vmem [resolvable:$true] %s16_s27 }
  0x15   :  { %p452_p9 = scmp.lt.u32.totalorder %s448_s30, %s659_s0 }
  0x17   :  { %p454_p10 = pnand %p452_p9, %p449_p8 }
  0x19   :  { %457 = shalt.err (!%p454_p10)
}
  0x1a   :  { %s458_s8 = scalar_lea.vmem %s17_s27, 1024  ;;  %p463_p12 = scmp.lt.s32.totalorder %s17_s27, %s17_s27 }
  0x1b   :  { %p459_p11 = scmp.ne.s32.totalorder %s17_s27, %s458_s8  ;;  %p464_p13 = scmp.lt.s32.totalorder %s458_s8, %s458_s8 }
  0x1d   :  { %p465_p0 = por %p464_p13, %p463_p12 }
  0x1f   :  { %p466_p1 = pnand %p465_p0, %p459_p11 }
  0x21   :  { %469 = shalt.err (!%p466_p1)
}
  0x22   :  { %s524_s1 = smov 128   ;;  %s525_s9 = smov 8  }
  0x23   :  { %22 = dma.hbm_to_vmem [thread:$0]  %s659_s0, 1024, %s17_s27, [#allocation3], %s524_s1, %s524_s1, %s525_s9  }
  0x24   :  { %s526_s12 = smov [#allocation7]   ;;  %s470_s16 = scalar_lea.hbm %s661_s2, 64 }
  0x25   :  { %s41_s13 = sshll.u32 %s526_s12, 4  ;;  %p471_p2 = scmp.ne.s32.totalorder %s661_s2, %s470_s16  ;;  %s42_s13 = int_to_ptr.vmem [resolvable:$true] %s41_s13 }
  0x26   :  { %p474_p3 = scmp.lt.u32.totalorder %s470_s16, %s661_s2 }
  0x28   :  { %p476_p4 = pnand %p474_p3, %p471_p2 }
  0x2a   :  { %479 = shalt.err (!%p476_p4)
}
  0x2b   :  { %s480_s21 = scalar_lea.vmem %s42_s13, 64  ;;  %p485_p6 = scmp.lt.s32.totalorder %s42_s13, %s42_s13 }
  0x2c   :  { %p481_p5 = scmp.ne.s32.totalorder %s42_s13, %s480_s21  ;;  %p486_p7 = scmp.lt.s32.totalorder %s480_s21, %s480_s21 }
  0x2e   :  { %p487_p8 = por %p486_p7, %p485_p6 }
  0x30   :  { %p488_p9 = pnand %p487_p8, %p481_p5 }
  0x32   :  { %491 = shalt.err (!%p488_p9)
}
  0x33   :  { %44 = dma.hbm_to_vmem [thread:$0]  %s661_s2, 64, %s42_s13, [#allocation6]  }
  0x34   :  { %514 = dma.done.wait [#allocation3], 1024  }
  0x35   :  { %515 = vsyncadd [#allocation3], 4294966272 }
  0x36   :  { %516 = dma.done.wait [#allocation6], 1088  }
  0x37   :  { %517 = vsyncadd [#allocation6], 4294966208  ;;  %v527_v0 = vmov 0.0   ;;  %v63_v1 = vld [vmem:[#allocation5 + $0x8] sm:$0xff]  ;;  %v65_v3 = vld [vmem:[#allocation5 + $0x18] sm:$0xff]  ;;  %vm92_vm0 = vcmask 130048   ;;  %v72_v21 = vlaneseq }
  0x38   :  { %181 = vmatprep.mubr.f32.mxu0 %v527_v0  ;;  %294 = vmatprep.mubr.f32.mxu1 %v527_v0  ;;  %v67_v2 = vld [vmem:[#allocation5 + $0x28] sm:$0xff]  ;;  %v69_v5 = vld [vmem:[#allocation5 + $0x38] sm:$0xff]  ;;  %v62_v6 = vld [vmem:[#allocation5] sm:$0xff]  ;;  %s528_s2 = smov [#allocation8]  }
  0x39   :  { %v409_v4 = vpack.c.bf16 %v67_v2, %v63_v1  ;;  %v66_v7 = vld [vmem:[#allocation5 + $0x20] sm:$0xff]  ;;  %v413_v8 = vpack.c.bf16 %v69_v5, %v65_v3  ;;  %v64_v10 = vld [vmem:[#allocation5 + $0x10] sm:$0xff]  ;;  %v55_v14 = vld [vmem:[#allocation2 + $0x8] sm:$0xff]  ;;  %v73_v22 = vshrl.u32 %v72_v21, 7  ;;  %s380_s25 = sshll.u32 %s528_s2, 4  ;;  %s381_s25 = int_to_ptr.vmem [resolvable:$true] %s380_s25 }
  0x3a   :  { %v411_v9 = vpack.c.bf16 %v66_v7, %v62_v6  ;;  %v68_v11 = vld [vmem:[#allocation5 + $0x30] sm:$0xff]  ;;  %v54_v13 = vld [vmem:[#allocation2] sm:$0xff]  ;;  %v57_v16 = vld [vmem:[#allocation2 + $0x18] sm:$0xff]  ;;  %s492_s26 = scalar_lea.vmem %s381_s25, 4096  ;;  %p497_p11 = scmp.lt.s32.totalorder %s381_s25, %s381_s25 }
  0x3b   :  { %410 = vmatprep.subr.bf16.mxu0 %v409_v4  ;;  %v415_v12 = vpack.c.bf16 %v68_v11, %v64_v10  ;;  %414 = vmatprep.subr.bf16.mxu1 %v413_v8  ;;  %v56_v15 = vld [vmem:[#allocation2 + $0x10] sm:$0xff]  ;;  %v58_v17 = vld [vmem:[#allocation2 + $0x20] sm:$0xff]  ;;  %v59_v18 = vld [vmem:[#allocation2 + $0x28] sm:$0xff]  ;;  %v74_v23 = vsub.s32 0, %v73_v22  ;;  %v82_v25 = vsub.s32 2, %v73_v22  ;;  %v78_v26 = vsub.s32 1, %v73_v22  ;;  %p493_p10 = scmp.ne.s32.totalorder %s381_s25, %s492_s26  ;;  %p498_p12 = scmp.lt.s32.totalorder %s492_s26, %s492_s26 }
  0x3c   :  { %412 = vmatpush1.bf16.msra.mxu0 %v411_v9  ;;  %v60_v19 = vld [vmem:[#allocation2 + $0x30] sm:$0xff]  ;;  %v61_v20 = vld [vmem:[#allocation2 + $0x38] sm:$0xff]  ;;  %v70_v24 = vld [vmem:[#allocation7] sm:$0xf]  ;;  %v86_v27 = vsub.s32 3, %v73_v22 }
  0x3d   :  { %416 = vmatpush1.bf16.msra.mxu1 %v415_v12  ;;  %v604_v28 = vrot.slane %v70_v24, %v74_v23  ;;  %v606_v29 = vrot.slane %v70_v24, %v82_v25  ;;  %v608_v30 = vrot.slane %v70_v24, %v78_v26  ;;  %p499_p13 = por %p498_p12, %p497_p11 }
  0x3e   :  { %v610_v31 = vrot.slane %v70_v24, %v86_v27 }
  0x3f   :  { %393 = vmatmul.mubr.msk.f32.vlgmr.msra.gmra.mrb[0].mxu0 %vm92_vm0, %v54_v13  ;;  %p500_p0 = pnand %p499_p13, %p493_p10 }
  0x40   :  { %401 = vmatmul.mubr.msk.f32.vlgmr.msra.gmra.mrb[0].mxu1 %vm92_vm0, %v54_v13  ;;  %187 = vmatprep.mubr.f32.mxu0 %v527_v0 }
  0x41   :  { %300 = vmatprep.mubr.f32.mxu1 %v527_v0 }
  0x43   :  { %394 = vmatmul.mubr.msk.f32.gmra.mrb[2].mxu0 %vm92_vm0, %v55_v14 }
  0x44   :  { %402 = vmatmul.mubr.msk.f32.gmra.mrb[2].mxu1 %vm92_vm0, %v55_v14  ;;  %193 = vmatprep.mubr.f32.mxu0 %v527_v0 }
  0x45   :  { %306 = vmatprep.mubr.f32.mxu1 %v527_v0 }
  0x47   :  { %395 = vmatmul.mubr.msk.f32.gmra.mrb[4].mxu0 %vm92_vm0, %v56_v15 }
  0x48   :  { %403 = vmatmul.mubr.msk.f32.gmra.mrb[4].mxu1 %vm92_vm0, %v56_v15  ;;  %199 = vmatprep.mubr.f32.mxu0 %v527_v0 }
  0x49   :  { %312 = vmatprep.mubr.f32.mxu1 %v527_v0 }
  0x4b   :  { %396 = vmatmul.mubr.msk.f32.gmra.mrb[6].mxu0 %vm92_vm0, %v57_v16 }
  0x4c   :  { %404 = vmatmul.mubr.msk.f32.gmra.mrb[6].mxu1 %vm92_vm0, %v57_v16  ;;  %205 = vmatprep.mubr.f32.mxu0 %v527_v0 }
  0x4d   :  { %318 = vmatprep.mubr.f32.mxu1 %v527_v0 }
  0x4f   :  { %397 = vmatmul.mubr.msk.f32.gmra.mrb[8].mxu0 %vm92_vm0, %v58_v17 }
  0x50   :  { %405 = vmatmul.mubr.msk.f32.gmra.mrb[8].mxu1 %vm92_vm0, %v58_v17  ;;  %211 = vmatprep.mubr.f32.mxu0 %v527_v0 }
  0x51   :  { %324 = vmatprep.mubr.f32.mxu1 %v527_v0 }
  0x53   :  { %398 = vmatmul.mubr.msk.f32.gmra.mrb[10].mxu0 %vm92_vm0, %v59_v18 }
  0x54   :  { %406 = vmatmul.mubr.msk.f32.gmra.mrb[10].mxu1 %vm92_vm0, %v59_v18  ;;  %217 = vmatprep.mubr.f32.mxu0 %v527_v0 }
  0x55   :  { %330 = vmatprep.mubr.f32.mxu1 %v527_v0 }
  0x57   :  { %399 = vmatmul.mubr.msk.f32.gmra.mrb[12].mxu0 %vm92_vm0, %v60_v19 }
  0x58   :  { %407 = vmatmul.mubr.msk.f32.gmra.mrb[12].mxu1 %vm92_vm0, %v60_v19  ;;  %223 = vmatprep.mubr.f32.mxu0 %v527_v0 }
  0x59   :  { %336 = vmatprep.mubr.f32.mxu1 %v527_v0 }
  0x5b   :  { %400 = vmatmul.mubr.msk.f32.gmra.mrb[14].mxu0 %vm92_vm0, %v61_v20 }
  0x5c   :  { %408 = vmatmul.mubr.msk.f32.gmra.mrb[14].mxu1 %vm92_vm0, %v61_v20 }
 0x112   :  { %v183_v32 = vpop.f32.mrb[0].mxu0 }
 0x113   :  { %v184_v33 = vadd.f32 %v183_v32, %v604_v28  ;;  %v296_v34 = vpop.f32.mrb[0].mxu1  ;;  %v185_v35 = vpop.f32.mrb[1].mxu0 }
 0x114   :  { %v297_v36 = vadd.f32 %v296_v34, %v606_v29  ;;  %v186_v37 = vadd.f32 %v185_v35, %v608_v30  ;;  %v298_v38 = vpop.f32.mrb[1].mxu1 }
 0x115   :  { %343 = vst [vmem:[#allocation8] sm:$0xff] %v184_v33  ;;  %v299_v39 = vadd.f32 %v298_v38, %v610_v31 }
 0x116   :  { %345 = vst [vmem:[#allocation8 + $0x10] sm:$0xff] %v297_v36  ;;  %344 = vst [vmem:[#allocation8 + $0x8] sm:$0xff] %v186_v37  ;;  %v189_v40 = vpop.f32.mrb[2].mxu0 }
 0x117   :  { %346 = vst [vmem:[#allocation8 + $0x18] sm:$0xff] %v299_v39  ;;  %v190_v41 = vadd.f32 %v189_v40, %v604_v28  ;;  %v302_v42 = vpop.f32.mrb[2].mxu1  ;;  %v191_v43 = vpop.f32.mrb[3].mxu0 }
 0x118   :  { %v303_v44 = vadd.f32 %v302_v42, %v606_v29  ;;  %v192_v45 = vadd.f32 %v191_v43, %v608_v30  ;;  %v304_v46 = vpop.f32.mrb[3].mxu1 }
 0x119   :  { %347 = vst [vmem:[#allocation8 + $0x20] sm:$0xff] %v190_v41  ;;  %v305_v47 = vadd.f32 %v304_v46, %v610_v31 }
 0x11a   :  { %349 = vst [vmem:[#allocation8 + $0x30] sm:$0xff] %v303_v44  ;;  %348 = vst [vmem:[#allocation8 + $0x28] sm:$0xff] %v192_v45  ;;  %v195_v48 = vpop.f32.mrb[4].mxu0 }
 0x11b   :  { %350 = vst [vmem:[#allocation8 + $0x38] sm:$0xff] %v305_v47  ;;  %v196_v49 = vadd.f32 %v195_v48, %v604_v28  ;;  %v308_v50 = vpop.f32.mrb[4].mxu1  ;;  %v197_v51 = vpop.f32.mrb[5].mxu0 }
 0x11c   :  { %v309_v52 = vadd.f32 %v308_v50, %v606_v29  ;;  %v198_v53 = vadd.f32 %v197_v51, %v608_v30  ;;  %v310_v54 = vpop.f32.mrb[5].mxu1 }
 0x11d   :  { %351 = vst [vmem:[#allocation8 + $0x40] sm:$0xff] %v196_v49  ;;  %v311_v55 = vadd.f32 %v310_v54, %v610_v31 }
 0x11e   :  { %353 = vst [vmem:[#allocation8 + $0x50] sm:$0xff] %v309_v52  ;;  %352 = vst [vmem:[#allocation8 + $0x48] sm:$0xff] %v198_v53  ;;  %v201_v56 = vpop.f32.mrb[6].mxu0 }
 0x11f   :  { %354 = vst [vmem:[#allocation8 + $0x58] sm:$0xff] %v311_v55  ;;  %v202_v57 = vadd.f32 %v201_v56, %v604_v28  ;;  %v314_v58 = vpop.f32.mrb[6].mxu1  ;;  %v203_v59 = vpop.f32.mrb[7].mxu0 }
 0x120   :  { %v315_v60 = vadd.f32 %v314_v58, %v606_v29  ;;  %v204_v61 = vadd.f32 %v203_v59, %v608_v30  ;;  %v316_v62 = vpop.f32.mrb[7].mxu1 }
 0x121   :  { %355 = vst [vmem:[#allocation8 + $0x60] sm:$0xff] %v202_v57  ;;  %v317_v63 = vadd.f32 %v316_v62, %v610_v31 }
 0x122   :  { %357 = vst [vmem:[#allocation8 + $0x70] sm:$0xff] %v315_v60  ;;  %356 = vst [vmem:[#allocation8 + $0x68] sm:$0xff] %v204_v61  ;;  %v207_v0 = vpop.f32.mrb[8].mxu0 }
 0x123   :  { %358 = vst [vmem:[#allocation8 + $0x78] sm:$0xff] %v317_v63  ;;  %v208_v1 = vadd.f32 %v207_v0, %v604_v28  ;;  %v320_v2 = vpop.f32.mrb[8].mxu1  ;;  %v209_v3 = vpop.f32.mrb[9].mxu0 }
 0x124   :  { %v321_v4 = vadd.f32 %v320_v2, %v606_v29  ;;  %v210_v5 = vadd.f32 %v209_v3, %v608_v30  ;;  %v322_v6 = vpop.f32.mrb[9].mxu1 }
 0x125   :  { %359 = vst [vmem:[#allocation8 + $0x80] sm:$0xff] %v208_v1  ;;  %v323_v7 = vadd.f32 %v322_v6, %v610_v31 }
 0x126   :  { %361 = vst [vmem:[#allocation8 + $0x90] sm:$0xff] %v321_v4  ;;  %360 = vst [vmem:[#allocation8 + $0x88] sm:$0xff] %v210_v5  ;;  %v213_v8 = vpop.f32.mrb[10].mxu0 }
 0x127   :  { %362 = vst [vmem:[#allocation8 + $0x98] sm:$0xff] %v323_v7  ;;  %v214_v9 = vadd.f32 %v213_v8, %v604_v28  ;;  %v326_v10 = vpop.f32.mrb[10].mxu1  ;;  %v215_v11 = vpop.f32.mrb[11].mxu0 }
 0x128   :  { %v327_v12 = vadd.f32 %v326_v10, %v606_v29  ;;  %v216_v13 = vadd.f32 %v215_v11, %v608_v30  ;;  %v328_v14 = vpop.f32.mrb[11].mxu1 }
 0x129   :  { %363 = vst [vmem:[#allocation8 + $0xa0] sm:$0xff] %v214_v9  ;;  %v329_v15 = vadd.f32 %v328_v14, %v610_v31 }
 0x12a   :  { %365 = vst [vmem:[#allocation8 + $0xb0] sm:$0xff] %v327_v12  ;;  %364 = vst [vmem:[#allocation8 + $0xa8] sm:$0xff] %v216_v13  ;;  %v219_v16 = vpop.f32.mrb[12].mxu0 }
 0x12b   :  { %366 = vst [vmem:[#allocation8 + $0xb8] sm:$0xff] %v329_v15  ;;  %v220_v17 = vadd.f32 %v219_v16, %v604_v28  ;;  %v332_v18 = vpop.f32.mrb[12].mxu1  ;;  %v221_v19 = vpop.f32.mrb[13].mxu0 }
 0x12c   :  { %v333_v20 = vadd.f32 %v332_v18, %v606_v29  ;;  %v222_v21 = vadd.f32 %v221_v19, %v608_v30  ;;  %v334_v22 = vpop.f32.mrb[13].mxu1 }
 0x12d   :  { %367 = vst [vmem:[#allocation8 + $0xc0] sm:$0xff] %v220_v17  ;;  %v335_v23 = vadd.f32 %v334_v22, %v610_v31 }
 0x12e   :  { %369 = vst [vmem:[#allocation8 + $0xd0] sm:$0xff] %v333_v20  ;;  %368 = vst [vmem:[#allocation8 + $0xc8] sm:$0xff] %v222_v21  ;;  %v225_v24 = vpop.f32.mrb[14].mxu0 }
 0x12f   :  { %370 = vst [vmem:[#allocation8 + $0xd8] sm:$0xff] %v335_v23  ;;  %v226_v25 = vadd.f32 %v225_v24, %v604_v28  ;;  %v338_v26 = vpop.f32.mrb[14].mxu1  ;;  %v227_v27 = vpop.f32.mrb[15].mxu0 }
 0x130   :  { %v339_v32 = vadd.f32 %v338_v26, %v606_v29  ;;  %v228_v33 = vadd.f32 %v227_v27, %v608_v30  ;;  %v340_v34 = vpop.f32.mrb[15].mxu1 }
 0x131   :  { %371 = vst [vmem:[#allocation8 + $0xe0] sm:$0xff] %v226_v25  ;;  %v341_v35 = vadd.f32 %v340_v34, %v610_v31 }
 0x132   :  { %373 = vst [vmem:[#allocation8 + $0xf0] sm:$0xff] %v339_v32  ;;  %372 = vst [vmem:[#allocation8 + $0xe8] sm:$0xff] %v228_v33 }
 0x133   :  { %374 = vst [vmem:[#allocation8 + $0xf8] sm:$0xff] %v341_v35 }
 0x134   :  { %503 = shalt.err (!%p500_p0)
}
 0x135   :  { %s504_s29 = scalar_lea.hbm %s662_s3, 4096 }
 0x136   :  { %p505_p1 = scmp.ne.s32.totalorder %s662_s3, %s504_s29  ;;  %p508_p2 = scmp.lt.u32.totalorder %s504_s29, %s662_s3 }
 0x138   :  { %p510_p3 = pnand %p508_p2, %p505_p1 }
 0x13a   :  { %513 = shalt.err (!%p510_p3)
}
 0x13b   :  { %386 = dma.vmem_to_hbm [thread:$0]  %s381_s25, 4096, %s662_s3, [#allocation4], %s521_s22, %s521_s22, %s522_s23  }
 0x13c   :  { %518 = dma.done.wait [#allocation4], 4096  }
 0x13d   :  { %519 = vsyncadd [#allocation4], 4294963200 }
 0x13e   :  { %390 = vsyncpa [#allocation3], 1 }
 0x13f   :  { %391 = vsyncpa [#allocation6], 1 }
 0x140   :  { %392 = vsyncpa [#allocation4], 1 }

// kernel: lstm_model_forward.6
= control target key start
LH: loop header
LB: loop body
LE: loop exit
PB: predicated region body
PF: predicated region fallthrough
CT: control target
= control target key end

     0   :  { %8 = vsyncpa [#allocation3], 0  ;;  %s730_s0 = inlined_call_operand.hbm [shape: f32[64,128], index: 0, kind: input, shape index: {}]   ;;  %s731_s1 = inlined_call_operand.hbm [shape: f32[128,512], index: 1, kind: input, shape index: {}]   ;;  %s732_s2 = inlined_call_operand.hbm [shape: f32[1,512], index: 2, kind: input, shape index: {}]   ;;  %s733_s3 = inlined_call_operand.hbm [shape: f32[64,512], index: 3, kind: output, shape index: {}]  }
   0x1   :  { %9 = vsyncpa [#allocation6], 0 }
   0x2   :  { %10 = vsyncpa [#allocation4], 0  ;;  %s591_s12 = smov [#allocation5]   ;;  %s497_s16 = scalar_lea.hbm %s731_s1, 8192 }
   0x3   :  { %s28_s13 = sshll.u32 %s591_s12, 4  ;;  %p498_p0 = scmp.ne.s32.totalorder %s731_s1, %s497_s16  ;;  %s29_s13 = int_to_ptr.vmem [resolvable:$true] %s28_s13 }
   0x4   :  { %p501_p1 = scmp.lt.u32.totalorder %s497_s16, %s731_s1 }
   0x6   :  { %p503_p2 = pnand %p501_p1, %p498_p0 }
   0x8   :  { %506 = shalt.err (!%p503_p2)
}
   0x9   :  { %s507_s21 = scalar_lea.vmem %s29_s13, 8192  ;;  %p512_p4 = scmp.lt.s32.totalorder %s29_s13, %s29_s13 }
   0xa   :  { %p508_p3 = scmp.ne.s32.totalorder %s29_s13, %s507_s21  ;;  %p513_p5 = scmp.lt.s32.totalorder %s507_s21, %s507_s21 }
   0xc   :  { %p514_p6 = por %p513_p5, %p512_p4 }
   0xe   :  { %p515_p7 = pnand %p514_p6, %p508_p3 }
  0x10   :  { %518 = shalt.err (!%p515_p7)
}
  0x11   :  { %s592_s22 = smov 512   ;;  %s593_s23 = smov 32  }
  0x12   :  { %34 = dma.hbm_to_vmem [thread:$0]  %s731_s1, 8192, %s29_s13, [#allocation6], %s592_s22, %s592_s22, %s593_s23  }
  0x13   :  { %s594_s26 = smov [#allocation2]   ;;  %s519_s30 = scalar_lea.hbm %s730_s0, 1024 }
  0x14   :  { %s16_s27 = sshll.u32 %s594_s26, 4  ;;  %p520_p8 = scmp.ne.s32.totalorder %s730_s0, %s519_s30  ;;  %s17_s27 = int_to_ptr.vmem [resolvable:$true] %s16_s27 }
  0x15   :  { %p523_p9 = scmp.lt.u32.totalorder %s519_s30, %s730_s0 }
  0x17   :  { %p525_p10 = pnand %p523_p9, %p520_p8 }
  0x19   :  { %528 = shalt.err (!%p525_p10)
}
  0x1a   :  { %s529_s8 = scalar_lea.vmem %s17_s27, 1024  ;;  %p534_p12 = scmp.lt.s32.totalorder %s17_s27, %s17_s27 }
  0x1b   :  { %p530_p11 = scmp.ne.s32.totalorder %s17_s27, %s529_s8  ;;  %p535_p13 = scmp.lt.s32.totalorder %s529_s8, %s529_s8 }
  0x1d   :  { %p536_p0 = por %p535_p13, %p534_p12 }
  0x1f   :  { %p537_p1 = pnand %p536_p0, %p530_p11 }
  0x21   :  { %540 = shalt.err (!%p537_p1)
}
  0x22   :  { %s595_s1 = smov 128   ;;  %s596_s9 = smov 8  }
  0x23   :  { %22 = dma.hbm_to_vmem [thread:$0]  %s730_s0, 1024, %s17_s27, [#allocation3], %s595_s1, %s595_s1, %s596_s9  }
  0x24   :  { %s597_s12 = smov [#allocation7]   ;;  %s541_s16 = scalar_lea.hbm %s732_s2, 64 }
  0x25   :  { %s41_s13 = sshll.u32 %s597_s12, 4  ;;  %p542_p2 = scmp.ne.s32.totalorder %s732_s2, %s541_s16  ;;  %s42_s13 = int_to_ptr.vmem [resolvable:$true] %s41_s13 }
  0x26   :  { %p545_p3 = scmp.lt.u32.totalorder %s541_s16, %s732_s2 }
  0x28   :  { %p547_p4 = pnand %p545_p3, %p542_p2 }
  0x2a   :  { %550 = shalt.err (!%p547_p4)
}
  0x2b   :  { %s551_s21 = scalar_lea.vmem %s42_s13, 64  ;;  %p556_p6 = scmp.lt.s32.totalorder %s42_s13, %s42_s13 }
  0x2c   :  { %p552_p5 = scmp.ne.s32.totalorder %s42_s13, %s551_s21  ;;  %p557_p7 = scmp.lt.s32.totalorder %s551_s21, %s551_s21 }
  0x2e   :  { %p558_p8 = por %p557_p7, %p556_p6 }
  0x30   :  { %p559_p9 = pnand %p558_p8, %p552_p5 }
  0x32   :  { %562 = shalt.err (!%p559_p9)
}
  0x33   :  { %44 = dma.hbm_to_vmem [thread:$0]  %s732_s2, 64, %s42_s13, [#allocation6]  }
  0x34   :  { %585 = dma.done.wait [#allocation3], 1024  }
  0x35   :  { %586 = vsyncadd [#allocation3], 4294966272 }
  0x36   :  { %587 = dma.done.wait [#allocation6], 8256  }
  0x37   :  { %588 = vsyncadd [#allocation6], 4294959040  ;;  %v598_v0 = vmov 0.0   ;;  %v63_v1 = vld [vmem:[#allocation5 + $0x8] sm:$0xff]  ;;  %v65_v3 = vld [vmem:[#allocation5 + $0x18] sm:$0xff]  ;;  %s599_s2 = smov [#allocation8]  }
  0x38   :  { %212 = vmatprep.mubr.f32.mxu0 %v598_v0  ;;  %325 = vmatprep.mubr.f32.mxu1 %v598_v0  ;;  %v67_v2 = vld [vmem:[#allocation5 + $0x28] sm:$0xff]  ;;  %v69_v5 = vld [vmem:[#allocation5 + $0x38] sm:$0xff]  ;;  %v62_v6 = vld [vmem:[#allocation5] sm:$0xff]  ;;  %s411_s25 = sshll.u32 %s599_s2, 4  ;;  %s412_s25 = int_to_ptr.vmem [resolvable:$true] %s411_s25 }
  0x39   :  { %v424_v4 = vpack.c.bf16 %v67_v2, %v63_v1  ;;  %v66_v7 = vld [vmem:[#allocation5 + $0x20] sm:$0xff]  ;;  %v456_v8 = vpack.c.bf16 %v69_v5, %v65_v3  ;;  %v64_v10 = vld [vmem:[#allocation5 + $0x10] sm:$0xff]  ;;  %v71_v12 = vld [vmem:[#allocation5 + $0x48] sm:$0xff]  ;;  %s563_s26 = scalar_lea.vmem %s412_s25, 4096  ;;  %p568_p11 = scmp.lt.s32.totalorder %s412_s25, %s412_s25 }
  0x3a   :  { %v426_v9 = vpack.c.bf16 %v66_v7, %v62_v6  ;;  %v68_v11 = vld [vmem:[#allocation5 + $0x30] sm:$0xff]  ;;  %v75_v14 = vld [vmem:[#allocation5 + $0x68] sm:$0xff]  ;;  %v73_v15 = vld [vmem:[#allocation5 + $0x58] sm:$0xff]  ;;  %p564_p10 = scmp.ne.s32.totalorder %s412_s25, %s563_s26  ;;  %p569_p12 = scmp.lt.s32.totalorder %s563_s26, %s563_s26 }
  0x3b   :  { %425 = vmatprep.subr.bf16.mxu0 %v424_v4  ;;  %v458_v13 = vpack.c.bf16 %v68_v11, %v64_v10  ;;  %v77_v16 = vld [vmem:[#allocation5 + $0x78] sm:$0xff]  ;;  %457 = vmatprep.subr.bf16.mxu1 %v456_v8  ;;  %v428_v17 = vpack.c.bf16 %v75_v14, %v71_v12  ;;  %v70_v19 = vld [vmem:[#allocation5 + $0x40] sm:$0xff]  ;;  %v72_v21 = vld [vmem:[#allocation5 + $0x50] sm:$0xff] }
  0x3c   :  { %427 = vmatpush1.bf16.msra.mxu0 %v426_v9  ;;  %v460_v18 = vpack.c.bf16 %v77_v16, %v73_v15  ;;  %v74_v20 = vld [vmem:[#allocation5 + $0x60] sm:$0xff]  ;;  %v76_v23 = vld [vmem:[#allocation5 + $0x70] sm:$0xff]  ;;  %v79_v24 = vld [vmem:[#allocation5 + $0x88] sm:$0xff]  ;;  %p570_p13 = por %p569_p12, %p568_p11 }
  0x3d   :  { %459 = vmatpush1.bf16.msra.mxu1 %v458_v13  ;;  %v430_v22 = vpack.c.bf16 %v74_v20, %v70_v19  ;;  %v83_v25 = vld [vmem:[#allocation5 + $0xa8] sm:$0xff]  ;;  %429 = vmatprep.subr.bf16.mxu0 %v428_v17  ;;  %v462_v26 = vpack.c.bf16 %v76_v23, %v72_v21  ;;  %v81_v28 = vld [vmem:[#allocation5 + $0x98] sm:$0xff]  ;;  %v78_v30 = vld [vmem:[#allocation5 + $0x80] sm:$0xff] }
  0x3e   :  { %461 = vmatprep.subr.bf16.mxu1 %v460_v18  ;;  %v432_v27 = vpack.c.bf16 %v83_v25, %v79_v24  ;;  %v85_v29 = vld [vmem:[#allocation5 + $0xb8] sm:$0xff]  ;;  %v82_v32 = vld [vmem:[#allocation5 + $0xa0] sm:$0xff]  ;;  %v80_v33 = vld [vmem:[#allocation5 + $0x90] sm:$0xff]  ;;  %p571_p0 = pnand %p570_p13, %p564_p10 }
  0x3f   :  { %v464_v31 = vpack.c.bf16 %v85_v29, %v81_v28  ;;  %v84_v34 = vld [vmem:[#allocation5 + $0xb0] sm:$0xff]  ;;  %v434_v35 = vpack.c.bf16 %v82_v32, %v78_v30  ;;  %v87_v36 = vld [vmem:[#allocation5 + $0xc8] sm:$0xff]  ;;  %v89_v38 = vld [vmem:[#allocation5 + $0xd8] sm:$0xff] }
  0x40   :  { %431 = vmatpush1.bf16.msra.mxu0 %v430_v22  ;;  %v91_v37 = vld [vmem:[#allocation5 + $0xe8] sm:$0xff]  ;;  %v466_v39 = vpack.c.bf16 %v84_v34, %v80_v33  ;;  %v93_v41 = vld [vmem:[#allocation5 + $0xf8] sm:$0xff]  ;;  %v86_v42 = vld [vmem:[#allocation5 + $0xc0] sm:$0xff] }
  0x41   :  { %463 = vmatpush1.bf16.msra.mxu1 %v462_v26  ;;  %433 = vmatprep.subr.bf16.mxu0 %v432_v27  ;;  %v436_v40 = vpack.c.bf16 %v91_v37, %v87_v36  ;;  %v90_v43 = vld [vmem:[#allocation5 + $0xe0] sm:$0xff]  ;;  %v468_v44 = vpack.c.bf16 %v93_v41, %v89_v38  ;;  %v88_v45 = vld [vmem:[#allocation5 + $0xd0] sm:$0xff]  ;;  %v95_v47 = vld [vmem:[#allocation5 + $0x108] sm:$0xff] }
  0x42   :  { %465 = vmatprep.subr.bf16.mxu1 %v464_v31  ;;  %v92_v46 = vld [vmem:[#allocation5 + $0xf0] sm:$0xff]  ;;  %v99_v48 = vld [vmem:[#allocation5 + $0x128] sm:$0xff]  ;;  %v97_v49 = vld [vmem:[#allocation5 + $0x118] sm:$0xff]  ;;  %v438_v51 = vpack.c.bf16 %v90_v43, %v86_v42  ;;  %v128_v42 = vlaneseq }
  0x43   :  { %v101_v50 = vld [vmem:[#allocation5 + $0x138] sm:$0xff]  ;;  %v470_v52 = vpack.c.bf16 %v92_v46, %v88_v45  ;;  %v440_v53 = vpack.c.bf16 %v99_v48, %v95_v47  ;;  %v94_v54 = vld [vmem:[#allocation5 + $0x100] sm:$0xff]  ;;  %v96_v56 = vld [vmem:[#allocation5 + $0x110] sm:$0xff] }
  0x44   :  { %435 = vmatpush1.bf16.msra.mxu0 %v434_v35  ;;  %v98_v55 = vld [vmem:[#allocation5 + $0x120] sm:$0xff]  ;;  %v472_v57 = vpack.c.bf16 %v101_v50, %v97_v49  ;;  %v100_v58 = vld [vmem:[#allocation5 + $0x130] sm:$0xff]  ;;  %v103_v59 = vld [vmem:[#allocation5 + $0x148] sm:$0xff]  ;;  %v129_v43 = vshrl.u32 %v128_v42, 7 }
  0x45   :  { %467 = vmatpush1.bf16.msra.mxu1 %v466_v39  ;;  %437 = vmatprep.subr.bf16.mxu0 %v436_v40  ;;  %v107_v60 = vld [vmem:[#allocation5 + $0x168] sm:$0xff]  ;;  %v105_v61 = vld [vmem:[#allocation5 + $0x158] sm:$0xff]  ;;  %v442_v63 = vpack.c.bf16 %v98_v55, %v94_v54  ;;  %v474_v1 = vpack.c.bf16 %v100_v58, %v96_v56  ;;  %v102_v3 = vld [vmem:[#allocation5 + $0x140] sm:$0xff] }
  0x46   :  { %469 = vmatprep.subr.bf16.mxu1 %v468_v44  ;;  %v109_v62 = vld [vmem:[#allocation5 + $0x178] sm:$0xff]  ;;  %v444_v2 = vpack.c.bf16 %v107_v60, %v103_v59  ;;  %v106_v4 = vld [vmem:[#allocation5 + $0x160] sm:$0xff]  ;;  %v104_v5 = vld [vmem:[#allocation5 + $0x150] sm:$0xff]  ;;  %v130_v44 = vsub.s32 0, %v129_v43  ;;  %v138_v46 = vsub.s32 2, %v129_v43  ;;  %v134_v47 = vsub.s32 1, %v129_v43 }
  0x47   :  { %v476_v6 = vpack.c.bf16 %v109_v62, %v105_v61  ;;  %v108_v7 = vld [vmem:[#allocation5 + $0x170] sm:$0xff]  ;;  %v111_v8 = vld [vmem:[#allocation5 + $0x188] sm:$0xff]  ;;  %v113_v10 = vld [vmem:[#allocation5 + $0x198] sm:$0xff]  ;;  %v446_v12 = vpack.c.bf16 %v106_v4, %v102_v3  ;;  %v142_v48 = vsub.s32 3, %v129_v43 }
  0x48   :  { %439 = vmatpush1.bf16.msra.mxu0 %v438_v51  ;;  %v115_v9 = vld [vmem:[#allocation5 + $0x1a8] sm:$0xff]  ;;  %v117_v11 = vld [vmem:[#allocation5 + $0x1b8] sm:$0xff]  ;;  %v478_v13 = vpack.c.bf16 %v108_v7, %v104_v5  ;;  %v110_v15 = vld [vmem:[#allocation5 + $0x180] sm:$0xff] }
  0x49   :  { %471 = vmatpush1.bf16.msra.mxu1 %v470_v52  ;;  %441 = vmatprep.subr.bf16.mxu0 %v440_v53  ;;  %v448_v14 = vpack.c.bf16 %v115_v9, %v111_v8  ;;  %v114_v16 = vld [vmem:[#allocation5 + $0x1a0] sm:$0xff]  ;;  %v112_v17 = vld [vmem:[#allocation5 + $0x190] sm:$0xff]  ;;  %v480_v18 = vpack.c.bf16 %v117_v11, %v113_v10  ;;  %v119_v20 = vld [vmem:[#allocation5 + $0x1c8] sm:$0xff] }
  0x4a   :  { %473 = vmatprep.subr.bf16.mxu1 %v472_v57  ;;  %v116_v19 = vld [vmem:[#allocation5 + $0x1b0] sm:$0xff]  ;;  %v123_v21 = vld [vmem:[#allocation5 + $0x1e8] sm:$0xff]  ;;  %v121_v22 = vld [vmem:[#allocation5 + $0x1d8] sm:$0xff]  ;;  %v450_v24 = vpack.c.bf16 %v114_v16, %v110_v15 }
  0x4b   :  { %v125_v23 = vld [vmem:[#allocation5 + $0x1f8] sm:$0xff]  ;;  %v482_v25 = vpack.c.bf16 %v116_v19, %v112_v17  ;;  %v452_v26 = vpack.c.bf16 %v123_v21, %v119_v20  ;;  %v118_v27 = vld [vmem:[#allocation5 + $0x1c0] sm:$0xff]  ;;  %v120_v30 = vld [vmem:[#allocation5 + $0x1d0] sm:$0xff] }
  0x4c   :  { %443 = vmatpush1.bf16.msra.mxu0 %v442_v63  ;;  %v122_v28 = vld [vmem:[#allocation5 + $0x1e0] sm:$0xff]  ;;  %v484_v29 = vpack.c.bf16 %v125_v23, %v121_v22  ;;  %v124_v31 = vld [vmem:[#allocation5 + $0x1f0] sm:$0xff]  ;;  %v55_v35 = vld [vmem:[#allocation2 + $0x8] sm:$0xff] }
  0x4d   :  { %475 = vmatpush1.bf16.msra.mxu1 %v474_v1  ;;  %445 = vmatprep.subr.bf16.mxu0 %v444_v2  ;;  %v454_v32 = vpack.c.bf16 %v122_v28, %v118_v27  ;;  %v486_v33 = vpack.c.bf16 %v124_v31, %v120_v30  ;;  %v54_v34 = vld [vmem:[#allocation2] sm:$0xff]  ;;  %v56_v36 = vld [vmem:[#allocation2 + $0x10] sm:$0xff]  ;;  %v57_v37 = vld [vmem:[#allocation2 + $0x18] sm:$0xff] }
  0x4e   :  { %477 = vmatprep.subr.bf16.mxu1 %v476_v6  ;;  %v58_v38 = vld [vmem:[#allocation2 + $0x20] sm:$0xff]  ;;  %v59_v39 = vld [vmem:[#allocation2 + $0x28] sm:$0xff]  ;;  %v60_v40 = vld [vmem:[#allocation2 + $0x30] sm:$0xff] }
  0x4f   :  { %v61_v41 = vld [vmem:[#allocation2 + $0x38] sm:$0xff]  ;;  %v126_v45 = vld [vmem:[#allocation7] sm:$0xf] }
  0x50   :  { %447 = vmatpush1.bf16.msra.mxu0 %v446_v12  ;;  %v675_v49 = vrot.slane %v126_v45, %v130_v44  ;;  %v677_v50 = vrot.slane %v126_v45, %v138_v46  ;;  %v679_v51 = vrot.slane %v126_v45, %v134_v47  ;;  %v681_v52 = vrot.slane %v126_v45, %v142_v48 }
  0x51   :  { %479 = vmatpush1.bf16.msra.mxu1 %v478_v13  ;;  %449 = vmatprep.subr.bf16.mxu0 %v448_v14 }
  0x52   :  { %481 = vmatprep.subr.bf16.mxu1 %v480_v18 }
  0x54   :  { %451 = vmatpush1.bf16.msra.mxu0 %v450_v24 }
  0x55   :  { %483 = vmatpush1.bf16.msra.mxu1 %v482_v25  ;;  %453 = vmatprep.subr.bf16.mxu0 %v452_v26 }
  0x56   :  { %485 = vmatprep.subr.bf16.mxu1 %v484_v29 }
  0x58   :  { %455 = vmatpush1.bf16.msra.mxu0 %v454_v32 }
  0x59   :  { %487 = vmatpush1.bf16.msra.mxu1 %v486_v33 }
  0x5b   :  { %213 = vmatmul.mubr.f32.vlgmr.msra.gmra.mrb[0].mxu0 %v54_v34 }
  0x5c   :  { %326 = vmatmul.mubr.f32.vlgmr.msra.gmra.mrb[0].mxu1 %v54_v34  ;;  %218 = vmatprep.mubr.f32.mxu0 %v598_v0 }
  0x5d   :  { %331 = vmatprep.mubr.f32.mxu1 %v598_v0 }
  0x5f   :  { %219 = vmatmul.mubr.f32.gmra.mrb[2].mxu0 %v55_v35 }
  0x60   :  { %332 = vmatmul.mubr.f32.gmra.mrb[2].mxu1 %v55_v35  ;;  %224 = vmatprep.mubr.f32.mxu0 %v598_v0 }
  0x61   :  { %337 = vmatprep.mubr.f32.mxu1 %v598_v0 }
  0x63   :  { %225 = vmatmul.mubr.f32.gmra.mrb[4].mxu0 %v56_v36 }
  0x64   :  { %338 = vmatmul.mubr.f32.gmra.mrb[4].mxu1 %v56_v36  ;;  %230 = vmatprep.mubr.f32.mxu0 %v598_v0 }
  0x65   :  { %343 = vmatprep.mubr.f32.mxu1 %v598_v0 }
  0x67   :  { %231 = vmatmul.mubr.f32.gmra.mrb[6].mxu0 %v57_v37 }
  0x68   :  { %344 = vmatmul.mubr.f32.gmra.mrb[6].mxu1 %v57_v37  ;;  %236 = vmatprep.mubr.f32.mxu0 %v598_v0 }
  0x69   :  { %349 = vmatprep.mubr.f32.mxu1 %v598_v0 }
  0x6b   :  { %237 = vmatmul.mubr.f32.gmra.mrb[8].mxu0 %v58_v38 }
  0x6c   :  { %350 = vmatmul.mubr.f32.gmra.mrb[8].mxu1 %v58_v38  ;;  %242 = vmatprep.mubr.f32.mxu0 %v598_v0 }
  0x6d   :  { %355 = vmatprep.mubr.f32.mxu1 %v598_v0 }
  0x6f   :  { %243 = vmatmul.mubr.f32.gmra.mrb[10].mxu0 %v59_v39 }
  0x70   :  { %356 = vmatmul.mubr.f32.gmra.mrb[10].mxu1 %v59_v39  ;;  %248 = vmatprep.mubr.f32.mxu0 %v598_v0 }
  0x71   :  { %361 = vmatprep.mubr.f32.mxu1 %v598_v0 }
  0x73   :  { %249 = vmatmul.mubr.f32.gmra.mrb[12].mxu0 %v60_v40 }
  0x74   :  { %362 = vmatmul.mubr.f32.gmra.mrb[12].mxu1 %v60_v40  ;;  %254 = vmatprep.mubr.f32.mxu0 %v598_v0 }
  0x75   :  { %367 = vmatprep.mubr.f32.mxu1 %v598_v0 }
  0x77   :  { %255 = vmatmul.mubr.f32.gmra.mrb[14].mxu0 %v61_v41 }
  0x78   :  { %368 = vmatmul.mubr.f32.gmra.mrb[14].mxu1 %v61_v41 }
 0x12e   :  { %v214_v53 = vpop.f32.mrb[0].mxu0 }
 0x12f   :  { %v215_v0 = vadd.f32 %v214_v53, %v675_v49  ;;  %v327_v54 = vpop.f32.mrb[0].mxu1  ;;  %v216_v55 = vpop.f32.mrb[1].mxu0 }
 0x130   :  { %v328_v56 = vadd.f32 %v327_v54, %v677_v50  ;;  %v217_v57 = vadd.f32 %v216_v55, %v679_v51  ;;  %v329_v58 = vpop.f32.mrb[1].mxu1 }
 0x131   :  { %374 = vst [vmem:[#allocation8] sm:$0xff] %v215_v0  ;;  %v330_v59 = vadd.f32 %v329_v58, %v681_v52 }
 0x132   :  { %376 = vst [vmem:[#allocation8 + $0x10] sm:$0xff] %v328_v56  ;;  %375 = vst [vmem:[#allocation8 + $0x8] sm:$0xff] %v217_v57  ;;  %v220_v60 = vpop.f32.mrb[2].mxu0 }
 0x133   :  { %377 = vst [vmem:[#allocation8 + $0x18] sm:$0xff] %v330_v59  ;;  %v221_v61 = vadd.f32 %v220_v60, %v675_v49  ;;  %v333_v62 = vpop.f32.mrb[2].mxu1  ;;  %v222_v63 = vpop.f32.mrb[3].mxu0 }
 0x134   :  { %v334_v1 = vadd.f32 %v333_v62, %v677_v50  ;;  %v223_v2 = vadd.f32 %v222_v63, %v679_v51  ;;  %v335_v3 = vpop.f32.mrb[3].mxu1 }
 0x135   :  { %378 = vst [vmem:[#allocation8 + $0x20] sm:$0xff] %v221_v61  ;;  %v336_v4 = vadd.f32 %v335_v3, %v681_v52 }
 0x136   :  { %380 = vst [vmem:[#allocation8 + $0x30] sm:$0xff] %v334_v1  ;;  %379 = vst [vmem:[#allocation8 + $0x28] sm:$0xff] %v223_v2  ;;  %v226_v5 = vpop.f32.mrb[4].mxu0 }
 0x137   :  { %381 = vst [vmem:[#allocation8 + $0x38] sm:$0xff] %v336_v4  ;;  %v227_v6 = vadd.f32 %v226_v5, %v675_v49  ;;  %v339_v7 = vpop.f32.mrb[4].mxu1  ;;  %v228_v8 = vpop.f32.mrb[5].mxu0 }
 0x138   :  { %v340_v9 = vadd.f32 %v339_v7, %v677_v50  ;;  %v229_v10 = vadd.f32 %v228_v8, %v679_v51  ;;  %v341_v11 = vpop.f32.mrb[5].mxu1 }
 0x139   :  { %382 = vst [vmem:[#allocation8 + $0x40] sm:$0xff] %v227_v6  ;;  %v342_v12 = vadd.f32 %v341_v11, %v681_v52 }
 0x13a   :  { %384 = vst [vmem:[#allocation8 + $0x50] sm:$0xff] %v340_v9  ;;  %383 = vst [vmem:[#allocation8 + $0x48] sm:$0xff] %v229_v10  ;;  %v232_v13 = vpop.f32.mrb[6].mxu0 }
 0x13b   :  { %385 = vst [vmem:[#allocation8 + $0x58] sm:$0xff] %v342_v12  ;;  %v233_v14 = vadd.f32 %v232_v13, %v675_v49  ;;  %v345_v15 = vpop.f32.mrb[6].mxu1  ;;  %v234_v16 = vpop.f32.mrb[7].mxu0 }
 0x13c   :  { %v346_v17 = vadd.f32 %v345_v15, %v677_v50  ;;  %v235_v18 = vadd.f32 %v234_v16, %v679_v51  ;;  %v347_v19 = vpop.f32.mrb[7].mxu1 }
 0x13d   :  { %386 = vst [vmem:[#allocation8 + $0x60] sm:$0xff] %v233_v14  ;;  %v348_v20 = vadd.f32 %v347_v19, %v681_v52 }
 0x13e   :  { %388 = vst [vmem:[#allocation8 + $0x70] sm:$0xff] %v346_v17  ;;  %387 = vst [vmem:[#allocation8 + $0x68] sm:$0xff] %v235_v18  ;;  %v238_v21 = vpop.f32.mrb[8].mxu0 }
 0x13f   :  { %389 = vst [vmem:[#allocation8 + $0x78] sm:$0xff] %v348_v20  ;;  %v239_v22 = vadd.f32 %v238_v21, %v675_v49  ;;  %v351_v23 = vpop.f32.mrb[8].mxu1  ;;  %v240_v24 = vpop.f32.mrb[9].mxu0 }
 0x140   :  { %v352_v25 = vadd.f32 %v351_v23, %v677_v50  ;;  %v241_v26 = vadd.f32 %v240_v24, %v679_v51  ;;  %v353_v27 = vpop.f32.mrb[9].mxu1 }
 0x141   :  { %390 = vst [vmem:[#allocation8 + $0x80] sm:$0xff] %v239_v22  ;;  %v354_v28 = vadd.f32 %v353_v27, %v681_v52 }
 0x142   :  { %392 = vst [vmem:[#allocation8 + $0x90] sm:$0xff] %v352_v25  ;;  %391 = vst [vmem:[#allocation8 + $0x88] sm:$0xff] %v241_v26  ;;  %v244_v29 = vpop.f32.mrb[10].mxu0 }
 0x143   :  { %393 = vst [vmem:[#allocation8 + $0x98] sm:$0xff] %v354_v28  ;;  %v245_v30 = vadd.f32 %v244_v29, %v675_v49  ;;  %v357_v31 = vpop.f32.mrb[10].mxu1  ;;  %v246_v32 = vpop.f32.mrb[11].mxu0 }
 0x144   :  { %v358_v33 = vadd.f32 %v357_v31, %v677_v50  ;;  %v247_v34 = vadd.f32 %v246_v32, %v679_v51  ;;  %v359_v35 = vpop.f32.mrb[11].mxu1 }
 0x145   :  { %394 = vst [vmem:[#allocation8 + $0xa0] sm:$0xff] %v245_v30  ;;  %v360_v36 = vadd.f32 %v359_v35, %v681_v52 }
 0x146   :  { %396 = vst [vmem:[#allocation8 + $0xb0] sm:$0xff] %v358_v33  ;;  %395 = vst [vmem:[#allocation8 + $0xa8] sm:$0xff] %v247_v34  ;;  %v250_v37 = vpop.f32.mrb[12].mxu0 }
 0x147   :  { %397 = vst [vmem:[#allocation8 + $0xb8] sm:$0xff] %v360_v36  ;;  %v251_v38 = vadd.f32 %v250_v37, %v675_v49  ;;  %v363_v39 = vpop.f32.mrb[12].mxu1  ;;  %v252_v40 = vpop.f32.mrb[13].mxu0 }
 0x148   :  { %v364_v41 = vadd.f32 %v363_v39, %v677_v50  ;;  %v253_v42 = vadd.f32 %v252_v40, %v679_v51  ;;  %v365_v43 = vpop.f32.mrb[13].mxu1 }
 0x149   :  { %398 = vst [vmem:[#allocation8 + $0xc0] sm:$0xff] %v251_v38  ;;  %v366_v44 = vadd.f32 %v365_v43, %v681_v52 }
 0x14a   :  { %400 = vst [vmem:[#allocation8 + $0xd0] sm:$0xff] %v364_v41  ;;  %399 = vst [vmem:[#allocation8 + $0xc8] sm:$0xff] %v253_v42  ;;  %v256_v45 = vpop.f32.mrb[14].mxu0 }
 0x14b   :  { %401 = vst [vmem:[#allocation8 + $0xd8] sm:$0xff] %v366_v44  ;;  %v257_v46 = vadd.f32 %v256_v45, %v675_v49  ;;  %v369_v47 = vpop.f32.mrb[14].mxu1  ;;  %v258_v48 = vpop.f32.mrb[15].mxu0 }
 0x14c   :  { %v370_v53 = vadd.f32 %v369_v47, %v677_v50  ;;  %v259_v0 = vadd.f32 %v258_v48, %v679_v51  ;;  %v371_v54 = vpop.f32.mrb[15].mxu1 }
 0x14d   :  { %402 = vst [vmem:[#allocation8 + $0xe0] sm:$0xff] %v257_v46  ;;  %v372_v55 = vadd.f32 %v371_v54, %v681_v52 }
 0x14e   :  { %404 = vst [vmem:[#allocation8 + $0xf0] sm:$0xff] %v370_v53  ;;  %403 = vst [vmem:[#allocation8 + $0xe8] sm:$0xff] %v259_v0 }
 0x14f   :  { %405 = vst [vmem:[#allocation8 + $0xf8] sm:$0xff] %v372_v55 }
 0x150   :  { %574 = shalt.err (!%p571_p0)
}
 0x151   :  { %s575_s29 = scalar_lea.hbm %s733_s3, 4096 }
 0x152   :  { %p576_p1 = scmp.ne.s32.totalorder %s733_s3, %s575_s29  ;;  %p579_p2 = scmp.lt.u32.totalorder %s575_s29, %s733_s3 }
 0x154   :  { %p581_p3 = pnand %p579_p2, %p576_p1 }
 0x156   :  { %584 = shalt.err (!%p581_p3)
}
 0x157   :  { %417 = dma.vmem_to_hbm [thread:$0]  %s412_s25, 4096, %s733_s3, [#allocation4], %s592_s22, %s592_s22, %s593_s23  }
 0x158   :  { %589 = dma.done.wait [#allocation4], 4096  }
 0x159   :  { %590 = vsyncadd [#allocation4], 4294963200 }
 0x15a   :  { %421 = vsyncpa [#allocation3], 1 }
 0x15b   :  { %422 = vsyncpa [#allocation6], 1 }
 0x15c   :  { %423 = vsyncpa [#allocation4], 1 }

// kernel: lstm_model_forward.5
= control target key start
LH: loop header
LB: loop body
LE: loop exit
PB: predicated region body
PF: predicated region fallthrough
CT: control target
= control target key end

     0   :  { %7 = vsyncpa [#allocation5], 0  ;;  %s2711_s0 = inlined_call_operand.hbm [shape: f32[8,8,512], index: 0, kind: input, shape index: {}]   ;;  %s2712_s1 = inlined_call_operand.hbm [shape: f32[128,512], index: 1, kind: input, shape index: {}]   ;;  %s2713_s2 = inlined_call_operand.hbm [shape: f32[8,8,128], index: 2, kind: output, shape index: {}]  }
   0x1   :  { %8 = vsyncpa [#allocation8], 0 }
   0x2   :  { %9 = vsyncpa [#allocation6], 0  ;;  %s2290_s9 = smov [#allocation4]   ;;  %s2218_s13 = scalar_lea.hbm %s2711_s0, 4096 }
   0x3   :  { %s15_s10 = sshll.u32 %s2290_s9, 4  ;;  %p2219_p0 = scmp.ne.s32.totalorder %s2711_s0, %s2218_s13  ;;  %s16_s10 = int_to_ptr.vmem [resolvable:$true] %s15_s10 }
   0x4   :  { %p2222_p1 = scmp.lt.u32.totalorder %s2218_s13, %s2711_s0 }
   0x6   :  { %p2224_p2 = pnand %p2222_p1, %p2219_p0 }
   0x8   :  { %2227 = shalt.err (!%p2224_p2)
}
   0x9   :  { %s2228_s18 = scalar_lea.vmem %s16_s10, 4096  ;;  %p2233_p4 = scmp.lt.s32.totalorder %s16_s10, %s16_s10 }
   0xa   :  { %p2229_p3 = scmp.ne.s32.totalorder %s16_s10, %s2228_s18  ;;  %p2234_p5 = scmp.lt.s32.totalorder %s2228_s18, %s2228_s18 }
   0xc   :  { %p2235_p6 = por %p2234_p5, %p2233_p4 }
   0xe   :  { %p2236_p7 = pnand %p2235_p6, %p2229_p3 }
  0x10   :  { %2239 = shalt.err (!%p2236_p7)
}
  0x11   :  { %s2291_s19 = smov 512   ;;  %s2292_s20 = smov 32  }
  0x12   :  { %21 = dma.hbm_to_vmem [thread:$0]  %s2711_s0, 4096, %s16_s10, [#allocation5], %s2291_s19, %s2291_s19, %s2292_s20  }
  0x13   :  { %s2293_s23 = smov [#allocation7]   ;;  %s2240_s27 = scalar_lea.hbm %s2712_s1, 8192 }
  0x14   :  { %s27_s24 = sshll.u32 %s2293_s23, 4  ;;  %p2241_p8 = scmp.ne.s32.totalorder %s2712_s1, %s2240_s27  ;;  %s28_s24 = int_to_ptr.vmem [resolvable:$true] %s27_s24 }
  0x15   :  { %p2244_p9 = scmp.lt.u32.totalorder %s2240_s27, %s2712_s1 }
  0x17   :  { %p2246_p10 = pnand %p2244_p9, %p2241_p8 }
  0x19   :  { %2249 = shalt.err (!%p2246_p10)
}
  0x1a   :  { %s2250_s4 = scalar_lea.vmem %s28_s24, 8192  ;;  %p2255_p12 = scmp.lt.s32.totalorder %s28_s24, %s28_s24 }
  0x1b   :  { %p2251_p11 = scmp.ne.s32.totalorder %s28_s24, %s2250_s4  ;;  %p2256_p13 = scmp.lt.s32.totalorder %s2250_s4, %s2250_s4 }
  0x1d   :  { %p2257_p0 = por %p2256_p13, %p2255_p12 }
  0x1f   :  { %p2258_p1 = pnand %p2257_p0, %p2251_p11 }
  0x21   :  { %2261 = shalt.err (!%p2258_p1)
}
  0x22   :  { %33 = dma.hbm_to_vmem [thread:$0]  %s2712_s1, 8192, %s28_s24, [#allocation8], %s2291_s19, %s2291_s19, %s2292_s20  }
  0x23   :  { %2284 = dma.done.wait [#allocation5], 4096  }
  0x24   :  { %2285 = vsyncadd [#allocation5], 4294963200 }
  0x25   :  { %2286 = dma.done.wait [#allocation8], 8192  }
  0x26   :  { %2287 = vsyncadd [#allocation8], 4294959104  ;;  %v2294_v0 = vmov 0.0   ;;  %v47_v1 = vld [vmem:[#allocation7 + $0x8] sm:$0xff]  ;;  %v46_v3 = vld [vmem:[#allocation7] sm:$0xff]  ;;  %s2295_s1 = smov [#allocation9]  }
  0x27   :  { %180 = vmatprep.mubr.f32.mxu0 %v2294_v0  ;;  %251 = vmatprep.mubr.f32.mxu1 %v2294_v0  ;;  %v51_v2 = vld [vmem:[#allocation7 + $0x28] sm:$0xff]  ;;  %v50_v5 = vld [vmem:[#allocation7 + $0x20] sm:$0xff]  ;;  %v49_v19 = vld [vmem:[#allocation7 + $0x18] sm:$0xff]  ;;  %s1533_s6 = sshll.u32 %s2295_s1, 4  ;;  %s1534_s6 = int_to_ptr.vmem [resolvable:$true] %s1533_s6 }
  0x28   :  { %v2339_v4 = vpack.c.bf16 %v51_v2, %v47_v1  ;;  %v55_v6 = vld [vmem:[#allocation7 + $0x48] sm:$0xff]  ;;  %v2341_v8 = vpack.c.bf16 %v50_v5, %v46_v3  ;;  %v54_v10 = vld [vmem:[#allocation7 + $0x40] sm:$0xff]  ;;  %v53_v20 = vld [vmem:[#allocation7 + $0x38] sm:$0xff]  ;;  %s2262_s7 = scalar_lea.vmem %s1534_s6, 1024  ;;  %p2267_p3 = scmp.lt.s32.totalorder %s1534_s6, %s1534_s6 }
  0x29   :  { %v59_v7 = vld [vmem:[#allocation7 + $0x68] sm:$0xff]  ;;  %v58_v11 = vld [vmem:[#allocation7 + $0x60] sm:$0xff]  ;;  %v2352_v22 = vpack.c.bf16 %v53_v20, %v49_v19  ;;  %v48_v23 = vld [vmem:[#allocation7 + $0x10] sm:$0xff]  ;;  %p2263_p2 = scmp.ne.s32.totalorder %s1534_s6, %s2262_s7  ;;  %p2268_p4 = scmp.lt.s32.totalorder %s2262_s7, %s2262_s7 }
  0x2a   :  { %v2343_v9 = vpack.c.bf16 %v59_v7, %v55_v6  ;;  %v63_v12 = vld [vmem:[#allocation7 + $0x88] sm:$0xff]  ;;  %1571 = vmatprep.subr.bf16.mxu0 %v2339_v4  ;;  %v2347_v14 = vpack.c.bf16 %v58_v11, %v54_v10  ;;  %v62_v15 = vld [vmem:[#allocation7 + $0x80] sm:$0xff]  ;;  %v52_v24 = vld [vmem:[#allocation7 + $0x30] sm:$0xff] }
  0x2b   :  { %v67_v13 = vld [vmem:[#allocation7 + $0xa8] sm:$0xff]  ;;  %1573 = vmatpush1.bf16.msra.mxu0 %v2341_v8  ;;  %v66_v16 = vld [vmem:[#allocation7 + $0xa0] sm:$0xff]  ;;  %v2354_v25 = vpack.c.bf16 %v52_v24, %v48_v23  ;;  %1603 = vmatprep.subr.bf16.mxu1 %v2352_v22  ;;  %v57_v27 = vld [vmem:[#allocation7 + $0x58] sm:$0xff]  ;;  %p2269_p5 = por %p2268_p4, %p2267_p3 }
  0x2c   :  { %1575 = vmatprep.subr.bf16.mxu0 %v2343_v9  ;;  %v2350_v17 = vpack.c.bf16 %v67_v13, %v63_v12  ;;  %v71_v18 = vld [vmem:[#allocation7 + $0xc8] sm:$0xff]  ;;  %v2357_v26 = vpack.c.bf16 %v66_v16, %v62_v15  ;;  %v61_v28 = vld [vmem:[#allocation7 + $0x78] sm:$0xff]  ;;  %v56_v29 = vld [vmem:[#allocation7 + $0x50] sm:$0xff] }
  0x2d   :  { %v75_v21 = vld [vmem:[#allocation7 + $0xe8] sm:$0xff]  ;;  %v70_v31 = vld [vmem:[#allocation7 + $0xc0] sm:$0xff]  ;;  %1605 = vmatpush1.bf16.msra.mxu1 %v2354_v25  ;;  %v2364_v33 = vpack.c.bf16 %v61_v28, %v57_v27  ;;  %v60_v34 = vld [vmem:[#allocation7 + $0x70] sm:$0xff]  ;;  %p2270_p6 = pnand %p2269_p5, %p2263_p2 }
  0x2e   :  { %v2361_v30 = vpack.c.bf16 %v75_v21, %v71_v18  ;;  %v74_v32 = vld [vmem:[#allocation7 + $0xe0] sm:$0xff]  ;;  %v79_v35 = vld [vmem:[#allocation7 + $0x108] sm:$0xff]  ;;  %v2366_v37 = vpack.c.bf16 %v60_v34, %v56_v29  ;;  %v65_v38 = vld [vmem:[#allocation7 + $0x98] sm:$0xff] }
  0x2f   :  { %1577 = vmatpush1.bf16.msra.mxu0 %v2347_v14  ;;  %v83_v36 = vld [vmem:[#allocation7 + $0x128] sm:$0xff]  ;;  %1607 = vmatprep.subr.bf16.mxu1 %v2364_v33  ;;  %v69_v39 = vld [vmem:[#allocation7 + $0xb8] sm:$0xff]  ;;  %v64_v40 = vld [vmem:[#allocation7 + $0x90] sm:$0xff]  ;;  %v2370_v42 = vpack.c.bf16 %v74_v32, %v70_v31 }
  0x30   :  { %1579 = vmatprep.subr.bf16.mxu0 %v2350_v17  ;;  %v68_v41 = vld [vmem:[#allocation7 + $0xb0] sm:$0xff]  ;;  %v78_v43 = vld [vmem:[#allocation7 + $0x100] sm:$0xff]  ;;  %v2372_v45 = vpack.c.bf16 %v69_v39, %v65_v38  ;;  %v2375_v46 = vpack.c.bf16 %v83_v36, %v79_v35  ;;  %v87_v47 = vld [vmem:[#allocation7 + $0x148] sm:$0xff] }
  0x31   :  { %v82_v44 = vld [vmem:[#allocation7 + $0x120] sm:$0xff]  ;;  %1609 = vmatpush1.bf16.msra.mxu1 %v2366_v37  ;;  %v2378_v48 = vpack.c.bf16 %v68_v41, %v64_v40  ;;  %v73_v49 = vld [vmem:[#allocation7 + $0xd8] sm:$0xff]  ;;  %v91_v51 = vld [vmem:[#allocation7 + $0x168] sm:$0xff] }
  0x32   :  { %v77_v50 = vld [vmem:[#allocation7 + $0xf8] sm:$0xff]  ;;  %1611 = vmatprep.subr.bf16.mxu1 %v2372_v45  ;;  %v72_v53 = vld [vmem:[#allocation7 + $0xd0] sm:$0xff]  ;;  %v2384_v55 = vpack.c.bf16 %v82_v44, %v78_v43  ;;  %v2387_v58 = vpack.c.bf16 %v91_v51, %v87_v47  ;;  %v86_v59 = vld [vmem:[#allocation7 + $0x140] sm:$0xff] }
  0x33   :  { %1581 = vmatpush1.bf16.msra.mxu0 %v2357_v26  ;;  %v2381_v52 = vpack.c.bf16 %v77_v50, %v73_v49  ;;  %v76_v54 = vld [vmem:[#allocation7 + $0xf0] sm:$0xff]  ;;  %v81_v56 = vld [vmem:[#allocation7 + $0x118] sm:$0xff]  ;;  %v90_v60 = vld [vmem:[#allocation7 + $0x160] sm:$0xff] }
  0x34   :  { %1583 = vmatprep.subr.bf16.mxu0 %v2361_v30  ;;  %v85_v57 = vld [vmem:[#allocation7 + $0x138] sm:$0xff]  ;;  %v95_v61 = vld [vmem:[#allocation7 + $0x188] sm:$0xff]  ;;  %v2390_v62 = vpack.c.bf16 %v76_v54, %v72_v53  ;;  %v80_v2 = vld [vmem:[#allocation7 + $0x110] sm:$0xff]  ;;  %v2396_v7 = vpack.c.bf16 %v90_v60, %v86_v59 }
  0x35   :  { %1613 = vmatpush1.bf16.msra.mxu1 %v2378_v48  ;;  %v99_v63 = vld [vmem:[#allocation7 + $0x1a8] sm:$0xff]  ;;  %v2393_v1 = vpack.c.bf16 %v85_v57, %v81_v56  ;;  %v84_v3 = vld [vmem:[#allocation7 + $0x130] sm:$0xff]  ;;  %v89_v5 = vld [vmem:[#allocation7 + $0x158] sm:$0xff] }
  0x36   :  { %1615 = vmatprep.subr.bf16.mxu1 %v2381_v52  ;;  %v93_v6 = vld [vmem:[#allocation7 + $0x178] sm:$0xff]  ;;  %v2399_v10 = vpack.c.bf16 %v99_v63, %v95_v61  ;;  %v94_v11 = vld [vmem:[#allocation7 + $0x180] sm:$0xff]  ;;  %v103_v13 = vld [vmem:[#allocation7 + $0x1c8] sm:$0xff]  ;;  %v2402_v15 = vpack.c.bf16 %v84_v3, %v80_v2 }
  0x37   :  { %1585 = vmatpush1.bf16.msra.mxu0 %v2370_v42  ;;  %v98_v12 = vld [vmem:[#allocation7 + $0x1a0] sm:$0xff]  ;;  %v107_v16 = vld [vmem:[#allocation7 + $0x1e8] sm:$0xff]  ;;  %v2405_v18 = vpack.c.bf16 %v93_v6, %v89_v5  ;;  %v88_v19 = vld [vmem:[#allocation7 + $0x150] sm:$0xff] }
  0x38   :  { %1587 = vmatprep.subr.bf16.mxu0 %v2375_v46  ;;  %v92_v20 = vld [vmem:[#allocation7 + $0x170] sm:$0xff]  ;;  %v97_v21 = vld [vmem:[#allocation7 + $0x198] sm:$0xff]  ;;  %v2408_v24 = vpack.c.bf16 %v98_v12, %v94_v11  ;;  %v2411_v27 = vpack.c.bf16 %v107_v16, %v103_v13  ;;  %v102_v28 = vld [vmem:[#allocation7 + $0x1c0] sm:$0xff] }
  0x39   :  { %1617 = vmatpush1.bf16.msra.mxu1 %v2390_v62  ;;  %v101_v23 = vld [vmem:[#allocation7 + $0x1b8] sm:$0xff]  ;;  %v106_v29 = vld [vmem:[#allocation7 + $0x1e0] sm:$0xff]  ;;  %v2414_v31 = vpack.c.bf16 %v92_v20, %v88_v19  ;;  %v96_v34 = vld [vmem:[#allocation7 + $0x190] sm:$0xff] }
  0x3a   :  { %1619 = vmatprep.subr.bf16.mxu1 %v2393_v1  ;;  %v2417_v32 = vpack.c.bf16 %v101_v23, %v97_v21  ;;  %v100_v35 = vld [vmem:[#allocation7 + $0x1b0] sm:$0xff]  ;;  %v105_v36 = vld [vmem:[#allocation7 + $0x1d8] sm:$0xff]  ;;  %v2420_v39 = vpack.c.bf16 %v106_v29, %v102_v28  ;;  %v112_v49 = vld [vmem:[#allocation4] sm:$0xff] }
  0x3b   :  { %1589 = vmatpush1.bf16.msra.mxu0 %v2384_v55  ;;  %v109_v38 = vld [vmem:[#allocation7 + $0x1f8] sm:$0xff]  ;;  %v2424_v40 = vpack.c.bf16 %v100_v35, %v96_v34  ;;  %v104_v43 = vld [vmem:[#allocation7 + $0x1d0] sm:$0xff]  ;;  %v113_v50 = vld [vmem:[#allocation4 + $0x8] sm:$0xff] }
  0x3c   :  { %1591 = vmatprep.subr.bf16.mxu0 %v2387_v58  ;;  %v2427_v41 = vpack.c.bf16 %v109_v38, %v105_v36  ;;  %v108_v44 = vld [vmem:[#allocation7 + $0x1f0] sm:$0xff]  ;;  %v115_v60 = vld [vmem:[#allocation4 + $0x18] sm:$0xff] }
  0x3d   :  { %1621 = vmatpush1.bf16.msra.mxu1 %v2402_v15  ;;  %v2431_v47 = vpack.c.bf16 %v108_v44, %v104_v43  ;;  %v114_v3 = vld [vmem:[#allocation4 + $0x10] sm:$0xff]  ;;  %v288_v44 = vld [vmem:[#allocation4 + $0x20] sm:$0xff] }
  0x3e   :  { %1623 = vmatprep.subr.bf16.mxu1 %v2405_v18 }
  0x3f   :  { %1593 = vmatpush1.bf16.msra.mxu0 %v2396_v7 }
  0x40   :  { %1595 = vmatprep.subr.bf16.mxu0 %v2399_v10 }
  0x41   :  { %1625 = vmatpush1.bf16.msra.mxu1 %v2414_v31 }
  0x42   :  { %1627 = vmatprep.subr.bf16.mxu1 %v2417_v32 }
  0x43   :  { %1597 = vmatpush1.bf16.msra.mxu0 %v2408_v24 }
  0x44   :  { %1599 = vmatprep.subr.bf16.mxu0 %v2411_v27 }
  0x45   :  { %1629 = vmatpush1.bf16.msra.mxu1 %v2424_v40 }
  0x46   :  { %1631 = vmatprep.subr.bf16.mxu1 %v2427_v41 }
  0x47   :  { %1601 = vmatpush1.bf16.msra.mxu0 %v2420_v39 }
  0x48   :  { %1635 = vmatprep.subr.bf16.mxu0 %v2339_v4 }
  0x49   :  { %1633 = vmatpush1.bf16.msra.mxu1 %v2431_v47 }
  0x4a   :  { %181 = vmatmul.mubr.f32.vlgmr.msra.gmra.mrb[0].mxu0 %v2294_v0  ;;  %1667 = vmatprep.subr.bf16.mxu1 %v2352_v22 }
  0x4b   :  { %1637 = vmatpush1.bf16.msra.mxu0 %v2341_v8  ;;  %356 = vmatprep.mubr.f32.mxu0 %v2294_v0 }
  0x4c   :  { %1639 = vmatprep.subr.bf16.mxu0 %v2343_v9  ;;  %252 = vmatmul.mubr.f32.vlgmr.msra.gmra.mrb[0].mxu1 %v2294_v0 }
  0x4d   :  { %1669 = vmatpush1.bf16.msra.mxu1 %v2354_v25  ;;  %427 = vmatprep.mubr.f32.mxu1 %v2294_v0 }
  0x4e   :  { %1671 = vmatprep.subr.bf16.mxu1 %v2364_v33 }
  0x4f   :  { %1641 = vmatpush1.bf16.msra.mxu0 %v2347_v14 }
  0x50   :  { %1643 = vmatprep.subr.bf16.mxu0 %v2350_v17 }
  0x51   :  { %1673 = vmatpush1.bf16.msra.mxu1 %v2366_v37 }
  0x52   :  { %1675 = vmatprep.subr.bf16.mxu1 %v2372_v45 }
  0x53   :  { %1645 = vmatpush1.bf16.msra.mxu0 %v2357_v26 }
  0x54   :  { %1647 = vmatprep.subr.bf16.mxu0 %v2361_v30 }
  0x55   :  { %1677 = vmatpush1.bf16.msra.mxu1 %v2378_v48 }
  0x56   :  { %1679 = vmatprep.subr.bf16.mxu1 %v2381_v52 }
  0x57   :  { %1649 = vmatpush1.bf16.msra.mxu0 %v2370_v42 }
  0x58   :  { %1651 = vmatprep.subr.bf16.mxu0 %v2375_v46 }
  0x59   :  { %1681 = vmatpush1.bf16.msra.mxu1 %v2390_v62 }
  0x5a   :  { %1683 = vmatprep.subr.bf16.mxu1 %v2393_v1 }
  0x5b   :  { %1653 = vmatpush1.bf16.msra.mxu0 %v2384_v55 }
  0x5c   :  { %1655 = vmatprep.subr.bf16.mxu0 %v2387_v58 }
  0x5d   :  { %1685 = vmatpush1.bf16.msra.mxu1 %v2402_v15 }
  0x5e   :  { %1687 = vmatprep.subr.bf16.mxu1 %v2405_v18 }
  0x5f   :  { %1657 = vmatpush1.bf16.msra.mxu0 %v2396_v7 }
  0x60   :  { %1659 = vmatprep.subr.bf16.mxu0 %v2399_v10 }
  0x61   :  { %1689 = vmatpush1.bf16.msra.mxu1 %v2414_v31 }
  0x62   :  { %1691 = vmatprep.subr.bf16.mxu1 %v2417_v32 }
  0x63   :  { %1661 = vmatpush1.bf16.msra.mxu0 %v2408_v24 }
  0x64   :  { %1663 = vmatprep.subr.bf16.mxu0 %v2411_v27 }
  0x65   :  { %1693 = vmatpush1.bf16.msra.mxu1 %v2424_v40 }
  0x66   :  { %1695 = vmatprep.subr.bf16.mxu1 %v2427_v41 }
  0x67   :  { %1665 = vmatpush1.bf16.msra.mxu0 %v2420_v39 }
  0x68   :  { %1699 = vmatprep.subr.bf16.mxu0 %v2339_v4 }
  0x69   :  { %1697 = vmatpush1.bf16.msra.mxu1 %v2431_v47 }
  0x6a   :  { %1731 = vmatprep.subr.bf16.mxu1 %v2352_v22 }
 0x11d   :  { %v182_v51 = vpop.f32.mrb[0].mxu0 }
 0x11e   :  { %v258_v53 = vadd.f32 %v182_v51, %v112_v49  ;;  %v184_v54 = vpop.f32.mrb[1].mxu0  ;;  %v289_v49 = vld [vmem:[#allocation4 + $0x28] sm:$0xff] }
 0x11f   :  { %v259_v56 = vadd.f32 %v184_v54, %v113_v50  ;;  %v253_v61 = vpop.f32.mrb[0].mxu1 }
 0x120   :  { %v1546_v57 = vmul.f32 -1.442695, %v258_v53  ;;  %v255_v63 = vpop.f32.mrb[1].mxu1  ;;  %v260_v6 = vadd.f32 %v253_v61, %v114_v3  ;;  %v291_v61 = vld [vmem:[#allocation4 + $0x38] sm:$0xff] }
 0x121   :  { %v1547_v59 = vmul.f32 -1.442695, %v259_v56  ;;  %v261_v2 = vadd.f32 %v255_v63, %v115_v60 }
 0x122   :  { %2090 = vpow2.f32 %v1546_v57 }
 0x123   :  { %2092 = vpow2.f32 %v1547_v59  ;;  %v1548_v5 = vmul.f32 -1.442695, %v261_v2  ;;  %v290_v2 = vld [vmem:[#allocation4 + $0x30] sm:$0xff] }
 0x125   :  { %2094 = vpow2.f32 %v1548_v5 }
 0x126   :  { %2096 = vtanh.f32 %v260_v6 }
 0x12c   :  { %v2091_v11 = vpop.eup %2090 }
 0x12d   :  { %v2093_v12 = vpop.eup %2092  ;;  %v265_v13 = vadd.f32 1.0, %v2091_v11 }
 0x12e   :  { %v271_v16 = vadd.f32 1.0, %v2093_v12 }
 0x12f   :  { %2098 = vrcp.f32 %v265_v13  ;;  %v2095_v19 = vpop.eup %2094 }
 0x130   :  { %2100 = vrcp.f32 %v271_v16  ;;  %v2097_v20 = vpop.eup %2096  ;;  %v278_v23 = vadd.f32 1.0, %v2095_v19 }
 0x132   :  { %2102 = vrcp.f32 %v278_v23 }
 0x139   :  { %v2099_v21 = vpop.eup %2098 }
 0x13a   :  { %v2101_v28 = vpop.eup %2100  ;;  %v282_v29 = vmul.f32 %v2099_v21, %v2097_v20 }
 0x13b   :  { %v281_v34 = vmul.f32 0.0, %v2101_v28 }
 0x13c   :  { %v2103_v36 = vpop.eup %2102 }
 0x13d   :  { %v2473_v35 = vadd.f32 %v282_v29, %v281_v34 }
 0x13f   :  { %2104 = vtanh.f32 %v2473_v35 }
 0x149   :  { %v2105_v38 = vpop.eup %2104 }
 0x14a   :  { %v285_v43 = vmul.f32 %v2105_v38, %v2103_v36 }
 0x14c   :  { %286 = vst [vmem:[#allocation9] sm:$0xff] %v285_v43  ;;  %357 = vmatmul.mubr.f32.vlgmr.msra.gmra.mrb[2].mxu0 %v285_v43  ;;  %428 = vmatmul.mubr.f32.vlgmr.msra.gmra.mrb[2].mxu1 %v285_v43 }
 0x14d   :  { %1701 = vmatpush1.bf16.msra.mxu0 %v2341_v8  ;;  %1733 = vmatpush1.bf16.msra.mxu1 %v2354_v25 }
 0x14e   :  { %1703 = vmatprep.subr.bf16.mxu0 %v2343_v9  ;;  %1735 = vmatprep.subr.bf16.mxu1 %v2364_v33 }
 0x14f   :  { %533 = vmatprep.mubr.f32.mxu0 %v2294_v0  ;;  %604 = vmatprep.mubr.f32.mxu1 %v2294_v0 }
 0x151   :  { %1705 = vmatpush1.bf16.msra.mxu0 %v2347_v14  ;;  %1737 = vmatpush1.bf16.msra.mxu1 %v2366_v37 }
 0x152   :  { %1707 = vmatprep.subr.bf16.mxu0 %v2350_v17  ;;  %1739 = vmatprep.subr.bf16.mxu1 %v2372_v45 }
 0x155   :  { %1709 = vmatpush1.bf16.msra.mxu0 %v2357_v26  ;;  %1741 = vmatpush1.bf16.msra.mxu1 %v2378_v48 }
 0x156   :  { %1711 = vmatprep.subr.bf16.mxu0 %v2361_v30  ;;  %1743 = vmatprep.subr.bf16.mxu1 %v2381_v52 }
 0x159   :  { %1713 = vmatpush1.bf16.msra.mxu0 %v2370_v42  ;;  %1745 = vmatpush1.bf16.msra.mxu1 %v2390_v62 }
 0x15a   :  { %1715 = vmatprep.subr.bf16.mxu0 %v2375_v46  ;;  %1747 = vmatprep.subr.bf16.mxu1 %v2393_v1 }
 0x15d   :  { %1717 = vmatpush1.bf16.msra.mxu0 %v2384_v55  ;;  %1749 = vmatpush1.bf16.msra.mxu1 %v2402_v15 }
 0x15e   :  { %1719 = vmatprep.subr.bf16.mxu0 %v2387_v58  ;;  %1751 = vmatprep.subr.bf16.mxu1 %v2405_v18 }
 0x161   :  { %1721 = vmatpush1.bf16.msra.mxu0 %v2396_v7  ;;  %1753 = vmatpush1.bf16.msra.mxu1 %v2414_v31 }
 0x162   :  { %1723 = vmatprep.subr.bf16.mxu0 %v2399_v10  ;;  %1755 = vmatprep.subr.bf16.mxu1 %v2417_v32 }
 0x165   :  { %1725 = vmatpush1.bf16.msra.mxu0 %v2408_v24  ;;  %1757 = vmatpush1.bf16.msra.mxu1 %v2424_v40 }
 0x166   :  { %1727 = vmatprep.subr.bf16.mxu0 %v2411_v27  ;;  %1759 = vmatprep.subr.bf16.mxu1 %v2427_v41 }
 0x169   :  { %1729 = vmatpush1.bf16.msra.mxu0 %v2420_v39  ;;  %1761 = vmatpush1.bf16.msra.mxu1 %v2431_v47 }
 0x16a   :  { %1763 = vmatprep.subr.bf16.mxu0 %v2339_v4  ;;  %1795 = vmatprep.subr.bf16.mxu1 %v2352_v22 }
 0x21f   :  { %v358_v50 = vpop.f32.mrb[2].mxu0  ;;  %v429_v51 = vpop.f32.mrb[2].mxu1 }
 0x220   :  { %v434_v53 = vadd.f32 %v358_v50, %v288_v44  ;;  %v360_v54 = vpop.f32.mrb[3].mxu0  ;;  %v431_v56 = vpop.f32.mrb[3].mxu1  ;;  %v436_v5 = vadd.f32 %v429_v51, %v290_v2  ;;  %v466_v44 = vld [vmem:[#allocation4 + $0x48] sm:$0xff] }
 0x221   :  { %v435_v57 = vadd.f32 %v360_v54, %v289_v49  ;;  %v437_v63 = vadd.f32 %v431_v56, %v291_v61 }
 0x222   :  { %v1549_v59 = vmul.f32 -1.442695, %v434_v53 }
 0x223   :  { %v1550_v60 = vmul.f32 -1.442695, %v435_v57  ;;  %v1551_v3 = vmul.f32 -1.442695, %v437_v63  ;;  %v467_v63 = vld [vmem:[#allocation4 + $0x50] sm:$0xff] }
 0x224   :  { %2106 = vpow2.f32 %v1549_v59 }
 0x225   :  { %2108 = vpow2.f32 %v1550_v60  ;;  %v468_v60 = vld [vmem:[#allocation4 + $0x58] sm:$0xff] }
 0x226   :  { %2110 = vpow2.f32 %v1551_v3 }
 0x227   :  { %2112 = vtanh.f32 %v436_v5 }
 0x22e   :  { %v2107_v6 = vpop.eup %2106 }
 0x22f   :  { %v2109_v11 = vpop.eup %2108  ;;  %v441_v12 = vadd.f32 1.0, %v2107_v6 }
 0x230   :  { %v447_v13 = vadd.f32 1.0, %v2109_v11  ;;  %v2111_v16 = vpop.eup %2110 }
 0x231   :  { %2114 = vrcp.f32 %v441_v12  ;;  %v2113_v19 = vpop.eup %2112  ;;  %v454_v28 = vadd.f32 1.0, %v2111_v16 }
 0x232   :  { %2116 = vrcp.f32 %v447_v13 }
 0x233   :  { %2118 = vrcp.f32 %v454_v28 }
 0x23b   :  { %v2115_v20 = vpop.eup %2114 }
 0x23c   :  { %v2117_v21 = vpop.eup %2116  ;;  %v458_v23 = vmul.f32 %v2115_v20, %v2113_v19 }
 0x23d   :  { %v457_v29 = vmul.f32 %v2117_v21, %v2473_v35  ;;  %v2119_v36 = vpop.eup %2118  ;;  %v465_v35 = vld [vmem:[#allocation4 + $0x40] sm:$0xff] }
 0x23f   :  { %v2511_v34 = vadd.f32 %v458_v23, %v457_v29 }
 0x241   :  { %2120 = vtanh.f32 %v2511_v34 }
 0x24b   :  { %v2121_v38 = vpop.eup %2120 }
 0x24c   :  { %v461_v43 = vmul.f32 %v2121_v38, %v2119_v36 }
 0x24e   :  { %463 = vst [vmem:[#allocation9 + $0x8] sm:$0xff] %v461_v43  ;;  %534 = vmatmul.mubr.f32.vlgmr.msra.gmra.mrb[4].mxu0 %v461_v43  ;;  %605 = vmatmul.mubr.f32.vlgmr.msra.gmra.mrb[4].mxu1 %v461_v43 }
 0x24f   :  { %1765 = vmatpush1.bf16.msra.mxu0 %v2341_v8  ;;  %1797 = vmatpush1.bf16.msra.mxu1 %v2354_v25 }
 0x250   :  { %1767 = vmatprep.subr.bf16.mxu0 %v2343_v9  ;;  %1799 = vmatprep.subr.bf16.mxu1 %v2364_v33 }
 0x251   :  { %710 = vmatprep.mubr.f32.mxu0 %v2294_v0  ;;  %781 = vmatprep.mubr.f32.mxu1 %v2294_v0 }
 0x253   :  { %1769 = vmatpush1.bf16.msra.mxu0 %v2347_v14  ;;  %1801 = vmatpush1.bf16.msra.mxu1 %v2366_v37 }
 0x254   :  { %1771 = vmatprep.subr.bf16.mxu0 %v2350_v17  ;;  %1803 = vmatprep.subr.bf16.mxu1 %v2372_v45 }
 0x257   :  { %1773 = vmatpush1.bf16.msra.mxu0 %v2357_v26  ;;  %1805 = vmatpush1.bf16.msra.mxu1 %v2378_v48 }
 0x258   :  { %1775 = vmatprep.subr.bf16.mxu0 %v2361_v30  ;;  %1807 = vmatprep.subr.bf16.mxu1 %v2381_v52 }
 0x25b   :  { %1777 = vmatpush1.bf16.msra.mxu0 %v2370_v42  ;;  %1809 = vmatpush1.bf16.msra.mxu1 %v2390_v62 }
 0x25c   :  { %1779 = vmatprep.subr.bf16.mxu0 %v2375_v46  ;;  %1811 = vmatprep.subr.bf16.mxu1 %v2393_v1 }
 0x25f   :  { %1781 = vmatpush1.bf16.msra.mxu0 %v2384_v55  ;;  %1813 = vmatpush1.bf16.msra.mxu1 %v2402_v15 }
 0x260   :  { %1783 = vmatprep.subr.bf16.mxu0 %v2387_v58  ;;  %1815 = vmatprep.subr.bf16.mxu1 %v2405_v18 }
 0x263   :  { %1785 = vmatpush1.bf16.msra.mxu0 %v2396_v7  ;;  %1817 = vmatpush1.bf16.msra.mxu1 %v2414_v31 }
 0x264   :  { %1787 = vmatprep.subr.bf16.mxu0 %v2399_v10  ;;  %1819 = vmatprep.subr.bf16.mxu1 %v2417_v32 }
 0x267   :  { %1789 = vmatpush1.bf16.msra.mxu0 %v2408_v24  ;;  %1821 = vmatpush1.bf16.msra.mxu1 %v2424_v40 }
 0x268   :  { %1791 = vmatprep.subr.bf16.mxu0 %v2411_v27  ;;  %1823 = vmatprep.subr.bf16.mxu1 %v2427_v41 }
 0x26b   :  { %1793 = vmatpush1.bf16.msra.mxu0 %v2420_v39  ;;  %1825 = vmatpush1.bf16.msra.mxu1 %v2431_v47 }
 0x26c   :  { %1827 = vmatprep.subr.bf16.mxu0 %v2339_v4  ;;  %1859 = vmatprep.subr.bf16.mxu1 %v2352_v22 }
 0x321   :  { %v535_v49 = vpop.f32.mrb[4].mxu0  ;;  %v606_v50 = vpop.f32.mrb[4].mxu1 }
 0x322   :  { %v611_v51 = vadd.f32 %v535_v49, %v465_v35  ;;  %v537_v53 = vpop.f32.mrb[5].mxu0  ;;  %v608_v54 = vpop.f32.mrb[5].mxu1  ;;  %v613_v3 = vadd.f32 %v606_v50, %v467_v63  ;;  %v643_v35 = vld [vmem:[#allocation4 + $0x68] sm:$0xff] }
 0x323   :  { %v612_v56 = vadd.f32 %v537_v53, %v466_v44  ;;  %v614_v61 = vadd.f32 %v608_v54, %v468_v60 }
 0x324   :  { %v1552_v57 = vmul.f32 -1.442695, %v611_v51 }
 0x325   :  { %v1553_v59 = vmul.f32 -1.442695, %v612_v56  ;;  %v1554_v2 = vmul.f32 -1.442695, %v614_v61  ;;  %v644_v61 = vld [vmem:[#allocation4 + $0x70] sm:$0xff] }
 0x326   :  { %2122 = vpow2.f32 %v1552_v57 }
 0x327   :  { %2124 = vpow2.f32 %v1553_v59  ;;  %v645_v59 = vld [vmem:[#allocation4 + $0x78] sm:$0xff] }
 0x328   :  { %2126 = vpow2.f32 %v1554_v2 }
 0x329   :  { %2128 = vtanh.f32 %v613_v3 }
 0x330   :  { %v2123_v5 = vpop.eup %2122 }
 0x331   :  { %v2125_v6 = vpop.eup %2124  ;;  %v618_v11 = vadd.f32 1.0, %v2123_v5 }
 0x332   :  { %v624_v12 = vadd.f32 1.0, %v2125_v6  ;;  %v2127_v13 = vpop.eup %2126 }
 0x333   :  { %2130 = vrcp.f32 %v618_v11  ;;  %v2129_v16 = vpop.eup %2128  ;;  %v631_v23 = vadd.f32 1.0, %v2127_v13 }
 0x334   :  { %2132 = vrcp.f32 %v624_v12 }
 0x335   :  { %2134 = vrcp.f32 %v631_v23 }
 0x33d   :  { %v2131_v19 = vpop.eup %2130 }
 0x33e   :  { %v2133_v20 = vpop.eup %2132  ;;  %v635_v21 = vmul.f32 %v2131_v19, %v2129_v16 }
 0x33f   :  { %v634_v28 = vmul.f32 %v2133_v20, %v2511_v34  ;;  %v2135_v36 = vpop.eup %2134  ;;  %v642_v34 = vld [vmem:[#allocation4 + $0x60] sm:$0xff] }
 0x341   :  { %v2549_v29 = vadd.f32 %v635_v21, %v634_v28 }
 0x343   :  { %2136 = vtanh.f32 %v2549_v29 }
 0x34d   :  { %v2137_v38 = vpop.eup %2136 }
 0x34e   :  { %v638_v43 = vmul.f32 %v2137_v38, %v2135_v36 }
 0x350   :  { %640 = vst [vmem:[#allocation9 + $0x10] sm:$0xff] %v638_v43  ;;  %711 = vmatmul.mubr.f32.vlgmr.msra.gmra.mrb[6].mxu0 %v638_v43  ;;  %782 = vmatmul.mubr.f32.vlgmr.msra.gmra.mrb[6].mxu1 %v638_v43 }
 0x351   :  { %1829 = vmatpush1.bf16.msra.mxu0 %v2341_v8  ;;  %1861 = vmatpush1.bf16.msra.mxu1 %v2354_v25 }
 0x352   :  { %1831 = vmatprep.subr.bf16.mxu0 %v2343_v9  ;;  %1863 = vmatprep.subr.bf16.mxu1 %v2364_v33 }
 0x353   :  { %887 = vmatprep.mubr.f32.mxu0 %v2294_v0  ;;  %958 = vmatprep.mubr.f32.mxu1 %v2294_v0 }
 0x355   :  { %1833 = vmatpush1.bf16.msra.mxu0 %v2347_v14  ;;  %1865 = vmatpush1.bf16.msra.mxu1 %v2366_v37 }
 0x356   :  { %1835 = vmatprep.subr.bf16.mxu0 %v2350_v17  ;;  %1867 = vmatprep.subr.bf16.mxu1 %v2372_v45 }
 0x359   :  { %1837 = vmatpush1.bf16.msra.mxu0 %v2357_v26  ;;  %1869 = vmatpush1.bf16.msra.mxu1 %v2378_v48 }
 0x35a   :  { %1839 = vmatprep.subr.bf16.mxu0 %v2361_v30  ;;  %1871 = vmatprep.subr.bf16.mxu1 %v2381_v52 }
 0x35d   :  { %1841 = vmatpush1.bf16.msra.mxu0 %v2370_v42  ;;  %1873 = vmatpush1.bf16.msra.mxu1 %v2390_v62 }
 0x35e   :  { %1843 = vmatprep.subr.bf16.mxu0 %v2375_v46  ;;  %1875 = vmatprep.subr.bf16.mxu1 %v2393_v1 }
 0x361   :  { %1845 = vmatpush1.bf16.msra.mxu0 %v2384_v55  ;;  %1877 = vmatpush1.bf16.msra.mxu1 %v2402_v15 }
 0x362   :  { %1847 = vmatprep.subr.bf16.mxu0 %v2387_v58  ;;  %1879 = vmatprep.subr.bf16.mxu1 %v2405_v18 }
 0x365   :  { %1849 = vmatpush1.bf16.msra.mxu0 %v2396_v7  ;;  %1881 = vmatpush1.bf16.msra.mxu1 %v2414_v31 }
 0x366   :  { %1851 = vmatprep.subr.bf16.mxu0 %v2399_v10  ;;  %1883 = vmatprep.subr.bf16.mxu1 %v2417_v32 }
 0x369   :  { %1853 = vmatpush1.bf16.msra.mxu0 %v2408_v24  ;;  %1885 = vmatpush1.bf16.msra.mxu1 %v2424_v40 }
 0x36a   :  { %1855 = vmatprep.subr.bf16.mxu0 %v2411_v27  ;;  %1887 = vmatprep.subr.bf16.mxu1 %v2427_v41 }
 0x36d   :  { %1857 = vmatpush1.bf16.msra.mxu0 %v2420_v39  ;;  %1889 = vmatpush1.bf16.msra.mxu1 %v2431_v47 }
 0x36e   :  { %1891 = vmatprep.subr.bf16.mxu0 %v2339_v4  ;;  %1923 = vmatprep.subr.bf16.mxu1 %v2352_v22 }
 0x423   :  { %v712_v44 = vpop.f32.mrb[6].mxu0  ;;  %v783_v49 = vpop.f32.mrb[6].mxu1 }
 0x424   :  { %v788_v50 = vadd.f32 %v712_v44, %v642_v34  ;;  %v714_v51 = vpop.f32.mrb[7].mxu0  ;;  %v785_v53 = vpop.f32.mrb[7].mxu1  ;;  %v790_v2 = vadd.f32 %v783_v49, %v644_v61  ;;  %v820_v34 = vld [vmem:[#allocation4 + $0x88] sm:$0xff] }
 0x425   :  { %v789_v54 = vadd.f32 %v714_v51, %v643_v35  ;;  %v791_v60 = vadd.f32 %v785_v53, %v645_v59 }
 0x426   :  { %v1555_v56 = vmul.f32 -1.442695, %v788_v50 }
 0x427   :  { %v1556_v57 = vmul.f32 -1.442695, %v789_v54  ;;  %v1557_v63 = vmul.f32 -1.442695, %v791_v60  ;;  %v821_v60 = vld [vmem:[#allocation4 + $0x90] sm:$0xff] }
 0x428   :  { %2138 = vpow2.f32 %v1555_v56 }
 0x429   :  { %2140 = vpow2.f32 %v1556_v57  ;;  %v822_v57 = vld [vmem:[#allocation4 + $0x98] sm:$0xff] }
 0x42a   :  { %2142 = vpow2.f32 %v1557_v63 }
 0x42b   :  { %2144 = vtanh.f32 %v790_v2 }
 0x432   :  { %v2139_v3 = vpop.eup %2138 }
 0x433   :  { %v2141_v5 = vpop.eup %2140  ;;  %v795_v6 = vadd.f32 1.0, %v2139_v3 }
 0x434   :  { %v801_v11 = vadd.f32 1.0, %v2141_v5  ;;  %v2143_v12 = vpop.eup %2142 }
 0x435   :  { %2146 = vrcp.f32 %v795_v6  ;;  %v2145_v13 = vpop.eup %2144  ;;  %v808_v21 = vadd.f32 1.0, %v2143_v12 }
 0x436   :  { %2148 = vrcp.f32 %v801_v11 }
 0x437   :  { %2150 = vrcp.f32 %v808_v21 }
 0x43f   :  { %v2147_v16 = vpop.eup %2146 }
 0x440   :  { %v2149_v19 = vpop.eup %2148  ;;  %v812_v20 = vmul.f32 %v2147_v16, %v2145_v13 }
 0x441   :  { %v811_v23 = vmul.f32 %v2149_v19, %v2549_v29  ;;  %v2151_v36 = vpop.eup %2150  ;;  %v819_v29 = vld [vmem:[#allocation4 + $0x80] sm:$0xff] }
 0x443   :  { %v2587_v28 = vadd.f32 %v812_v20, %v811_v23 }
 0x445   :  { %2152 = vtanh.f32 %v2587_v28 }
 0x44f   :  { %v2153_v38 = vpop.eup %2152 }
 0x450   :  { %v815_v43 = vmul.f32 %v2153_v38, %v2151_v36 }
 0x452   :  { %817 = vst [vmem:[#allocation9 + $0x18] sm:$0xff] %v815_v43  ;;  %888 = vmatmul.mubr.f32.vlgmr.msra.gmra.mrb[8].mxu0 %v815_v43  ;;  %959 = vmatmul.mubr.f32.vlgmr.msra.gmra.mrb[8].mxu1 %v815_v43 }
 0x453   :  { %1893 = vmatpush1.bf16.msra.mxu0 %v2341_v8  ;;  %1925 = vmatpush1.bf16.msra.mxu1 %v2354_v25 }
 0x454   :  { %1895 = vmatprep.subr.bf16.mxu0 %v2343_v9  ;;  %1927 = vmatprep.subr.bf16.mxu1 %v2364_v33 }
 0x455   :  { %1064 = vmatprep.mubr.f32.mxu0 %v2294_v0  ;;  %1135 = vmatprep.mubr.f32.mxu1 %v2294_v0 }
 0x457   :  { %1897 = vmatpush1.bf16.msra.mxu0 %v2347_v14  ;;  %1929 = vmatpush1.bf16.msra.mxu1 %v2366_v37 }
 0x458   :  { %1899 = vmatprep.subr.bf16.mxu0 %v2350_v17  ;;  %1931 = vmatprep.subr.bf16.mxu1 %v2372_v45 }
 0x45b   :  { %1901 = vmatpush1.bf16.msra.mxu0 %v2357_v26  ;;  %1933 = vmatpush1.bf16.msra.mxu1 %v2378_v48 }
 0x45c   :  { %1903 = vmatprep.subr.bf16.mxu0 %v2361_v30  ;;  %1935 = vmatprep.subr.bf16.mxu1 %v2381_v52 }
 0x45f   :  { %1905 = vmatpush1.bf16.msra.mxu0 %v2370_v42  ;;  %1937 = vmatpush1.bf16.msra.mxu1 %v2390_v62 }
 0x460   :  { %1907 = vmatprep.subr.bf16.mxu0 %v2375_v46  ;;  %1939 = vmatprep.subr.bf16.mxu1 %v2393_v1 }
 0x463   :  { %1909 = vmatpush1.bf16.msra.mxu0 %v2384_v55  ;;  %1941 = vmatpush1.bf16.msra.mxu1 %v2402_v15 }
 0x464   :  { %1911 = vmatprep.subr.bf16.mxu0 %v2387_v58  ;;  %1943 = vmatprep.subr.bf16.mxu1 %v2405_v18 }
 0x467   :  { %1913 = vmatpush1.bf16.msra.mxu0 %v2396_v7  ;;  %1945 = vmatpush1.bf16.msra.mxu1 %v2414_v31 }
 0x468   :  { %1915 = vmatprep.subr.bf16.mxu0 %v2399_v10  ;;  %1947 = vmatprep.subr.bf16.mxu1 %v2417_v32 }
 0x46b   :  { %1917 = vmatpush1.bf16.msra.mxu0 %v2408_v24  ;;  %1949 = vmatpush1.bf16.msra.mxu1 %v2424_v40 }
 0x46c   :  { %1919 = vmatprep.subr.bf16.mxu0 %v2411_v27  ;;  %1951 = vmatprep.subr.bf16.mxu1 %v2427_v41 }
 0x46f   :  { %1921 = vmatpush1.bf16.msra.mxu0 %v2420_v39  ;;  %1953 = vmatpush1.bf16.msra.mxu1 %v2431_v47 }
 0x470   :  { %1955 = vmatprep.subr.bf16.mxu0 %v2339_v4  ;;  %1987 = vmatprep.subr.bf16.mxu1 %v2352_v22 }
 0x525   :  { %v889_v35 = vpop.f32.mrb[8].mxu0  ;;  %v960_v44 = vpop.f32.mrb[8].mxu1 }
 0x526   :  { %v965_v49 = vadd.f32 %v889_v35, %v819_v29  ;;  %v891_v50 = vpop.f32.mrb[9].mxu0  ;;  %v962_v51 = vpop.f32.mrb[9].mxu1  ;;  %v967_v63 = vadd.f32 %v960_v44, %v821_v60  ;;  %v997_v29 = vld [vmem:[#allocation4 + $0xa8] sm:$0xff] }
 0x527   :  { %v966_v53 = vadd.f32 %v891_v50, %v820_v34  ;;  %v968_v59 = vadd.f32 %v962_v51, %v822_v57 }
 0x528   :  { %v1558_v54 = vmul.f32 -1.442695, %v965_v49 }
 0x529   :  { %v1559_v56 = vmul.f32 -1.442695, %v966_v53  ;;  %v1560_v61 = vmul.f32 -1.442695, %v968_v59  ;;  %v998_v59 = vld [vmem:[#allocation4 + $0xb0] sm:$0xff] }
 0x52a   :  { %2154 = vpow2.f32 %v1558_v54 }
 0x52b   :  { %2156 = vpow2.f32 %v1559_v56  ;;  %v999_v56 = vld [vmem:[#allocation4 + $0xb8] sm:$0xff] }
 0x52c   :  { %2158 = vpow2.f32 %v1560_v61 }
 0x52d   :  { %2160 = vtanh.f32 %v967_v63 }
 0x534   :  { %v2155_v2 = vpop.eup %2154 }
 0x535   :  { %v2157_v3 = vpop.eup %2156  ;;  %v972_v5 = vadd.f32 1.0, %v2155_v2 }
 0x536   :  { %v978_v6 = vadd.f32 1.0, %v2157_v3  ;;  %v2159_v11 = vpop.eup %2158 }
 0x537   :  { %2162 = vrcp.f32 %v972_v5  ;;  %v2161_v12 = vpop.eup %2160  ;;  %v985_v20 = vadd.f32 1.0, %v2159_v11 }
 0x538   :  { %2164 = vrcp.f32 %v978_v6 }
 0x539   :  { %2166 = vrcp.f32 %v985_v20 }
 0x541   :  { %v2163_v13 = vpop.eup %2162 }
 0x542   :  { %v2165_v16 = vpop.eup %2164  ;;  %v989_v19 = vmul.f32 %v2163_v13, %v2161_v12 }
 0x543   :  { %v988_v21 = vmul.f32 %v2165_v16, %v2587_v28  ;;  %v2167_v36 = vpop.eup %2166  ;;  %v996_v28 = vld [vmem:[#allocation4 + $0xa0] sm:$0xff] }
 0x545   :  { %v2625_v23 = vadd.f32 %v989_v19, %v988_v21 }
 0x547   :  { %2168 = vtanh.f32 %v2625_v23 }
 0x551   :  { %v2169_v38 = vpop.eup %2168 }
 0x552   :  { %v992_v43 = vmul.f32 %v2169_v38, %v2167_v36 }
 0x554   :  { %994 = vst [vmem:[#allocation9 + $0x20] sm:$0xff] %v992_v43  ;;  %1065 = vmatmul.mubr.f32.vlgmr.msra.gmra.mrb[10].mxu0 %v992_v43  ;;  %1136 = vmatmul.mubr.f32.vlgmr.msra.gmra.mrb[10].mxu1 %v992_v43 }
 0x555   :  { %1957 = vmatpush1.bf16.msra.mxu0 %v2341_v8  ;;  %1989 = vmatpush1.bf16.msra.mxu1 %v2354_v25 }
 0x556   :  { %1959 = vmatprep.subr.bf16.mxu0 %v2343_v9  ;;  %1991 = vmatprep.subr.bf16.mxu1 %v2364_v33 }
 0x557   :  { %1241 = vmatprep.mubr.f32.mxu0 %v2294_v0  ;;  %1312 = vmatprep.mubr.f32.mxu1 %v2294_v0 }
 0x559   :  { %1961 = vmatpush1.bf16.msra.mxu0 %v2347_v14  ;;  %1993 = vmatpush1.bf16.msra.mxu1 %v2366_v37 }
 0x55a   :  { %1963 = vmatprep.subr.bf16.mxu0 %v2350_v17  ;;  %1995 = vmatprep.subr.bf16.mxu1 %v2372_v45 }
 0x55d   :  { %1965 = vmatpush1.bf16.msra.mxu0 %v2357_v26  ;;  %1997 = vmatpush1.bf16.msra.mxu1 %v2378_v48 }
 0x55e   :  { %1967 = vmatprep.subr.bf16.mxu0 %v2361_v30  ;;  %1999 = vmatprep.subr.bf16.mxu1 %v2381_v52 }
 0x561   :  { %1969 = vmatpush1.bf16.msra.mxu0 %v2370_v42  ;;  %2001 = vmatpush1.bf16.msra.mxu1 %v2390_v62 }
 0x562   :  { %1971 = vmatprep.subr.bf16.mxu0 %v2375_v46  ;;  %2003 = vmatprep.subr.bf16.mxu1 %v2393_v1 }
 0x565   :  { %1973 = vmatpush1.bf16.msra.mxu0 %v2384_v55  ;;  %2005 = vmatpush1.bf16.msra.mxu1 %v2402_v15 }
 0x566   :  { %1975 = vmatprep.subr.bf16.mxu0 %v2387_v58  ;;  %2007 = vmatprep.subr.bf16.mxu1 %v2405_v18 }
 0x569   :  { %1977 = vmatpush1.bf16.msra.mxu0 %v2396_v7  ;;  %2009 = vmatpush1.bf16.msra.mxu1 %v2414_v31 }
 0x56a   :  { %1979 = vmatprep.subr.bf16.mxu0 %v2399_v10  ;;  %2011 = vmatprep.subr.bf16.mxu1 %v2417_v32 }
 0x56d   :  { %1981 = vmatpush1.bf16.msra.mxu0 %v2408_v24  ;;  %2013 = vmatpush1.bf16.msra.mxu1 %v2424_v40 }
 0x56e   :  { %1983 = vmatprep.subr.bf16.mxu0 %v2411_v27  ;;  %2015 = vmatprep.subr.bf16.mxu1 %v2427_v41 }
 0x571   :  { %1985 = vmatpush1.bf16.msra.mxu0 %v2420_v39  ;;  %2017 = vmatpush1.bf16.msra.mxu1 %v2431_v47 }
 0x572   :  { %2019 = vmatprep.subr.bf16.mxu0 %v2339_v4  ;;  %2051 = vmatprep.subr.bf16.mxu1 %v2352_v22 }
 0x627   :  { %v1066_v34 = vpop.f32.mrb[10].mxu0  ;;  %v1137_v35 = vpop.f32.mrb[10].mxu1 }
 0x628   :  { %v1142_v44 = vadd.f32 %v1066_v34, %v996_v28  ;;  %v1068_v49 = vpop.f32.mrb[11].mxu0  ;;  %v1139_v50 = vpop.f32.mrb[11].mxu1  ;;  %v1144_v61 = vadd.f32 %v1137_v35, %v998_v59 }
 0x629   :  { %v1143_v51 = vadd.f32 %v1068_v49, %v997_v29  ;;  %v1145_v57 = vadd.f32 %v1139_v50, %v999_v56  ;;  %v1353_v50 = vld [vmem:[#allocation4 + $0xf8] sm:$0xff] }
 0x62a   :  { %v1561_v53 = vmul.f32 -1.442695, %v1142_v44 }
 0x62b   :  { %v1562_v54 = vmul.f32 -1.442695, %v1143_v51  ;;  %v1563_v60 = vmul.f32 -1.442695, %v1145_v57 }
 0x62c   :  { %2170 = vpow2.f32 %v1561_v53  ;;  %v1352_v53 = vld [vmem:[#allocation4 + $0xf0] sm:$0xff] }
 0x62d   :  { %2172 = vpow2.f32 %v1562_v54 }
 0x62e   :  { %2174 = vpow2.f32 %v1563_v60 }
 0x62f   :  { %2176 = vtanh.f32 %v1144_v61 }
 0x636   :  { %v2171_v4 = vpop.eup %2170 }
 0x637   :  { %v2173_v63 = vpop.eup %2172  ;;  %v1149_v22 = vadd.f32 1.0, %v2171_v4 }
 0x638   :  { %v1155_v2 = vadd.f32 1.0, %v2173_v63  ;;  %v2175_v3 = vpop.eup %2174 }
 0x639   :  { %2178 = vrcp.f32 %v1149_v22  ;;  %v2177_v5 = vpop.eup %2176  ;;  %v1162_v13 = vadd.f32 1.0, %v2175_v3 }
 0x63a   :  { %2180 = vrcp.f32 %v1155_v2 }
 0x63b   :  { %2182 = vrcp.f32 %v1162_v13 }
 0x643   :  { %v2179_v6 = vpop.eup %2178 }
 0x644   :  { %v2181_v11 = vpop.eup %2180  ;;  %v1166_v12 = vmul.f32 %v2179_v6, %v2177_v5 }
 0x645   :  { %v1165_v16 = vmul.f32 %v2181_v11, %v2625_v23  ;;  %v2183_v20 = vpop.eup %2182  ;;  %v1351_v23 = vld [vmem:[#allocation4 + $0xe8] sm:$0xff] }
 0x647   :  { %v2663_v19 = vadd.f32 %v1166_v12, %v1165_v16 }
 0x649   :  { %2184 = vtanh.f32 %v2663_v19 }
 0x653   :  { %v2185_v21 = vpop.eup %2184 }
 0x654   :  { %v1169_v36 = vmul.f32 %v2185_v21, %v2183_v20 }
 0x656   :  { %1171 = vst [vmem:[#allocation9 + $0x28] sm:$0xff] %v1169_v36  ;;  %1242 = vmatmul.mubr.f32.vlgmr.msra.gmra.mrb[12].mxu0 %v1169_v36  ;;  %1313 = vmatmul.mubr.f32.vlgmr.msra.gmra.mrb[12].mxu1 %v1169_v36 }
 0x657   :  { %2021 = vmatpush1.bf16.msra.mxu0 %v2341_v8  ;;  %2053 = vmatpush1.bf16.msra.mxu1 %v2354_v25  ;;  %v1174_v8 = vld [vmem:[#allocation4 + $0xc8] sm:$0xff] }
 0x658   :  { %2023 = vmatprep.subr.bf16.mxu0 %v2343_v9  ;;  %2055 = vmatprep.subr.bf16.mxu1 %v2364_v33 }
 0x659   :  { %1418 = vmatprep.mubr.f32.mxu0 %v2294_v0  ;;  %1489 = vmatprep.mubr.f32.mxu1 %v2294_v0  ;;  %v1173_v0 = vld [vmem:[#allocation4 + $0xc0] sm:$0xff] }
 0x65b   :  { %2025 = vmatpush1.bf16.msra.mxu0 %v2347_v14  ;;  %2057 = vmatpush1.bf16.msra.mxu1 %v2366_v37 }
 0x65c   :  { %2027 = vmatprep.subr.bf16.mxu0 %v2350_v17  ;;  %2059 = vmatprep.subr.bf16.mxu1 %v2372_v45 }
 0x65f   :  { %2029 = vmatpush1.bf16.msra.mxu0 %v2357_v26  ;;  %2061 = vmatpush1.bf16.msra.mxu1 %v2378_v48 }
 0x660   :  { %2031 = vmatprep.subr.bf16.mxu0 %v2361_v30  ;;  %2063 = vmatprep.subr.bf16.mxu1 %v2381_v52 }
 0x663   :  { %2033 = vmatpush1.bf16.msra.mxu0 %v2370_v42  ;;  %2065 = vmatpush1.bf16.msra.mxu1 %v2390_v62  ;;  %v1176_v42 = vld [vmem:[#allocation4 + $0xd8] sm:$0xff] }
 0x664   :  { %2035 = vmatprep.subr.bf16.mxu0 %v2375_v46  ;;  %2067 = vmatprep.subr.bf16.mxu1 %v2393_v1  ;;  %v1175_v46 = vld [vmem:[#allocation4 + $0xd0] sm:$0xff] }
 0x667   :  { %2037 = vmatpush1.bf16.msra.mxu0 %v2384_v55  ;;  %2069 = vmatpush1.bf16.msra.mxu1 %v2402_v15 }
 0x668   :  { %2039 = vmatprep.subr.bf16.mxu0 %v2387_v58  ;;  %2071 = vmatprep.subr.bf16.mxu1 %v2405_v18 }
 0x66b   :  { %2041 = vmatpush1.bf16.msra.mxu0 %v2396_v7  ;;  %2073 = vmatpush1.bf16.msra.mxu1 %v2414_v31 }
 0x66c   :  { %2043 = vmatprep.subr.bf16.mxu0 %v2399_v10  ;;  %2075 = vmatprep.subr.bf16.mxu1 %v2417_v32 }
 0x66f   :  { %2045 = vmatpush1.bf16.msra.mxu0 %v2408_v24  ;;  %2077 = vmatpush1.bf16.msra.mxu1 %v2424_v40 }
 0x670   :  { %2047 = vmatprep.subr.bf16.mxu0 %v2411_v27  ;;  %2079 = vmatprep.subr.bf16.mxu1 %v2427_v41 }
 0x673   :  { %2049 = vmatpush1.bf16.msra.mxu0 %v2420_v39  ;;  %2081 = vmatpush1.bf16.msra.mxu1 %v2431_v47  ;;  %v1350_v47 = vld [vmem:[#allocation4 + $0xe0] sm:$0xff] }
 0x729   :  { %v1243_v9 = vpop.f32.mrb[12].mxu0  ;;  %v1314_v14 = vpop.f32.mrb[12].mxu1 }
 0x72a   :  { %v1319_v17 = vadd.f32 %v1243_v9, %v1173_v0  ;;  %v1245_v25 = vpop.f32.mrb[13].mxu0  ;;  %v1316_v26 = vpop.f32.mrb[13].mxu1  ;;  %v1321_v52 = vadd.f32 %v1314_v14, %v1175_v46 }
 0x72b   :  { %v1320_v30 = vadd.f32 %v1245_v25, %v1174_v8  ;;  %v1322_v45 = vadd.f32 %v1316_v26, %v1176_v42 }
 0x72c   :  { %v1564_v33 = vmul.f32 -1.442695, %v1319_v17 }
 0x72d   :  { %v1565_v37 = vmul.f32 -1.442695, %v1320_v30  ;;  %v1566_v48 = vmul.f32 -1.442695, %v1322_v45 }
 0x72e   :  { %2186 = vpow2.f32 %v1564_v33 }
 0x72f   :  { %2188 = vpow2.f32 %v1565_v37 }
 0x730   :  { %2190 = vpow2.f32 %v1566_v48 }
 0x731   :  { %2192 = vtanh.f32 %v1321_v52 }
 0x738   :  { %v2187_v55 = vpop.eup %2186 }
 0x739   :  { %v2189_v58 = vpop.eup %2188  ;;  %v1326_v62 = vadd.f32 1.0, %v2187_v55 }
 0x73a   :  { %v1332_v1 = vadd.f32 1.0, %v2189_v58  ;;  %v2191_v7 = vpop.eup %2190 }
 0x73b   :  { %2194 = vrcp.f32 %v1326_v62  ;;  %v2193_v10 = vpop.eup %2192  ;;  %v1339_v27 = vadd.f32 1.0, %v2191_v7 }
 0x73c   :  { %2196 = vrcp.f32 %v1332_v1 }
 0x73d   :  { %2198 = vrcp.f32 %v1339_v27 }
 0x745   :  { %v2195_v15 = vpop.eup %2194 }
 0x746   :  { %v2197_v18 = vpop.eup %2196  ;;  %v1343_v24 = vmul.f32 %v2195_v15, %v2193_v10 }
 0x747   :  { %v1342_v31 = vmul.f32 %v2197_v18, %v2663_v19  ;;  %v2199_v39 = vpop.eup %2198 }
 0x749   :  { %v1344_v32 = vadd.f32 %v1343_v24, %v1342_v31 }
 0x74b   :  { %2200 = vtanh.f32 %v1344_v32 }
 0x755   :  { %v2201_v40 = vpop.eup %2200 }
 0x756   :  { %v1346_v41 = vmul.f32 %v2201_v40, %v2199_v39 }
 0x758   :  { %1348 = vst [vmem:[#allocation9 + $0x30] sm:$0xff] %v1346_v41  ;;  %1419 = vmatmul.mubr.f32.vlgmr.msra.gmra.mrb[14].mxu0 %v1346_v41  ;;  %1490 = vmatmul.mubr.f32.vlgmr.msra.gmra.mrb[14].mxu1 %v1346_v41 }
 0x82b   :  { %v1420_v38 = vpop.f32.mrb[14].mxu0  ;;  %v1491_v43 = vpop.f32.mrb[14].mxu1 }
 0x82c   :  { %v1496_v28 = vadd.f32 %v1420_v38, %v1350_v47  ;;  %v1422_v29 = vpop.f32.mrb[15].mxu0  ;;  %v1493_v34 = vpop.f32.mrb[15].mxu1  ;;  %v1498_v56 = vadd.f32 %v1491_v43, %v1352_v53 }
 0x82d   :  { %v1497_v35 = vadd.f32 %v1422_v29, %v1351_v23  ;;  %v1499_v51 = vadd.f32 %v1493_v34, %v1353_v50 }
 0x82e   :  { %v1567_v44 = vmul.f32 -1.442695, %v1496_v28 }
 0x82f   :  { %v1568_v49 = vmul.f32 -1.442695, %v1497_v35  ;;  %v1569_v54 = vmul.f32 -1.442695, %v1499_v51 }
 0x830   :  { %2202 = vpow2.f32 %v1567_v44 }
 0x831   :  { %2204 = vpow2.f32 %v1568_v49 }
 0x832   :  { %2206 = vpow2.f32 %v1569_v54 }
 0x833   :  { %2208 = vtanh.f32 %v1498_v56 }
 0x83a   :  { %v2203_v57 = vpop.eup %2202 }
 0x83b   :  { %v2205_v59 = vpop.eup %2204  ;;  %v1503_v60 = vadd.f32 1.0, %v2203_v57 }
 0x83c   :  { %v1509_v61 = vadd.f32 1.0, %v2205_v59  ;;  %v2207_v4 = vpop.eup %2206 }
 0x83d   :  { %2210 = vrcp.f32 %v1503_v60  ;;  %v2209_v63 = vpop.eup %2208  ;;  %v1516_v5 = vadd.f32 1.0, %v2207_v4 }
 0x83e   :  { %2212 = vrcp.f32 %v1509_v61 }
 0x83f   :  { %2214 = vrcp.f32 %v1516_v5 }
 0x847   :  { %v2211_v22 = vpop.eup %2210 }
 0x848   :  { %v2213_v2 = vpop.eup %2212  ;;  %v1520_v3 = vmul.f32 %v2211_v22, %v2209_v63 }
 0x849   :  { %v1519_v6 = vmul.f32 %v2213_v2, %v1344_v32  ;;  %v2215_v12 = vpop.eup %2214 }
 0x84b   :  { %v1521_v11 = vadd.f32 %v1520_v3, %v1519_v6 }
 0x84d   :  { %2216 = vtanh.f32 %v1521_v11 }
 0x857   :  { %v2217_v13 = vpop.eup %2216 }
 0x858   :  { %v1523_v16 = vmul.f32 %v2217_v13, %v2215_v12 }
 0x85a   :  { %1525 = vst [vmem:[#allocation9 + $0x38] sm:$0xff] %v1523_v16 }
 0x85b   :  { %2273 = shalt.err (!%p2270_p6)
}
 0x85c   :  { %s2274_s10 = scalar_lea.hbm %s2713_s2, 1024 }
 0x85d   :  { %p2275_p7 = scmp.ne.s32.totalorder %s2713_s2, %s2274_s10  ;;  %p2278_p8 = scmp.lt.u32.totalorder %s2274_s10, %s2713_s2 }
 0x85f   :  { %p2280_p9 = pnand %p2278_p8, %p2275_p7 }
 0x861   :  { %2283 = shalt.err (!%p2280_p9)
}
 0x862   :  { %s2296_s15 = smov 128   ;;  %s2297_s16 = smov 8  }
 0x863   :  { %1539 = dma.vmem_to_hbm [thread:$0]  %s1534_s6, 1024, %s2713_s2, [#allocation6], %s2296_s15, %s2296_s15, %s2297_s16  }
 0x864   :  { %2288 = dma.done.wait [#allocation6], 1024  }
 0x865   :  { %2289 = vsyncadd [#allocation6], 4294966272 }
 0x866   :  { %1543 = vsyncpa [#allocation5], 1 }
 0x867   :  { %1544 = vsyncpa [#allocation8], 1 }
 0x868   :  { %1545 = vsyncpa [#allocation6], 1 }

// kernel: lstm_model_forward.7
= control target key start
LH: loop header
LB: loop body
LE: loop exit
PB: predicated region body
PF: predicated region fallthrough
CT: control target
= control target key end

     0   :  { %9 = vsyncpa [#allocation5], 0  ;;  %s3001_s0 = inlined_call_operand.hbm [shape: f32[8,8,512], index: 0, kind: input, shape index: {}]   ;;  %s3002_s1 = inlined_call_operand.hbm [shape: f32[128,512], index: 1, kind: input, shape index: {}]   ;;  %s3003_s2 = inlined_call_operand.hbm [shape: f32[128,4], index: 2, kind: input, shape index: {}]   ;;  %s3004_s3 = inlined_call_operand.hbm [shape: f32[1,4], index: 3, kind: input, shape index: {}]   ;;  %s3005_s4 = inlined_call_operand.hbm [shape: f32[8,4], index: 4, kind: output, shape index: {}]  }
   0x1   :  { %10 = vsyncpa [#allocation8], 0 }
   0x2   :  { %11 = vsyncpa [#allocation11], 0 }
   0x3   :  { %12 = vsyncpa [#allocation6], 0  ;;  %s2530_s15 = smov [#allocation7]   ;;  %s2531_s17 = smov [#allocation4]  }
   0x4   :  { %s30_s16 = sshll.u32 %s2530_s15, 4  ;;  %s18_s18 = sshll.u32 %s2531_s17, 4  ;;  %s31_s16 = int_to_ptr.vmem [resolvable:$true] %s30_s16  ;;  %s2567_s18 = int_to_ptr.vmem [resolvable:$true] %s18_s18 }
   0x5   :  { %s2412_s21 = scalar_lea.hbm %s3002_s1, 8192 }
   0x6   :  { %p2413_p0 = scmp.ne.s32.totalorder %s3002_s1, %s2412_s21  ;;  %p2416_p1 = scmp.lt.u32.totalorder %s2412_s21, %s3002_s1 }
   0x8   :  { %p2418_p2 = pnand %p2416_p1, %p2413_p0 }
   0xa   :  { %2421 = shalt.err (!%p2418_p2)
}
   0xb   :  { %s2422_s26 = scalar_lea.vmem %s31_s16, 8192  ;;  %p2427_p4 = scmp.lt.s32.totalorder %s31_s16, %s31_s16 }
   0xc   :  { %p2423_p3 = scmp.ne.s32.totalorder %s31_s16, %s2422_s26  ;;  %p2428_p5 = scmp.lt.s32.totalorder %s2422_s26, %s2422_s26 }
   0xe   :  { %p2429_p6 = por %p2428_p5, %p2427_p4 }
  0x10   :  { %p2430_p7 = pnand %p2429_p6, %p2423_p3 }
  0x12   :  { %2433 = shalt.err (!%p2430_p7)
}
  0x13   :  { %s2532_s27 = smov 512   ;;  %s2533_s28 = smov 32  }
  0x14   :  { %36 = dma.hbm_to_vmem [thread:$0]  %s3002_s1, 8192, %s31_s16, [#allocation8], %s2532_s27, %s2532_s27, %s2533_s28  }
  0x15   :  { %s2434_s7 = scalar_lea.hbm %s3001_s0, 4096 }
  0x16   :  { %p2435_p8 = scmp.ne.s32.totalorder %s3001_s0, %s2434_s7  ;;  %p2438_p9 = scmp.lt.u32.totalorder %s2434_s7, %s3001_s0 }
  0x18   :  { %p2440_p10 = pnand %p2438_p9, %p2435_p8 }
  0x1a   :  { %2443 = shalt.err (!%p2440_p10)
}
  0x1b   :  { %s2444_s12 = scalar_lea.vmem %s2567_s18, 4096  ;;  %p2449_p12 = scmp.lt.s32.totalorder %s2567_s18, %s2567_s18 }
  0x1c   :  { %p2445_p11 = scmp.ne.s32.totalorder %s2567_s18, %s2444_s12  ;;  %p2450_p13 = scmp.lt.s32.totalorder %s2444_s12, %s2444_s12 }
  0x1e   :  { %p2451_p0 = por %p2450_p13, %p2449_p12 }
  0x20   :  { %p2452_p1 = pnand %p2451_p0, %p2445_p11 }
  0x22   :  { %2455 = shalt.err (!%p2452_p1)
}
  0x23   :  { %24 = dma.hbm_to_vmem [thread:$0]  %s3001_s0, 4096, %s2567_s18, [#allocation5], %s2532_s27, %s2532_s27, %s2533_s28  }
  0x24   :  { %s2534_s14 = smov [#allocation9]   ;;  %s2456_s19 = scalar_lea.hbm %s3003_s2, 2048 }
  0x25   :  { %s42_s15 = sshll.u32 %s2534_s14, 4  ;;  %p2457_p2 = scmp.ne.s32.totalorder %s3003_s2, %s2456_s19  ;;  %s43_s15 = int_to_ptr.vmem [resolvable:$true] %s42_s15 }
  0x26   :  { %p2460_p3 = scmp.lt.u32.totalorder %s2456_s19, %s3003_s2 }
  0x28   :  { %p2462_p4 = pnand %p2460_p3, %p2457_p2 }
  0x2a   :  { %2465 = shalt.err (!%p2462_p4)
}
  0x2b   :  { %s2466_s24 = scalar_lea.vmem %s43_s15, 2048  ;;  %p2471_p6 = scmp.lt.s32.totalorder %s43_s15, %s43_s15 }
  0x2c   :  { %p2467_p5 = scmp.ne.s32.totalorder %s43_s15, %s2466_s24  ;;  %p2472_p7 = scmp.lt.s32.totalorder %s2466_s24, %s2466_s24 }
  0x2e   :  { %p2473_p8 = por %p2472_p7, %p2471_p6 }
  0x30   :  { %p2474_p9 = pnand %p2473_p8, %p2467_p5 }
  0x32   :  { %2477 = shalt.err (!%p2474_p9)
}
  0x33   :  { %s2535_s0 = smov 128   ;;  %s2536_s18 = smov 8  }
  0x34   :  { %48 = dma.hbm_to_vmem [thread:$0]  %s3003_s2, 2048, %s43_s15, [#allocation8], %s2535_s0, %s2535_s0, %s2536_s18  }
  0x35   :  { %s2537_s27 = smov [#allocation10]   ;;  %s2478_s5 = scalar_lea.hbm %s3004_s3, 16 }
  0x36   :  { %s55_s28 = sshll.u32 %s2537_s27, 4  ;;  %p2479_p10 = scmp.ne.s32.totalorder %s3004_s3, %s2478_s5  ;;  %s56_s28 = int_to_ptr.vmem [resolvable:$true] %s55_s28 }
  0x37   :  { %p2482_p11 = scmp.lt.u32.totalorder %s2478_s5, %s3004_s3 }
  0x39   :  { %p2484_p12 = pnand %p2482_p11, %p2479_p10 }
  0x3b   :  { %2487 = shalt.err (!%p2484_p12)
}
  0x3c   :  { %s2488_s10 = scalar_lea.vmem %s56_s28, 16  ;;  %s2492_s2 = scalar_lea.vmem %s56_s28, 32 }
  0x3d   :  { %p2489_p13 = scmp.ne.s32.totalorder %s56_s28, %s2488_s10  ;;  %p2493_p0 = scmp.lt.s32.totalorder %s56_s28, %s56_s28 }
  0x3e   :  { %p2494_p1 = scmp.lt.s32.totalorder %s2492_s2, %s2488_s10 }
  0x40   :  { %p2495_p2 = por %p2494_p1, %p2493_p0 }
  0x42   :  { %p2496_p3 = pnand %p2495_p2, %p2489_p13 }
  0x44   :  { %2499 = shalt.err (!%p2496_p3)
}
  0x45   :  { %58 = dma.hbm_to_vmem [thread:$0]  %s3004_s3, 16, %s56_s28, [#allocation11]  }
  0x46   :  { %2522 = dma.done.wait [#allocation5], 4096  }
  0x47   :  { %2523 = vsyncadd [#allocation5], 4294963200 }
  0x48   :  { %2524 = dma.done.wait [#allocation8], 10240  }
  0x49   :  { %2525 = vsyncadd [#allocation8], 4294957056 }
  0x4a   :  { %2526 = dma.done.wait [#allocation11], 16  }
  0x4b   :  { %2527 = vsyncadd [#allocation11], 4294967280  ;;  %v2538_v0 = vmov 0.0   ;;  %v78_v1 = vld [vmem:[#allocation7 + $0x8] sm:$0xff]  ;;  %v77_v3 = vld [vmem:[#allocation7] sm:$0xff]  ;;  %vm2540_vm0 = vmmov 0  }
  0x4c   :  { %211 = vmatprep.mubr.f32.mxu0 %v2538_v0  ;;  %282 = vmatprep.mubr.f32.mxu1 %v2538_v0  ;;  %v82_v2 = vld [vmem:[#allocation7 + $0x28] sm:$0xff]  ;;  %v81_v5 = vld [vmem:[#allocation7 + $0x20] sm:$0xff]  ;;  %v80_v19 = vld [vmem:[#allocation7 + $0x18] sm:$0xff]  ;;  %s2541_s3 = smov [#allocation12]   ;;  %vm1640_vm1 = vcmask 31744  }
  0x4d   :  { %v2624_v4 = vpack.c.bf16 %v82_v2, %v78_v1  ;;  %v86_v6 = vld [vmem:[#allocation7 + $0x48] sm:$0xff]  ;;  %v2626_v8 = vpack.c.bf16 %v81_v5, %v77_v3  ;;  %v85_v10 = vld [vmem:[#allocation7 + $0x40] sm:$0xff]  ;;  %v84_v20 = vld [vmem:[#allocation7 + $0x38] sm:$0xff]  ;;  %s1648_s1 = sshll.u32 %s2541_s3, 4  ;;  %s1649_s1 = int_to_ptr.vmem [resolvable:$true] %s1648_s1 }
  0x4e   :  { %v90_v7 = vld [vmem:[#allocation7 + $0x68] sm:$0xff]  ;;  %v89_v11 = vld [vmem:[#allocation7 + $0x60] sm:$0xff]  ;;  %v2637_v22 = vpack.c.bf16 %v84_v20, %v80_v19  ;;  %v79_v23 = vld [vmem:[#allocation7 + $0x10] sm:$0xff]  ;;  %s2500_s13 = scalar_lea.vmem %s1649_s1, 128  ;;  %p2505_p5 = scmp.lt.s32.totalorder %s1649_s1, %s1649_s1 }
  0x4f   :  { %v2628_v9 = vpack.c.bf16 %v90_v7, %v86_v6  ;;  %v94_v12 = vld [vmem:[#allocation7 + $0x88] sm:$0xff]  ;;  %1737 = vmatprep.subr.bf16.mxu0 %v2624_v4  ;;  %v2632_v14 = vpack.c.bf16 %v89_v11, %v85_v10  ;;  %v93_v15 = vld [vmem:[#allocation7 + $0x80] sm:$0xff]  ;;  %v83_v24 = vld [vmem:[#allocation7 + $0x30] sm:$0xff]  ;;  %p2501_p4 = scmp.ne.s32.totalorder %s1649_s1, %s2500_s13  ;;  %p2506_p6 = scmp.lt.s32.totalorder %s2500_s13, %s2500_s13 }
  0x50   :  { %v98_v13 = vld [vmem:[#allocation7 + $0xa8] sm:$0xff]  ;;  %1739 = vmatpush1.bf16.msra.mxu0 %v2626_v8  ;;  %v97_v16 = vld [vmem:[#allocation7 + $0xa0] sm:$0xff]  ;;  %v2639_v25 = vpack.c.bf16 %v83_v24, %v79_v23  ;;  %1769 = vmatprep.subr.bf16.mxu1 %v2637_v22  ;;  %v88_v27 = vld [vmem:[#allocation7 + $0x58] sm:$0xff] }
  0x51   :  { %1741 = vmatprep.subr.bf16.mxu0 %v2628_v9  ;;  %v2635_v17 = vpack.c.bf16 %v98_v13, %v94_v12  ;;  %v102_v18 = vld [vmem:[#allocation7 + $0xc8] sm:$0xff]  ;;  %v2642_v26 = vpack.c.bf16 %v97_v16, %v93_v15  ;;  %v92_v28 = vld [vmem:[#allocation7 + $0x78] sm:$0xff]  ;;  %v87_v29 = vld [vmem:[#allocation7 + $0x50] sm:$0xff]  ;;  %p2507_p7 = por %p2506_p6, %p2505_p5 }
  0x52   :  { %v106_v21 = vld [vmem:[#allocation7 + $0xe8] sm:$0xff]  ;;  %v101_v31 = vld [vmem:[#allocation7 + $0xc0] sm:$0xff]  ;;  %1771 = vmatpush1.bf16.msra.mxu1 %v2639_v25  ;;  %v2649_v33 = vpack.c.bf16 %v92_v28, %v88_v27  ;;  %v91_v34 = vld [vmem:[#allocation7 + $0x70] sm:$0xff] }
  0x53   :  { %v2646_v30 = vpack.c.bf16 %v106_v21, %v102_v18  ;;  %v105_v32 = vld [vmem:[#allocation7 + $0xe0] sm:$0xff]  ;;  %v110_v35 = vld [vmem:[#allocation7 + $0x108] sm:$0xff]  ;;  %v2651_v37 = vpack.c.bf16 %v91_v34, %v87_v29  ;;  %v96_v38 = vld [vmem:[#allocation7 + $0x98] sm:$0xff]  ;;  %p2508_p8 = pnand %p2507_p7, %p2501_p4 }
  0x54   :  { %1743 = vmatpush1.bf16.msra.mxu0 %v2632_v14  ;;  %v114_v36 = vld [vmem:[#allocation7 + $0x128] sm:$0xff]  ;;  %1773 = vmatprep.subr.bf16.mxu1 %v2649_v33  ;;  %v100_v39 = vld [vmem:[#allocation7 + $0xb8] sm:$0xff]  ;;  %v95_v40 = vld [vmem:[#allocation7 + $0x90] sm:$0xff]  ;;  %v2655_v42 = vpack.c.bf16 %v105_v32, %v101_v31 }
  0x55   :  { %1745 = vmatprep.subr.bf16.mxu0 %v2635_v17  ;;  %v99_v41 = vld [vmem:[#allocation7 + $0xb0] sm:$0xff]  ;;  %v109_v43 = vld [vmem:[#allocation7 + $0x100] sm:$0xff]  ;;  %v2657_v45 = vpack.c.bf16 %v100_v39, %v96_v38  ;;  %v2660_v46 = vpack.c.bf16 %v114_v36, %v110_v35  ;;  %v118_v47 = vld [vmem:[#allocation7 + $0x148] sm:$0xff] }
  0x56   :  { %v113_v44 = vld [vmem:[#allocation7 + $0x120] sm:$0xff]  ;;  %1775 = vmatpush1.bf16.msra.mxu1 %v2651_v37  ;;  %v2663_v48 = vpack.c.bf16 %v99_v41, %v95_v40  ;;  %v104_v49 = vld [vmem:[#allocation7 + $0xd8] sm:$0xff]  ;;  %v122_v51 = vld [vmem:[#allocation7 + $0x168] sm:$0xff] }
  0x57   :  { %v108_v50 = vld [vmem:[#allocation7 + $0xf8] sm:$0xff]  ;;  %1777 = vmatprep.subr.bf16.mxu1 %v2657_v45  ;;  %v103_v53 = vld [vmem:[#allocation7 + $0xd0] sm:$0xff]  ;;  %v2669_v55 = vpack.c.bf16 %v113_v44, %v109_v43  ;;  %v2672_v58 = vpack.c.bf16 %v122_v51, %v118_v47  ;;  %v117_v59 = vld [vmem:[#allocation7 + $0x140] sm:$0xff] }
  0x58   :  { %1747 = vmatpush1.bf16.msra.mxu0 %v2642_v26  ;;  %v2666_v52 = vpack.c.bf16 %v108_v50, %v104_v49  ;;  %v107_v54 = vld [vmem:[#allocation7 + $0xf0] sm:$0xff]  ;;  %v112_v56 = vld [vmem:[#allocation7 + $0x118] sm:$0xff]  ;;  %v121_v60 = vld [vmem:[#allocation7 + $0x160] sm:$0xff] }
  0x59   :  { %1749 = vmatprep.subr.bf16.mxu0 %v2646_v30  ;;  %v116_v57 = vld [vmem:[#allocation7 + $0x138] sm:$0xff]  ;;  %v126_v61 = vld [vmem:[#allocation7 + $0x188] sm:$0xff]  ;;  %v2675_v62 = vpack.c.bf16 %v107_v54, %v103_v53  ;;  %v111_v2 = vld [vmem:[#allocation7 + $0x110] sm:$0xff]  ;;  %v2681_v7 = vpack.c.bf16 %v121_v60, %v117_v59 }
  0x5a   :  { %1779 = vmatpush1.bf16.msra.mxu1 %v2663_v48  ;;  %v130_v63 = vld [vmem:[#allocation7 + $0x1a8] sm:$0xff]  ;;  %v2678_v1 = vpack.c.bf16 %v116_v57, %v112_v56  ;;  %v115_v3 = vld [vmem:[#allocation7 + $0x130] sm:$0xff]  ;;  %v120_v5 = vld [vmem:[#allocation7 + $0x158] sm:$0xff] }
  0x5b   :  { %1781 = vmatprep.subr.bf16.mxu1 %v2666_v52  ;;  %v124_v6 = vld [vmem:[#allocation7 + $0x178] sm:$0xff]  ;;  %v2684_v10 = vpack.c.bf16 %v130_v63, %v126_v61  ;;  %v125_v11 = vld [vmem:[#allocation7 + $0x180] sm:$0xff]  ;;  %v134_v13 = vld [vmem:[#allocation7 + $0x1c8] sm:$0xff]  ;;  %v2687_v15 = vpack.c.bf16 %v115_v3, %v111_v2 }
  0x5c   :  { %1751 = vmatpush1.bf16.msra.mxu0 %v2655_v42  ;;  %v129_v12 = vld [vmem:[#allocation7 + $0x1a0] sm:$0xff]  ;;  %v138_v16 = vld [vmem:[#allocation7 + $0x1e8] sm:$0xff]  ;;  %v2690_v18 = vpack.c.bf16 %v124_v6, %v120_v5  ;;  %v119_v19 = vld [vmem:[#allocation7 + $0x150] sm:$0xff] }
  0x5d   :  { %1753 = vmatprep.subr.bf16.mxu0 %v2660_v46  ;;  %v123_v20 = vld [vmem:[#allocation7 + $0x170] sm:$0xff]  ;;  %v128_v21 = vld [vmem:[#allocation7 + $0x198] sm:$0xff]  ;;  %v2693_v24 = vpack.c.bf16 %v129_v12, %v125_v11  ;;  %v2696_v27 = vpack.c.bf16 %v138_v16, %v134_v13  ;;  %v133_v28 = vld [vmem:[#allocation7 + $0x1c0] sm:$0xff] }
  0x5e   :  { %1783 = vmatpush1.bf16.msra.mxu1 %v2675_v62  ;;  %v132_v23 = vld [vmem:[#allocation7 + $0x1b8] sm:$0xff]  ;;  %v137_v29 = vld [vmem:[#allocation7 + $0x1e0] sm:$0xff]  ;;  %v2699_v31 = vpack.c.bf16 %v123_v20, %v119_v19  ;;  %v127_v34 = vld [vmem:[#allocation7 + $0x190] sm:$0xff] }
  0x5f   :  { %1785 = vmatprep.subr.bf16.mxu1 %v2678_v1  ;;  %v2702_v32 = vpack.c.bf16 %v132_v23, %v128_v21  ;;  %v131_v35 = vld [vmem:[#allocation7 + $0x1b0] sm:$0xff]  ;;  %v136_v36 = vld [vmem:[#allocation7 + $0x1d8] sm:$0xff]  ;;  %v2705_v39 = vpack.c.bf16 %v137_v29, %v133_v28  ;;  %v143_v49 = vld [vmem:[#allocation4] sm:$0xff] }
  0x60   :  { %1755 = vmatpush1.bf16.msra.mxu0 %v2669_v55  ;;  %v140_v38 = vld [vmem:[#allocation7 + $0x1f8] sm:$0xff]  ;;  %v2709_v40 = vpack.c.bf16 %v131_v35, %v127_v34  ;;  %v135_v43 = vld [vmem:[#allocation7 + $0x1d0] sm:$0xff]  ;;  %v144_v50 = vld [vmem:[#allocation4 + $0x8] sm:$0xff] }
  0x61   :  { %1757 = vmatprep.subr.bf16.mxu0 %v2672_v58  ;;  %v2712_v41 = vpack.c.bf16 %v140_v38, %v136_v36  ;;  %v139_v44 = vld [vmem:[#allocation7 + $0x1f0] sm:$0xff]  ;;  %v146_v60 = vld [vmem:[#allocation4 + $0x18] sm:$0xff] }
  0x62   :  { %1787 = vmatpush1.bf16.msra.mxu1 %v2687_v15  ;;  %v2716_v47 = vpack.c.bf16 %v139_v44, %v135_v43  ;;  %v145_v3 = vld [vmem:[#allocation4 + $0x10] sm:$0xff]  ;;  %v318_v44 = vld [vmem:[#allocation4 + $0x20] sm:$0xff] }
  0x63   :  { %1789 = vmatprep.subr.bf16.mxu1 %v2690_v18 }
  0x64   :  { %1759 = vmatpush1.bf16.msra.mxu0 %v2681_v7 }
  0x65   :  { %1761 = vmatprep.subr.bf16.mxu0 %v2684_v10 }
  0x66   :  { %1791 = vmatpush1.bf16.msra.mxu1 %v2699_v31 }
  0x67   :  { %1793 = vmatprep.subr.bf16.mxu1 %v2702_v32 }
  0x68   :  { %1763 = vmatpush1.bf16.msra.mxu0 %v2693_v24 }
  0x69   :  { %1765 = vmatprep.subr.bf16.mxu0 %v2696_v27 }
  0x6a   :  { %1795 = vmatpush1.bf16.msra.mxu1 %v2709_v40 }
  0x6b   :  { %1797 = vmatprep.subr.bf16.mxu1 %v2712_v41 }
  0x6c   :  { %1767 = vmatpush1.bf16.msra.mxu0 %v2705_v39 }
  0x6d   :  { %1801 = vmatprep.subr.bf16.mxu0 %v2624_v4 }
  0x6e   :  { %1799 = vmatpush1.bf16.msra.mxu1 %v2716_v47 }
  0x6f   :  { %212 = vmatmul.mubr.f32.vlgmr.msra.gmra.mrb[0].mxu0 %v2538_v0  ;;  %1833 = vmatprep.subr.bf16.mxu1 %v2637_v22 }
  0x70   :  { %1803 = vmatpush1.bf16.msra.mxu0 %v2626_v8  ;;  %386 = vmatprep.mubr.f32.mxu0 %v2538_v0 }
  0x71   :  { %1805 = vmatprep.subr.bf16.mxu0 %v2628_v9  ;;  %283 = vmatmul.mubr.f32.vlgmr.msra.gmra.mrb[0].mxu1 %v2538_v0 }
  0x72   :  { %1835 = vmatpush1.bf16.msra.mxu1 %v2639_v25  ;;  %457 = vmatprep.mubr.f32.mxu1 %v2538_v0 }
  0x73   :  { %1837 = vmatprep.subr.bf16.mxu1 %v2649_v33 }
  0x74   :  { %1807 = vmatpush1.bf16.msra.mxu0 %v2632_v14 }
  0x75   :  { %1809 = vmatprep.subr.bf16.mxu0 %v2635_v17 }
  0x76   :  { %1839 = vmatpush1.bf16.msra.mxu1 %v2651_v37 }
  0x77   :  { %1841 = vmatprep.subr.bf16.mxu1 %v2657_v45 }
  0x78   :  { %1811 = vmatpush1.bf16.msra.mxu0 %v2642_v26 }
  0x79   :  { %1813 = vmatprep.subr.bf16.mxu0 %v2646_v30 }
  0x7a   :  { %1843 = vmatpush1.bf16.msra.mxu1 %v2663_v48 }
  0x7b   :  { %1845 = vmatprep.subr.bf16.mxu1 %v2666_v52 }
  0x7c   :  { %1815 = vmatpush1.bf16.msra.mxu0 %v2655_v42 }
  0x7d   :  { %1817 = vmatprep.subr.bf16.mxu0 %v2660_v46 }
  0x7e   :  { %1847 = vmatpush1.bf16.msra.mxu1 %v2675_v62 }
  0x7f   :  { %1849 = vmatprep.subr.bf16.mxu1 %v2678_v1 }
  0x80   :  { %1819 = vmatpush1.bf16.msra.mxu0 %v2669_v55 }
  0x81   :  { %1821 = vmatprep.subr.bf16.mxu0 %v2672_v58 }
  0x82   :  { %1851 = vmatpush1.bf16.msra.mxu1 %v2687_v15 }
  0x83   :  { %1853 = vmatprep.subr.bf16.mxu1 %v2690_v18 }
  0x84   :  { %1823 = vmatpush1.bf16.msra.mxu0 %v2681_v7 }
  0x85   :  { %1825 = vmatprep.subr.bf16.mxu0 %v2684_v10 }
  0x86   :  { %1855 = vmatpush1.bf16.msra.mxu1 %v2699_v31 }
  0x87   :  { %1857 = vmatprep.subr.bf16.mxu1 %v2702_v32 }
  0x88   :  { %1827 = vmatpush1.bf16.msra.mxu0 %v2693_v24 }
  0x89   :  { %1829 = vmatprep.subr.bf16.mxu0 %v2696_v27 }
  0x8a   :  { %1859 = vmatpush1.bf16.msra.mxu1 %v2709_v40 }
  0x8b   :  { %1861 = vmatprep.subr.bf16.mxu1 %v2712_v41 }
  0x8c   :  { %1831 = vmatpush1.bf16.msra.mxu0 %v2705_v39 }
  0x8d   :  { %1865 = vmatprep.subr.bf16.mxu0 %v2624_v4 }
  0x8e   :  { %1863 = vmatpush1.bf16.msra.mxu1 %v2716_v47 }
  0x8f   :  { %1897 = vmatprep.subr.bf16.mxu1 %v2637_v22 }
 0x142   :  { %v213_v51 = vpop.f32.mrb[0].mxu0 }
 0x143   :  { %v289_v53 = vadd.f32 %v213_v51, %v143_v49  ;;  %v215_v54 = vpop.f32.mrb[1].mxu0  ;;  %v319_v49 = vld [vmem:[#allocation4 + $0x28] sm:$0xff] }
 0x144   :  { %v290_v56 = vadd.f32 %v215_v54, %v144_v50  ;;  %v284_v61 = vpop.f32.mrb[0].mxu1 }
 0x145   :  { %v1659_v57 = vmul.f32 -1.442695, %v289_v53  ;;  %v286_v63 = vpop.f32.mrb[1].mxu1  ;;  %v291_v6 = vadd.f32 %v284_v61, %v145_v3  ;;  %v321_v61 = vld [vmem:[#allocation4 + $0x38] sm:$0xff] }
 0x146   :  { %v1660_v59 = vmul.f32 -1.442695, %v290_v56  ;;  %v292_v2 = vadd.f32 %v286_v63, %v146_v60 }
 0x147   :  { %2284 = vpow2.f32 %v1659_v57 }
 0x148   :  { %2286 = vpow2.f32 %v1660_v59  ;;  %v1661_v5 = vmul.f32 -1.442695, %v292_v2  ;;  %v320_v2 = vld [vmem:[#allocation4 + $0x30] sm:$0xff] }
 0x14a   :  { %2288 = vpow2.f32 %v1661_v5 }
 0x14b   :  { %2290 = vtanh.f32 %v291_v6 }
 0x151   :  { %v2285_v11 = vpop.eup %2284 }
 0x152   :  { %v2287_v12 = vpop.eup %2286  ;;  %v296_v13 = vadd.f32 1.0, %v2285_v11 }
 0x153   :  { %v302_v16 = vadd.f32 1.0, %v2287_v12 }
 0x154   :  { %2292 = vrcp.f32 %v296_v13  ;;  %v2289_v19 = vpop.eup %2288 }
 0x155   :  { %2294 = vrcp.f32 %v302_v16  ;;  %v2291_v20 = vpop.eup %2290  ;;  %v309_v23 = vadd.f32 1.0, %v2289_v19 }
 0x157   :  { %2296 = vrcp.f32 %v309_v23 }
 0x15e   :  { %v2293_v21 = vpop.eup %2292 }
 0x15f   :  { %v2295_v28 = vpop.eup %2294  ;;  %v313_v29 = vmul.f32 %v2293_v21, %v2291_v20 }
 0x160   :  { %v312_v34 = vmul.f32 0.0, %v2295_v28 }
 0x161   :  { %v2297_v36 = vpop.eup %2296 }
 0x162   :  { %v2758_v35 = vadd.f32 %v313_v29, %v312_v34 }
 0x164   :  { %2298 = vtanh.f32 %v2758_v35 }
 0x16e   :  { %v2299_v38 = vpop.eup %2298 }
 0x16f   :  { %v316_v43 = vmul.f32 %v2299_v38, %v2297_v36 }
 0x171   :  { %387 = vmatmul.mubr.f32.vlgmr.msra.gmra.mrb[2].mxu0 %v316_v43  ;;  %458 = vmatmul.mubr.f32.vlgmr.msra.gmra.mrb[2].mxu1 %v316_v43 }
 0x172   :  { %1867 = vmatpush1.bf16.msra.mxu0 %v2626_v8  ;;  %1899 = vmatpush1.bf16.msra.mxu1 %v2639_v25 }
 0x173   :  { %1869 = vmatprep.subr.bf16.mxu0 %v2628_v9  ;;  %1901 = vmatprep.subr.bf16.mxu1 %v2649_v33 }
 0x174   :  { %561 = vmatprep.mubr.f32.mxu0 %v2538_v0  ;;  %632 = vmatprep.mubr.f32.mxu1 %v2538_v0 }
 0x176   :  { %1871 = vmatpush1.bf16.msra.mxu0 %v2632_v14  ;;  %1903 = vmatpush1.bf16.msra.mxu1 %v2651_v37 }
 0x177   :  { %1873 = vmatprep.subr.bf16.mxu0 %v2635_v17  ;;  %1905 = vmatprep.subr.bf16.mxu1 %v2657_v45 }
 0x17a   :  { %1875 = vmatpush1.bf16.msra.mxu0 %v2642_v26  ;;  %1907 = vmatpush1.bf16.msra.mxu1 %v2663_v48 }
 0x17b   :  { %1877 = vmatprep.subr.bf16.mxu0 %v2646_v30  ;;  %1909 = vmatprep.subr.bf16.mxu1 %v2666_v52 }
 0x17e   :  { %1879 = vmatpush1.bf16.msra.mxu0 %v2655_v42  ;;  %1911 = vmatpush1.bf16.msra.mxu1 %v2675_v62 }
 0x17f   :  { %1881 = vmatprep.subr.bf16.mxu0 %v2660_v46  ;;  %1913 = vmatprep.subr.bf16.mxu1 %v2678_v1 }
 0x182   :  { %1883 = vmatpush1.bf16.msra.mxu0 %v2669_v55  ;;  %1915 = vmatpush1.bf16.msra.mxu1 %v2687_v15 }
 0x183   :  { %1885 = vmatprep.subr.bf16.mxu0 %v2672_v58  ;;  %1917 = vmatprep.subr.bf16.mxu1 %v2690_v18 }
 0x186   :  { %1887 = vmatpush1.bf16.msra.mxu0 %v2681_v7  ;;  %1919 = vmatpush1.bf16.msra.mxu1 %v2699_v31 }
 0x187   :  { %1889 = vmatprep.subr.bf16.mxu0 %v2684_v10  ;;  %1921 = vmatprep.subr.bf16.mxu1 %v2702_v32 }
 0x18a   :  { %1891 = vmatpush1.bf16.msra.mxu0 %v2693_v24  ;;  %1923 = vmatpush1.bf16.msra.mxu1 %v2709_v40 }
 0x18b   :  { %1893 = vmatprep.subr.bf16.mxu0 %v2696_v27  ;;  %1925 = vmatprep.subr.bf16.mxu1 %v2712_v41 }
 0x18e   :  { %1895 = vmatpush1.bf16.msra.mxu0 %v2705_v39  ;;  %1927 = vmatpush1.bf16.msra.mxu1 %v2716_v47 }
 0x18f   :  { %1929 = vmatprep.subr.bf16.mxu0 %v2624_v4  ;;  %1961 = vmatprep.subr.bf16.mxu1 %v2637_v22 }
 0x244   :  { %v388_v50 = vpop.f32.mrb[2].mxu0  ;;  %v459_v51 = vpop.f32.mrb[2].mxu1 }
 0x245   :  { %v464_v53 = vadd.f32 %v388_v50, %v318_v44  ;;  %v390_v54 = vpop.f32.mrb[3].mxu0  ;;  %v461_v56 = vpop.f32.mrb[3].mxu1  ;;  %v466_v5 = vadd.f32 %v459_v51, %v320_v2  ;;  %v494_v44 = vld [vmem:[#allocation4 + $0x48] sm:$0xff] }
 0x246   :  { %v465_v57 = vadd.f32 %v390_v54, %v319_v49  ;;  %v467_v63 = vadd.f32 %v461_v56, %v321_v61 }
 0x247   :  { %v1662_v59 = vmul.f32 -1.442695, %v464_v53 }
 0x248   :  { %v1663_v60 = vmul.f32 -1.442695, %v465_v57  ;;  %v1664_v3 = vmul.f32 -1.442695, %v467_v63  ;;  %v495_v63 = vld [vmem:[#allocation4 + $0x50] sm:$0xff] }
 0x249   :  { %2300 = vpow2.f32 %v1662_v59 }
 0x24a   :  { %2302 = vpow2.f32 %v1663_v60  ;;  %v496_v60 = vld [vmem:[#allocation4 + $0x58] sm:$0xff] }
 0x24b   :  { %2304 = vpow2.f32 %v1664_v3 }
 0x24c   :  { %2306 = vtanh.f32 %v466_v5 }
 0x253   :  { %v2301_v6 = vpop.eup %2300 }
 0x254   :  { %v2303_v11 = vpop.eup %2302  ;;  %v471_v12 = vadd.f32 1.0, %v2301_v6 }
 0x255   :  { %v477_v13 = vadd.f32 1.0, %v2303_v11  ;;  %v2305_v16 = vpop.eup %2304 }
 0x256   :  { %2308 = vrcp.f32 %v471_v12  ;;  %v2307_v19 = vpop.eup %2306  ;;  %v484_v28 = vadd.f32 1.0, %v2305_v16 }
 0x257   :  { %2310 = vrcp.f32 %v477_v13 }
 0x258   :  { %2312 = vrcp.f32 %v484_v28 }
 0x260   :  { %v2309_v20 = vpop.eup %2308 }
 0x261   :  { %v2311_v21 = vpop.eup %2310  ;;  %v488_v23 = vmul.f32 %v2309_v20, %v2307_v19 }
 0x262   :  { %v487_v29 = vmul.f32 %v2311_v21, %v2758_v35  ;;  %v2313_v36 = vpop.eup %2312  ;;  %v493_v35 = vld [vmem:[#allocation4 + $0x40] sm:$0xff] }
 0x264   :  { %v2796_v34 = vadd.f32 %v488_v23, %v487_v29 }
 0x266   :  { %2314 = vtanh.f32 %v2796_v34 }
 0x270   :  { %v2315_v38 = vpop.eup %2314 }
 0x271   :  { %v491_v43 = vmul.f32 %v2315_v38, %v2313_v36 }
 0x273   :  { %562 = vmatmul.mubr.f32.vlgmr.msra.gmra.mrb[4].mxu0 %v491_v43  ;;  %633 = vmatmul.mubr.f32.vlgmr.msra.gmra.mrb[4].mxu1 %v491_v43 }
 0x274   :  { %1931 = vmatpush1.bf16.msra.mxu0 %v2626_v8  ;;  %1963 = vmatpush1.bf16.msra.mxu1 %v2639_v25 }
 0x275   :  { %1933 = vmatprep.subr.bf16.mxu0 %v2628_v9  ;;  %1965 = vmatprep.subr.bf16.mxu1 %v2649_v33 }
 0x276   :  { %736 = vmatprep.mubr.f32.mxu0 %v2538_v0  ;;  %807 = vmatprep.mubr.f32.mxu1 %v2538_v0 }
 0x278   :  { %1935 = vmatpush1.bf16.msra.mxu0 %v2632_v14  ;;  %1967 = vmatpush1.bf16.msra.mxu1 %v2651_v37 }
 0x279   :  { %1937 = vmatprep.subr.bf16.mxu0 %v2635_v17  ;;  %1969 = vmatprep.subr.bf16.mxu1 %v2657_v45 }
 0x27c   :  { %1939 = vmatpush1.bf16.msra.mxu0 %v2642_v26  ;;  %1971 = vmatpush1.bf16.msra.mxu1 %v2663_v48 }
 0x27d   :  { %1941 = vmatprep.subr.bf16.mxu0 %v2646_v30  ;;  %1973 = vmatprep.subr.bf16.mxu1 %v2666_v52 }
 0x280   :  { %1943 = vmatpush1.bf16.msra.mxu0 %v2655_v42  ;;  %1975 = vmatpush1.bf16.msra.mxu1 %v2675_v62 }
 0x281   :  { %1945 = vmatprep.subr.bf16.mxu0 %v2660_v46  ;;  %1977 = vmatprep.subr.bf16.mxu1 %v2678_v1 }
 0x284   :  { %1947 = vmatpush1.bf16.msra.mxu0 %v2669_v55  ;;  %1979 = vmatpush1.bf16.msra.mxu1 %v2687_v15 }
 0x285   :  { %1949 = vmatprep.subr.bf16.mxu0 %v2672_v58  ;;  %1981 = vmatprep.subr.bf16.mxu1 %v2690_v18 }
 0x288   :  { %1951 = vmatpush1.bf16.msra.mxu0 %v2681_v7  ;;  %1983 = vmatpush1.bf16.msra.mxu1 %v2699_v31 }
 0x289   :  { %1953 = vmatprep.subr.bf16.mxu0 %v2684_v10  ;;  %1985 = vmatprep.subr.bf16.mxu1 %v2702_v32 }
 0x28c   :  { %1955 = vmatpush1.bf16.msra.mxu0 %v2693_v24  ;;  %1987 = vmatpush1.bf16.msra.mxu1 %v2709_v40 }
 0x28d   :  { %1957 = vmatprep.subr.bf16.mxu0 %v2696_v27  ;;  %1989 = vmatprep.subr.bf16.mxu1 %v2712_v41 }
 0x290   :  { %1959 = vmatpush1.bf16.msra.mxu0 %v2705_v39  ;;  %1991 = vmatpush1.bf16.msra.mxu1 %v2716_v47 }
 0x291   :  { %1993 = vmatprep.subr.bf16.mxu0 %v2624_v4  ;;  %2025 = vmatprep.subr.bf16.mxu1 %v2637_v22 }
 0x346   :  { %v563_v49 = vpop.f32.mrb[4].mxu0  ;;  %v634_v50 = vpop.f32.mrb[4].mxu1 }
 0x347   :  { %v639_v51 = vadd.f32 %v563_v49, %v493_v35  ;;  %v565_v53 = vpop.f32.mrb[5].mxu0  ;;  %v636_v54 = vpop.f32.mrb[5].mxu1  ;;  %v641_v3 = vadd.f32 %v634_v50, %v495_v63  ;;  %v669_v35 = vld [vmem:[#allocation4 + $0x68] sm:$0xff] }
 0x348   :  { %v640_v56 = vadd.f32 %v565_v53, %v494_v44  ;;  %v642_v61 = vadd.f32 %v636_v54, %v496_v60 }
 0x349   :  { %v1665_v57 = vmul.f32 -1.442695, %v639_v51 }
 0x34a   :  { %v1666_v59 = vmul.f32 -1.442695, %v640_v56  ;;  %v1667_v2 = vmul.f32 -1.442695, %v642_v61  ;;  %v670_v61 = vld [vmem:[#allocation4 + $0x70] sm:$0xff] }
 0x34b   :  { %2316 = vpow2.f32 %v1665_v57 }
 0x34c   :  { %2318 = vpow2.f32 %v1666_v59  ;;  %v671_v59 = vld [vmem:[#allocation4 + $0x78] sm:$0xff] }
 0x34d   :  { %2320 = vpow2.f32 %v1667_v2 }
 0x34e   :  { %2322 = vtanh.f32 %v641_v3 }
 0x355   :  { %v2317_v5 = vpop.eup %2316 }
 0x356   :  { %v2319_v6 = vpop.eup %2318  ;;  %v646_v11 = vadd.f32 1.0, %v2317_v5 }
 0x357   :  { %v652_v12 = vadd.f32 1.0, %v2319_v6  ;;  %v2321_v13 = vpop.eup %2320 }
 0x358   :  { %2324 = vrcp.f32 %v646_v11  ;;  %v2323_v16 = vpop.eup %2322  ;;  %v659_v23 = vadd.f32 1.0, %v2321_v13 }
 0x359   :  { %2326 = vrcp.f32 %v652_v12 }
 0x35a   :  { %2328 = vrcp.f32 %v659_v23 }
 0x362   :  { %v2325_v19 = vpop.eup %2324 }
 0x363   :  { %v2327_v20 = vpop.eup %2326  ;;  %v663_v21 = vmul.f32 %v2325_v19, %v2323_v16 }
 0x364   :  { %v662_v28 = vmul.f32 %v2327_v20, %v2796_v34  ;;  %v2329_v36 = vpop.eup %2328  ;;  %v668_v34 = vld [vmem:[#allocation4 + $0x60] sm:$0xff] }
 0x366   :  { %v2834_v29 = vadd.f32 %v663_v21, %v662_v28 }
 0x368   :  { %2330 = vtanh.f32 %v2834_v29 }
 0x372   :  { %v2331_v38 = vpop.eup %2330 }
 0x373   :  { %v666_v43 = vmul.f32 %v2331_v38, %v2329_v36 }
 0x375   :  { %737 = vmatmul.mubr.f32.vlgmr.msra.gmra.mrb[6].mxu0 %v666_v43  ;;  %808 = vmatmul.mubr.f32.vlgmr.msra.gmra.mrb[6].mxu1 %v666_v43 }
 0x376   :  { %1995 = vmatpush1.bf16.msra.mxu0 %v2626_v8  ;;  %2027 = vmatpush1.bf16.msra.mxu1 %v2639_v25 }
 0x377   :  { %1997 = vmatprep.subr.bf16.mxu0 %v2628_v9  ;;  %2029 = vmatprep.subr.bf16.mxu1 %v2649_v33 }
 0x378   :  { %911 = vmatprep.mubr.f32.mxu0 %v2538_v0  ;;  %982 = vmatprep.mubr.f32.mxu1 %v2538_v0 }
 0x37a   :  { %1999 = vmatpush1.bf16.msra.mxu0 %v2632_v14  ;;  %2031 = vmatpush1.bf16.msra.mxu1 %v2651_v37 }
 0x37b   :  { %2001 = vmatprep.subr.bf16.mxu0 %v2635_v17  ;;  %2033 = vmatprep.subr.bf16.mxu1 %v2657_v45 }
 0x37e   :  { %2003 = vmatpush1.bf16.msra.mxu0 %v2642_v26  ;;  %2035 = vmatpush1.bf16.msra.mxu1 %v2663_v48 }
 0x37f   :  { %2005 = vmatprep.subr.bf16.mxu0 %v2646_v30  ;;  %2037 = vmatprep.subr.bf16.mxu1 %v2666_v52 }
 0x382   :  { %2007 = vmatpush1.bf16.msra.mxu0 %v2655_v42  ;;  %2039 = vmatpush1.bf16.msra.mxu1 %v2675_v62 }
 0x383   :  { %2009 = vmatprep.subr.bf16.mxu0 %v2660_v46  ;;  %2041 = vmatprep.subr.bf16.mxu1 %v2678_v1 }
 0x386   :  { %2011 = vmatpush1.bf16.msra.mxu0 %v2669_v55  ;;  %2043 = vmatpush1.bf16.msra.mxu1 %v2687_v15 }
 0x387   :  { %2013 = vmatprep.subr.bf16.mxu0 %v2672_v58  ;;  %2045 = vmatprep.subr.bf16.mxu1 %v2690_v18 }
 0x38a   :  { %2015 = vmatpush1.bf16.msra.mxu0 %v2681_v7  ;;  %2047 = vmatpush1.bf16.msra.mxu1 %v2699_v31 }
 0x38b   :  { %2017 = vmatprep.subr.bf16.mxu0 %v2684_v10  ;;  %2049 = vmatprep.subr.bf16.mxu1 %v2702_v32 }
 0x38e   :  { %2019 = vmatpush1.bf16.msra.mxu0 %v2693_v24  ;;  %2051 = vmatpush1.bf16.msra.mxu1 %v2709_v40 }
 0x38f   :  { %2021 = vmatprep.subr.bf16.mxu0 %v2696_v27  ;;  %2053 = vmatprep.subr.bf16.mxu1 %v2712_v41 }
 0x392   :  { %2023 = vmatpush1.bf16.msra.mxu0 %v2705_v39  ;;  %2055 = vmatpush1.bf16.msra.mxu1 %v2716_v47 }
 0x393   :  { %2057 = vmatprep.subr.bf16.mxu0 %v2624_v4  ;;  %2089 = vmatprep.subr.bf16.mxu1 %v2637_v22 }
 0x448   :  { %v738_v44 = vpop.f32.mrb[6].mxu0  ;;  %v809_v49 = vpop.f32.mrb[6].mxu1 }
 0x449   :  { %v814_v50 = vadd.f32 %v738_v44, %v668_v34  ;;  %v740_v51 = vpop.f32.mrb[7].mxu0  ;;  %v811_v53 = vpop.f32.mrb[7].mxu1  ;;  %v816_v2 = vadd.f32 %v809_v49, %v670_v61  ;;  %v844_v34 = vld [vmem:[#allocation4 + $0x88] sm:$0xff] }
 0x44a   :  { %v815_v54 = vadd.f32 %v740_v51, %v669_v35  ;;  %v817_v60 = vadd.f32 %v811_v53, %v671_v59 }
 0x44b   :  { %v1668_v56 = vmul.f32 -1.442695, %v814_v50 }
 0x44c   :  { %v1669_v57 = vmul.f32 -1.442695, %v815_v54  ;;  %v1670_v63 = vmul.f32 -1.442695, %v817_v60  ;;  %v845_v60 = vld [vmem:[#allocation4 + $0x90] sm:$0xff] }
 0x44d   :  { %2332 = vpow2.f32 %v1668_v56 }
 0x44e   :  { %2334 = vpow2.f32 %v1669_v57  ;;  %v846_v57 = vld [vmem:[#allocation4 + $0x98] sm:$0xff] }
 0x44f   :  { %2336 = vpow2.f32 %v1670_v63 }
 0x450   :  { %2338 = vtanh.f32 %v816_v2 }
 0x457   :  { %v2333_v3 = vpop.eup %2332 }
 0x458   :  { %v2335_v5 = vpop.eup %2334  ;;  %v821_v6 = vadd.f32 1.0, %v2333_v3 }
 0x459   :  { %v827_v11 = vadd.f32 1.0, %v2335_v5  ;;  %v2337_v12 = vpop.eup %2336 }
 0x45a   :  { %2340 = vrcp.f32 %v821_v6  ;;  %v2339_v13 = vpop.eup %2338  ;;  %v834_v21 = vadd.f32 1.0, %v2337_v12 }
 0x45b   :  { %2342 = vrcp.f32 %v827_v11 }
 0x45c   :  { %2344 = vrcp.f32 %v834_v21 }
 0x464   :  { %v2341_v16 = vpop.eup %2340 }
 0x465   :  { %v2343_v19 = vpop.eup %2342  ;;  %v838_v20 = vmul.f32 %v2341_v16, %v2339_v13 }
 0x466   :  { %v837_v23 = vmul.f32 %v2343_v19, %v2834_v29  ;;  %v2345_v36 = vpop.eup %2344  ;;  %v843_v29 = vld [vmem:[#allocation4 + $0x80] sm:$0xff] }
 0x468   :  { %v2872_v28 = vadd.f32 %v838_v20, %v837_v23 }
 0x46a   :  { %2346 = vtanh.f32 %v2872_v28 }
 0x474   :  { %v2347_v38 = vpop.eup %2346 }
 0x475   :  { %v841_v43 = vmul.f32 %v2347_v38, %v2345_v36 }
 0x477   :  { %912 = vmatmul.mubr.f32.vlgmr.msra.gmra.mrb[8].mxu0 %v841_v43  ;;  %983 = vmatmul.mubr.f32.vlgmr.msra.gmra.mrb[8].mxu1 %v841_v43 }
 0x478   :  { %2059 = vmatpush1.bf16.msra.mxu0 %v2626_v8  ;;  %2091 = vmatpush1.bf16.msra.mxu1 %v2639_v25 }
 0x479   :  { %2061 = vmatprep.subr.bf16.mxu0 %v2628_v9  ;;  %2093 = vmatprep.subr.bf16.mxu1 %v2649_v33 }
 0x47a   :  { %1086 = vmatprep.mubr.f32.mxu0 %v2538_v0  ;;  %1157 = vmatprep.mubr.f32.mxu1 %v2538_v0 }
 0x47c   :  { %2063 = vmatpush1.bf16.msra.mxu0 %v2632_v14  ;;  %2095 = vmatpush1.bf16.msra.mxu1 %v2651_v37 }
 0x47d   :  { %2065 = vmatprep.subr.bf16.mxu0 %v2635_v17  ;;  %2097 = vmatprep.subr.bf16.mxu1 %v2657_v45 }
 0x480   :  { %2067 = vmatpush1.bf16.msra.mxu0 %v2642_v26  ;;  %2099 = vmatpush1.bf16.msra.mxu1 %v2663_v48 }
 0x481   :  { %2069 = vmatprep.subr.bf16.mxu0 %v2646_v30  ;;  %2101 = vmatprep.subr.bf16.mxu1 %v2666_v52 }
 0x484   :  { %2071 = vmatpush1.bf16.msra.mxu0 %v2655_v42  ;;  %2103 = vmatpush1.bf16.msra.mxu1 %v2675_v62 }
 0x485   :  { %2073 = vmatprep.subr.bf16.mxu0 %v2660_v46  ;;  %2105 = vmatprep.subr.bf16.mxu1 %v2678_v1 }
 0x488   :  { %2075 = vmatpush1.bf16.msra.mxu0 %v2669_v55  ;;  %2107 = vmatpush1.bf16.msra.mxu1 %v2687_v15 }
 0x489   :  { %2077 = vmatprep.subr.bf16.mxu0 %v2672_v58  ;;  %2109 = vmatprep.subr.bf16.mxu1 %v2690_v18 }
 0x48c   :  { %2079 = vmatpush1.bf16.msra.mxu0 %v2681_v7  ;;  %2111 = vmatpush1.bf16.msra.mxu1 %v2699_v31 }
 0x48d   :  { %2081 = vmatprep.subr.bf16.mxu0 %v2684_v10  ;;  %2113 = vmatprep.subr.bf16.mxu1 %v2702_v32 }
 0x490   :  { %2083 = vmatpush1.bf16.msra.mxu0 %v2693_v24  ;;  %2115 = vmatpush1.bf16.msra.mxu1 %v2709_v40 }
 0x491   :  { %2085 = vmatprep.subr.bf16.mxu0 %v2696_v27  ;;  %2117 = vmatprep.subr.bf16.mxu1 %v2712_v41 }
 0x494   :  { %2087 = vmatpush1.bf16.msra.mxu0 %v2705_v39  ;;  %2119 = vmatpush1.bf16.msra.mxu1 %v2716_v47 }
 0x495   :  { %2121 = vmatprep.subr.bf16.mxu0 %v2624_v4  ;;  %2153 = vmatprep.subr.bf16.mxu1 %v2637_v22 }
 0x54a   :  { %v913_v35 = vpop.f32.mrb[8].mxu0  ;;  %v984_v44 = vpop.f32.mrb[8].mxu1 }
 0x54b   :  { %v989_v49 = vadd.f32 %v913_v35, %v843_v29  ;;  %v915_v50 = vpop.f32.mrb[9].mxu0  ;;  %v986_v51 = vpop.f32.mrb[9].mxu1  ;;  %v991_v63 = vadd.f32 %v984_v44, %v845_v60  ;;  %v1019_v29 = vld [vmem:[#allocation4 + $0xa8] sm:$0xff] }
 0x54c   :  { %v990_v53 = vadd.f32 %v915_v50, %v844_v34  ;;  %v992_v59 = vadd.f32 %v986_v51, %v846_v57 }
 0x54d   :  { %v1671_v54 = vmul.f32 -1.442695, %v989_v49 }
 0x54e   :  { %v1672_v56 = vmul.f32 -1.442695, %v990_v53  ;;  %v1673_v61 = vmul.f32 -1.442695, %v992_v59  ;;  %v1020_v59 = vld [vmem:[#allocation4 + $0xb0] sm:$0xff] }
 0x54f   :  { %2348 = vpow2.f32 %v1671_v54 }
 0x550   :  { %2350 = vpow2.f32 %v1672_v56  ;;  %v1021_v56 = vld [vmem:[#allocation4 + $0xb8] sm:$0xff] }
 0x551   :  { %2352 = vpow2.f32 %v1673_v61 }
 0x552   :  { %2354 = vtanh.f32 %v991_v63 }
 0x559   :  { %v2349_v2 = vpop.eup %2348 }
 0x55a   :  { %v2351_v3 = vpop.eup %2350  ;;  %v996_v5 = vadd.f32 1.0, %v2349_v2 }
 0x55b   :  { %v1002_v6 = vadd.f32 1.0, %v2351_v3  ;;  %v2353_v11 = vpop.eup %2352 }
 0x55c   :  { %2356 = vrcp.f32 %v996_v5  ;;  %v2355_v12 = vpop.eup %2354  ;;  %v1009_v20 = vadd.f32 1.0, %v2353_v11 }
 0x55d   :  { %2358 = vrcp.f32 %v1002_v6 }
 0x55e   :  { %2360 = vrcp.f32 %v1009_v20 }
 0x566   :  { %v2357_v13 = vpop.eup %2356 }
 0x567   :  { %v2359_v16 = vpop.eup %2358  ;;  %v1013_v19 = vmul.f32 %v2357_v13, %v2355_v12 }
 0x568   :  { %v1012_v21 = vmul.f32 %v2359_v16, %v2872_v28  ;;  %v2361_v36 = vpop.eup %2360  ;;  %v1018_v28 = vld [vmem:[#allocation4 + $0xa0] sm:$0xff] }
 0x56a   :  { %v2910_v23 = vadd.f32 %v1013_v19, %v1012_v21 }
 0x56c   :  { %2362 = vtanh.f32 %v2910_v23 }
 0x576   :  { %v2363_v38 = vpop.eup %2362 }
 0x577   :  { %v1016_v43 = vmul.f32 %v2363_v38, %v2361_v36  ;;  %v1548_v38 = vld [vmem:[#allocation9 + $0x8] sm:$0xff] }
 0x579   :  { %1087 = vmatmul.mubr.f32.vlgmr.msra.gmra.mrb[10].mxu0 %v1016_v43  ;;  %1158 = vmatmul.mubr.f32.vlgmr.msra.gmra.mrb[10].mxu1 %v1016_v43 }
 0x57a   :  { %2123 = vmatpush1.bf16.msra.mxu0 %v2626_v8  ;;  %2155 = vmatpush1.bf16.msra.mxu1 %v2639_v25 }
 0x57b   :  { %2125 = vmatprep.subr.bf16.mxu0 %v2628_v9  ;;  %2157 = vmatprep.subr.bf16.mxu1 %v2649_v33 }
 0x57c   :  { %1261 = vmatprep.mubr.f32.mxu0 %v2538_v0  ;;  %1332 = vmatprep.mubr.f32.mxu1 %v2538_v0 }
 0x57e   :  { %2127 = vmatpush1.bf16.msra.mxu0 %v2632_v14  ;;  %2159 = vmatpush1.bf16.msra.mxu1 %v2651_v37 }
 0x57f   :  { %2129 = vmatprep.subr.bf16.mxu0 %v2635_v17  ;;  %2161 = vmatprep.subr.bf16.mxu1 %v2657_v45 }
 0x582   :  { %2131 = vmatpush1.bf16.msra.mxu0 %v2642_v26  ;;  %2163 = vmatpush1.bf16.msra.mxu1 %v2663_v48 }
 0x583   :  { %2133 = vmatprep.subr.bf16.mxu0 %v2646_v30  ;;  %2165 = vmatprep.subr.bf16.mxu1 %v2666_v52 }
 0x586   :  { %2135 = vmatpush1.bf16.msra.mxu0 %v2655_v42  ;;  %2167 = vmatpush1.bf16.msra.mxu1 %v2675_v62 }
 0x587   :  { %2137 = vmatprep.subr.bf16.mxu0 %v2660_v46  ;;  %2169 = vmatprep.subr.bf16.mxu1 %v2678_v1 }
 0x58a   :  { %2139 = vmatpush1.bf16.msra.mxu0 %v2669_v55  ;;  %2171 = vmatpush1.bf16.msra.mxu1 %v2687_v15 }
 0x58b   :  { %2141 = vmatprep.subr.bf16.mxu0 %v2672_v58  ;;  %2173 = vmatprep.subr.bf16.mxu1 %v2690_v18 }
 0x58e   :  { %2143 = vmatpush1.bf16.msra.mxu0 %v2681_v7  ;;  %2175 = vmatpush1.bf16.msra.mxu1 %v2699_v31 }
 0x58f   :  { %2145 = vmatprep.subr.bf16.mxu0 %v2684_v10  ;;  %2177 = vmatprep.subr.bf16.mxu1 %v2702_v32 }
 0x592   :  { %2147 = vmatpush1.bf16.msra.mxu0 %v2693_v24  ;;  %2179 = vmatpush1.bf16.msra.mxu1 %v2709_v40 }
 0x593   :  { %2149 = vmatprep.subr.bf16.mxu0 %v2696_v27  ;;  %2181 = vmatprep.subr.bf16.mxu1 %v2712_v41 }
 0x596   :  { %2151 = vmatpush1.bf16.msra.mxu0 %v2705_v39  ;;  %2183 = vmatpush1.bf16.msra.mxu1 %v2716_v47 }
 0x597   :  { %2185 = vmatprep.subr.bf16.mxu0 %v2624_v4  ;;  %2217 = vmatprep.subr.bf16.mxu1 %v2637_v22 }
 0x64c   :  { %v1088_v34 = vpop.f32.mrb[10].mxu0  ;;  %v1159_v35 = vpop.f32.mrb[10].mxu1 }
 0x64d   :  { %v1164_v44 = vadd.f32 %v1088_v34, %v1018_v28  ;;  %v1090_v49 = vpop.f32.mrb[11].mxu0  ;;  %v1161_v50 = vpop.f32.mrb[11].mxu1  ;;  %v1166_v61 = vadd.f32 %v1159_v35, %v1020_v59  ;;  %v2539_v28 = vmov 0.0|0.0   ;;  %v1550_v34 = vld [vmem:[#allocation9 + $0x18] sm:$0xff] }
 0x64e   :  { %v1165_v51 = vadd.f32 %v1090_v49, %v1019_v29  ;;  %v1167_v57 = vadd.f32 %v1161_v50, %v1021_v56  ;;  %v1549_v29 = vld [vmem:[#allocation9 + $0x10] sm:$0xff]  ;;  %v1552_v49 = vld [vmem:[#allocation9 + $0x28] sm:$0xff]  ;;  %v1555_v56 = vld [vmem:[#allocation9 + $0x40] sm:$0xff] }
 0x64f   :  { %v1674_v53 = vmul.f32 -1.442695, %v1164_v44  ;;  %v2252_v35 = vpack.c.bf16 %v1550_v34, %v1549_v29  ;;  %v1551_v44 = vld [vmem:[#allocation9 + $0x20] sm:$0xff] }
 0x650   :  { %v1675_v54 = vmul.f32 -1.442695, %v1165_v51  ;;  %v1676_v60 = vmul.f32 -1.442695, %v1167_v57  ;;  %v2255_v50 = vpack.c.bf16 %v1552_v49, %v1551_v44  ;;  %v1553_v51 = vld [vmem:[#allocation9 + $0x30] sm:$0xff]  ;;  %v1556_v57 = vld [vmem:[#allocation9 + $0x48] sm:$0xff] }
 0x651   :  { %2364 = vpow2.f32 %v1674_v53  ;;  %v1554_v53 = vld [vmem:[#allocation9 + $0x38] sm:$0xff]  ;;  %v2261_v59 = vpack.c.bf16 %v1556_v57, %v1555_v56 }
 0x652   :  { %2366 = vpow2.f32 %v1675_v54  ;;  %v2258_v54 = vpack.c.bf16 %v1554_v53, %v1553_v51 }
 0x653   :  { %2368 = vpow2.f32 %v1676_v60  ;;  %v1557_v60 = vld [vmem:[#allocation9 + $0x50] sm:$0xff] }
 0x654   :  { %2370 = vtanh.f32 %v1166_v61  ;;  %v1558_v61 = vld [vmem:[#allocation9 + $0x58] sm:$0xff] }
 0x65b   :  { %v2365_v4 = vpop.eup %2364 }
 0x65c   :  { %v2367_v63 = vpop.eup %2366  ;;  %v1171_v22 = vadd.f32 1.0, %v2365_v4  ;;  %v1559_v4 = vld [vmem:[#allocation9 + $0x60] sm:$0xff] }
 0x65d   :  { %v1177_v2 = vadd.f32 1.0, %v2367_v63  ;;  %v2369_v3 = vpop.eup %2368  ;;  %v2264_v63 = vpack.c.bf16 %v1558_v61, %v1557_v60 }
 0x65e   :  { %2372 = vrcp.f32 %v1171_v22  ;;  %v2371_v5 = vpop.eup %2370  ;;  %v1184_v13 = vadd.f32 1.0, %v2369_v3  ;;  %v1560_v22 = vld [vmem:[#allocation9 + $0x68] sm:$0xff]  ;;  %v1561_v3 = vld [vmem:[#allocation9 + $0x70] sm:$0xff] }
 0x65f   :  { %2374 = vrcp.f32 %v1177_v2  ;;  %v2267_v2 = vpack.c.bf16 %v1560_v22, %v1559_v4 }
 0x660   :  { %2376 = vrcp.f32 %v1184_v13 }
 0x668   :  { %v2373_v6 = vpop.eup %2372 }
 0x669   :  { %v2375_v11 = vpop.eup %2374  ;;  %v1188_v12 = vmul.f32 %v2373_v6, %v2371_v5  ;;  %v1562_v5 = vld [vmem:[#allocation9 + $0x78] sm:$0xff] }
 0x66a   :  { %v1187_v16 = vmul.f32 %v2375_v11, %v2910_v23  ;;  %v2377_v20 = vpop.eup %2376  ;;  %v1547_v23 = vld [vmem:[#allocation9] sm:$0xff]  ;;  %v2270_v6 = vpack.c.bf16 %v1562_v5, %v1561_v3 }
 0x66b   :  { %v2249_v43 = vpack.c.bf16 %v1548_v38, %v1547_v23  ;;  %v1368_v11 = vld [vmem:[#allocation4 + $0xe0] sm:$0xff] }
 0x66c   :  { %v2948_v19 = vadd.f32 %v1188_v12, %v1187_v16  ;;  %v1369_v12 = vld [vmem:[#allocation4 + $0xe8] sm:$0xff] }
 0x66e   :  { %2378 = vtanh.f32 %v2948_v19 }
 0x678   :  { %v2379_v21 = vpop.eup %2378 }
 0x679   :  { %v1191_v36 = vmul.f32 %v2379_v21, %v2377_v20 }
 0x67b   :  { %1262 = vmatmul.mubr.f32.vlgmr.msra.gmra.mrb[12].mxu0 %v1191_v36  ;;  %1333 = vmatmul.mubr.f32.vlgmr.msra.gmra.mrb[12].mxu1 %v1191_v36 }
 0x67c   :  { %2187 = vmatpush1.bf16.msra.mxu0 %v2626_v8  ;;  %2219 = vmatpush1.bf16.msra.mxu1 %v2639_v25  ;;  %v1193_v8 = vld [vmem:[#allocation4 + $0xc0] sm:$0xff] }
 0x67d   :  { %2189 = vmatprep.subr.bf16.mxu0 %v2628_v9  ;;  %2221 = vmatprep.subr.bf16.mxu1 %v2649_v33  ;;  %v1194_v9 = vld [vmem:[#allocation4 + $0xc8] sm:$0xff] }
 0x67e   :  { %1436 = vmatprep.mubr.f32.mxu0 %v2538_v0  ;;  %1507 = vmatprep.mubr.f32.mxu1 %v2538_v0 }
 0x680   :  { %2191 = vmatpush1.bf16.msra.mxu0 %v2632_v14  ;;  %2223 = vmatpush1.bf16.msra.mxu1 %v2651_v37 }
 0x681   :  { %2193 = vmatprep.subr.bf16.mxu0 %v2635_v17  ;;  %2225 = vmatprep.subr.bf16.mxu1 %v2657_v45  ;;  %v1196_v45 = vld [vmem:[#allocation4 + $0xd8] sm:$0xff] }
 0x684   :  { %2195 = vmatpush1.bf16.msra.mxu0 %v2642_v26  ;;  %2227 = vmatpush1.bf16.msra.mxu1 %v2663_v48  ;;  %v1195_v48 = vld [vmem:[#allocation4 + $0xd0] sm:$0xff] }
 0x685   :  { %2197 = vmatprep.subr.bf16.mxu0 %v2646_v30  ;;  %2229 = vmatprep.subr.bf16.mxu1 %v2666_v52 }
 0x688   :  { %2199 = vmatpush1.bf16.msra.mxu0 %v2655_v42  ;;  %2231 = vmatpush1.bf16.msra.mxu1 %v2675_v62 }
 0x689   :  { %2201 = vmatprep.subr.bf16.mxu0 %v2660_v46  ;;  %2233 = vmatprep.subr.bf16.mxu1 %v2678_v1 }
 0x68c   :  { %2203 = vmatpush1.bf16.msra.mxu0 %v2669_v55  ;;  %2235 = vmatpush1.bf16.msra.mxu1 %v2687_v15 }
 0x68d   :  { %2205 = vmatprep.subr.bf16.mxu0 %v2672_v58  ;;  %2237 = vmatprep.subr.bf16.mxu1 %v2690_v18 }
 0x690   :  { %2207 = vmatpush1.bf16.msra.mxu0 %v2681_v7  ;;  %2239 = vmatpush1.bf16.msra.mxu1 %v2699_v31 }
 0x691   :  { %2209 = vmatprep.subr.bf16.mxu0 %v2684_v10  ;;  %2241 = vmatprep.subr.bf16.mxu1 %v2702_v32 }
 0x694   :  { %2211 = vmatpush1.bf16.msra.mxu0 %v2693_v24  ;;  %2243 = vmatpush1.bf16.msra.mxu1 %v2709_v40 }
 0x695   :  { %2213 = vmatprep.subr.bf16.mxu0 %v2696_v27  ;;  %2245 = vmatprep.subr.bf16.mxu1 %v2712_v41 }
 0x698   :  { %2215 = vmatpush1.bf16.msra.mxu0 %v2705_v39  ;;  %2247 = vmatpush1.bf16.msra.mxu1 %v2716_v47 }
 0x699   :  { %2248 = vmatprep.subr.bf16.mxu0 %v2539_v28 }
 0x74e   :  { %v1263_v14 = vpop.f32.mrb[12].mxu0  ;;  %v1334_v17 = vpop.f32.mrb[12].mxu1 }
 0x74f   :  { %v1339_v25 = vadd.f32 %v1263_v14, %v1193_v8  ;;  %v1265_v26 = vpop.f32.mrb[13].mxu0  ;;  %v1336_v30 = vpop.f32.mrb[13].mxu1  ;;  %v1341_v55 = vadd.f32 %v1334_v17, %v1195_v48  ;;  %v1370_v17 = vld [vmem:[#allocation4 + $0xf0] sm:$0xff] }
 0x750   :  { %v1340_v33 = vadd.f32 %v1265_v26, %v1194_v9  ;;  %v1342_v46 = vadd.f32 %v1336_v30, %v1196_v45 }
 0x751   :  { %v1677_v37 = vmul.f32 -1.442695, %v1339_v25 }
 0x752   :  { %v1678_v42 = vmul.f32 -1.442695, %v1340_v33  ;;  %v1679_v52 = vmul.f32 -1.442695, %v1342_v46 }
 0x753   :  { %2380 = vpow2.f32 %v1677_v37 }
 0x754   :  { %2382 = vpow2.f32 %v1678_v42 }
 0x755   :  { %2384 = vpow2.f32 %v1679_v52 }
 0x756   :  { %2386 = vtanh.f32 %v1341_v55 }
 0x75d   :  { %v2381_v58 = vpop.eup %2380 }
 0x75e   :  { %v2383_v62 = vpop.eup %2382  ;;  %v1346_v1 = vadd.f32 1.0, %v2381_v58 }
 0x75f   :  { %v1352_v7 = vadd.f32 1.0, %v2383_v62  ;;  %v2385_v10 = vpop.eup %2384 }
 0x760   :  { %2388 = vrcp.f32 %v1346_v1  ;;  %v2387_v15 = vpop.eup %2386  ;;  %v1359_v31 = vadd.f32 1.0, %v2385_v10 }
 0x761   :  { %2390 = vrcp.f32 %v1352_v7 }
 0x762   :  { %2392 = vrcp.f32 %v1359_v31 }
 0x76a   :  { %v2389_v18 = vpop.eup %2388 }
 0x76b   :  { %v2391_v24 = vpop.eup %2390  ;;  %v1363_v27 = vmul.f32 %v2389_v18, %v2387_v15  ;;  %v1683_v18 = vld [vmem:[#allocation10] ss:$0 sm:$0xff] }
 0x76c   :  { %v1362_v32 = vmul.f32 %v2391_v24, %v2948_v19  ;;  %v2393_v40 = vpop.eup %2392 }
 0x76e   :  { %v2984_v39 = vadd.f32 %v1363_v27, %v1362_v32 }
 0x770   :  { %2394 = vtanh.f32 %v2984_v39 }
 0x77a   :  { %v2395_v41 = vpop.eup %2394 }
 0x77b   :  { %v1366_v47 = vmul.f32 %v2395_v41, %v2393_v40 }
 0x77d   :  { %1437 = vmatmul.mubr.f32.vlgmr.msra.gmra.mrb[14].mxu0 %v1366_v47  ;;  %1508 = vmatmul.mubr.f32.vlgmr.msra.gmra.mrb[14].mxu1 %v1366_v47 }
 0x77e   :  { %2250 = vmatpush3.bf16.msra.mxu0 %v2249_v43  ;;  %1733 = vmatprep.mubr.msk.f32.mxu0 %vm2540_vm0, %v2538_v0  ;;  %v1371_v0 = vld [vmem:[#allocation4 + $0xf8] sm:$0xff] }
 0x77f   :  { %2251 = vmatprep.subr.bf16.mxu0 %v2539_v28 }
 0x782   :  { %2253 = vmatpush3.bf16.msra.mxu0 %v2252_v35 }
 0x783   :  { %2254 = vmatprep.subr.bf16.mxu0 %v2539_v28 }
 0x786   :  { %2256 = vmatpush3.bf16.msra.mxu0 %v2255_v50 }
 0x787   :  { %2257 = vmatprep.subr.bf16.mxu0 %v2539_v28 }
 0x78a   :  { %2259 = vmatpush3.bf16.msra.mxu0 %v2258_v54 }
 0x78b   :  { %2260 = vmatprep.subr.bf16.mxu0 %v2539_v28 }
 0x78e   :  { %2262 = vmatpush3.bf16.msra.mxu0 %v2261_v59 }
 0x78f   :  { %2263 = vmatprep.subr.bf16.mxu0 %v2539_v28 }
 0x792   :  { %2265 = vmatpush3.bf16.msra.mxu0 %v2264_v63 }
 0x793   :  { %2266 = vmatprep.subr.bf16.mxu0 %v2539_v28 }
 0x796   :  { %2268 = vmatpush3.bf16.msra.mxu0 %v2267_v2 }
 0x797   :  { %2269 = vmatprep.subr.bf16.mxu0 %v2539_v28 }
 0x79a   :  { %2271 = vmatpush3.bf16.msra.mxu0 %v2270_v6 }
 0x850   :  { %v1438_v13 = vpop.f32.mrb[14].mxu0  ;;  %v1509_v16 = vpop.f32.mrb[14].mxu1 }
 0x851   :  { %v1514_v19 = vadd.f32 %v1438_v13, %v1368_v11  ;;  %v1440_v20 = vpop.f32.mrb[15].mxu0  ;;  %v1511_v21 = vpop.f32.mrb[15].mxu1  ;;  %v1516_v26 = vadd.f32 %v1509_v16, %v1370_v17 }
 0x852   :  { %v1515_v36 = vadd.f32 %v1440_v20, %v1369_v12  ;;  %v1517_v14 = vadd.f32 %v1511_v21, %v1371_v0 }
 0x853   :  { %v1680_v8 = vmul.f32 -1.442695, %v1514_v19 }
 0x854   :  { %v1681_v9 = vmul.f32 -1.442695, %v1515_v36  ;;  %v1682_v25 = vmul.f32 -1.442695, %v1517_v14 }
 0x855   :  { %2396 = vpow2.f32 %v1680_v8 }
 0x856   :  { %2398 = vpow2.f32 %v1681_v9 }
 0x857   :  { %2400 = vpow2.f32 %v1682_v25 }
 0x858   :  { %2402 = vtanh.f32 %v1516_v26 }
 0x85f   :  { %v2397_v30 = vpop.eup %2396 }
 0x860   :  { %v2399_v33 = vpop.eup %2398  ;;  %v1521_v37 = vadd.f32 1.0, %v2397_v30 }
 0x861   :  { %v1527_v42 = vadd.f32 1.0, %v2399_v33  ;;  %v2401_v45 = vpop.eup %2400 }
 0x862   :  { %2404 = vrcp.f32 %v1521_v37  ;;  %v2403_v46 = vpop.eup %2402  ;;  %v1534_v58 = vadd.f32 1.0, %v2401_v45 }
 0x863   :  { %2406 = vrcp.f32 %v1527_v42 }
 0x864   :  { %2408 = vrcp.f32 %v1534_v58 }
 0x86c   :  { %v2405_v48 = vpop.eup %2404 }
 0x86d   :  { %v2407_v52 = vpop.eup %2406  ;;  %v1538_v55 = vmul.f32 %v2405_v48, %v2403_v46 }
 0x86e   :  { %v1537_v62 = vmul.f32 %v2407_v52, %v2984_v39  ;;  %v2409_v7 = vpop.eup %2408 }
 0x870   :  { %v1539_v1 = vadd.f32 %v1538_v55, %v1537_v62 }
 0x872   :  { %2410 = vtanh.f32 %v1539_v1 }
 0x87c   :  { %v2411_v10 = vpop.eup %2410 }
 0x87d   :  { %v1541_v15 = vmul.f32 %v2411_v10, %v2409_v7 }
 0x87f   :  { %1734 = vmatmul.mubr.f32.vlgmr.msra.gmra.mrb[16].mxu0 %v1541_v15 }
 0x952   :  { %v1636_v24 = vpop.f32.mrb[16].mxu0 }
 0x953   :  { %v1637_v27 = vadd.f32 %v1683_v18, %v1636_v24  ;;  %v1735_v31 = vpop.f32.mrb[17].mxu0 }
 0x955   :  { %1641 = vst.msk [vmem:[#allocation12] sm:$0xff] %vm1640_vm1, %v1637_v27 }
 0x956   :  { %2511 = shalt.err (!%p2508_p8)
}
 0x957   :  { %s2512_s16 = scalar_lea.hbm %s3005_s4, 128 }
 0x958   :  { %p2513_p9 = scmp.ne.s32.totalorder %s3005_s4, %s2512_s16  ;;  %p2516_p10 = scmp.lt.u32.totalorder %s2512_s16, %s3005_s4 }
 0x95a   :  { %p2518_p11 = pnand %p2516_p10, %p2513_p9 }
 0x95c   :  { %2521 = shalt.err (!%p2518_p11)
}
 0x95d   :  { %1651 = dma.vmem_to_hbm [thread:$0]  %s1649_s1, 128, %s3005_s4, [#allocation6]  }
 0x95e   :  { %2528 = dma.done.wait [#allocation6], 128  }
 0x95f   :  { %2529 = vsyncadd [#allocation6], 4294967168 }
 0x960   :  { %1655 = vsyncpa [#allocation5], 1 }
 0x961   :  { %1656 = vsyncpa [#allocation8], 1 }
 0x962   :  { %1657 = vsyncpa [#allocation11], 1 }
 0x963   :  { %1658 = vsyncpa [#allocation6], 1 }

</bundles_post_ra>
